<compile_context>
chip_gen: v7x
topology: tpu7x:2x2x1
jax: 0.10.0
libtpu: 0.0.40
codegen_flags: <defaults>
</compile_context>

<pallas_src>
import functools

import jax
import jax.numpy as jnp
from jax import lax
from jax.experimental import pallas as pl
from jax.experimental.pallas import tpu as pltpu


def _round_up(x, m):
    return (x + m - 1) // m * m


def _vmem_limit_bytes(need_bytes):
    """Scoped-VMEM limit from actual block/scratch bytes, capped per chip gen."""
    try:
        cap = int(pltpu.get_tpu_info().vmem_capacity_bytes)
    except Exception:
        cap = 64 * 1024 * 1024  # conservative (v7x per-TC VMEM)
    return int(min(max(need_bytes + (8 << 20), 32 << 20), cap * 3 // 4))


def _pick_strip_h(H, W, max_rows):
    """Largest divisor of H whose strip row-count is a multiple of 8 and fits."""
    cands = [sh for sh in range(1, H + 1)
             if H % sh == 0 and (sh * W) % 8 == 0 and sh * W <= max_rows]
    return max(cands) if cands else H


def _pick_tm(R, cap=1024):
    """Largest divisor of R that is a multiple of 8 and <= cap."""
    cands = [tm for tm in range(8, min(R, cap) + 1, 8) if R % tm == 0]
    if cands:
        return max(cands)
    return R  # TODO(synk): ragged row grids for R not a multiple of 8


# ----------------------------------------------------------------------------
# Kernel 1: 3x3 SAME conv (row strips, 1-row halo) via bf16 im2col + one MXU
# matmul, fused per-strip BatchNorm partial sums.
# ----------------------------------------------------------------------------
def _conv3x3_bnstats_kernel(x_ref, w_ref, y_ref, stats_ref, xp_ref, patch_ref,
                            *, strip_h, W, Cin):
    # x_ref    : (1, H, W, Cin)            bf16 full input image
    # w_ref    : (Kpad, Cpad)              bf16 weight, rows ordered (kh,kw,ci)
    # y_ref    : (1, strip_h*W, Cpad)      bf16 conv output strip
    # stats_ref: (1, 2, Cpad)              f32 per-strip [sum, sumsq]
    # xp_ref   : (strip_h+2, W+2, Cin)     bf16 scratch, padded strip
    # patch_ref: (strip_h*W, Kpad)         bf16 scratch, im2col patches
    sh = strip_h
    s = pl.program_id(1)
    n_strips = pl.num_programs(1)
    r0 = s * sh

    zrow = jnp.zeros((1, W, Cin), dtype=xp_ref.dtype)
    zcol = jnp.zeros((sh + 2, 1, Cin), dtype=xp_ref.dtype)

    # Zero only the halo borders (conv padding=1); interiors are fully written
    # below, so this stays correct under multi-core grid sharding.
    xp_ref[:, 0:1, :] = zcol
    xp_ref[:, W + 1:W + 2, :] = zcol

    # Interior rows of this strip.
    xp_ref[1:sh + 1, 1:W + 1, :] = x_ref[0, pl.ds(r0, sh), :, :]

    # Top halo row: image row r0-1 (or zeros at the image boundary).
    @pl.when(s == 0)
    def _():
        xp_ref[0:1, 1:W + 1, :] = zrow

    @pl.when(s > 0)
    def _():
        xp_ref[0:1, 1:W + 1, :] = x_ref[0, pl.ds(r0 - 1, 1), :, :]

    # Bottom halo row: image row r0+sh (or zeros at the image boundary).
    @pl.when(s == n_strips - 1)
    def _():
        xp_ref[sh + 1:sh + 2, 1:W + 1, :] = zrow

    @pl.when(s < n_strips - 1)
    def _():
        xp_ref[sh + 1:sh + 2, 1:W + 1, :] = x_ref[0, pl.ds(r0 + sh, 1), :, :]

    # Zero only the K-pad column strip (weight rows there are zero, but keep
    # the patch defined so 0 * uninitialized(NaN) cannot poison the matmul).
    kc = 9 * Cin
    if patch_ref.shape[1] > kc:
        patch_ref[:, kc:] = jnp.zeros(
            (patch_ref.shape[0], patch_ref.shape[1] - kc),
            dtype=patch_ref.dtype)

    # im2col in bf16: tap t = kh*3 + kw occupies columns [t*Cin, (t+1)*Cin).
    for kh in range(3):
        for kw in range(3):
            t = kh * 3 + kw
            patch_ref[:, t * Cin:(t + 1) * Cin] = (
                xp_ref[kh:kh + sh, kw:kw + W, :].reshape(sh * W, Cin))

    # Single MXU matmul: bf16 x bf16 -> f32 accumulate.
    acc = jnp.dot(patch_ref[...], w_ref[...],
                  preferred_element_type=jnp.float32)

    y_ref[0] = acc.astype(y_ref.dtype)
    # Per-channel partial sums for BatchNorm from the on-chip f32 accumulator.
    stats_ref[0, 0:1, :] = jnp.sum(acc, axis=0, keepdims=True)
    stats_ref[0, 1:2, :] = jnp.sum(acc * acc, axis=0, keepdims=True)


def conv3x3_same_with_stats(x_nhwc_bf16, wmat_bf16, *, H, W, Cin, Kpad, Cpad,
                            strip_h):
    N = x_nhwc_bf16.shape[0]
    n_strips = H // strip_h
    rows = strip_h * W
    kernel = functools.partial(_conv3x3_bnstats_kernel,
                               strip_h=strip_h, W=W, Cin=Cin)

    # Double-buffered blocks + single-buffered scratch.
    blk = 2 * (H * W * Cin * 2 + Kpad * Cpad * 2 + rows * Cpad * 2 + 2 * Cpad * 4)
    scr = (strip_h + 2) * (W + 2) * Cin * 2 + rows * Kpad * 2
    vmem_limit = _vmem_limit_bytes(blk + scr)

    return pl.pallas_call(
        kernel,
        out_shape=(
            jax.ShapeDtypeStruct((N, H * W, Cpad), jnp.bfloat16),
            jax.ShapeDtypeStruct((N * n_strips, 2, Cpad), jnp.float32),
        ),
        grid_spec=pltpu.PrefetchScalarGridSpec(
            num_scalar_prefetch=0,
            grid=(N, n_strips),
            in_specs=[
                pl.BlockSpec((1, H, W, Cin), lambda n, s: (n, 0, 0, 0)),
                pl.BlockSpec((Kpad, Cpad), lambda n, s: (0, 0)),
            ],
            out_specs=[
                pl.BlockSpec((1, rows, Cpad), lambda n, s: (n, s, 0)),
                pl.BlockSpec((1, 2, Cpad),
                             lambda n, s: (n * n_strips + s, 0, 0)),
            ],
            scratch_shapes=[
                pltpu.VMEM((strip_h + 2, W + 2, Cin), jnp.bfloat16),
                pltpu.VMEM((rows, Kpad), jnp.bfloat16),
            ],
        ),
        compiler_params=pltpu.CompilerParams(
            dimension_semantics=("parallel", "parallel"),
            vmem_limit_bytes=vmem_limit),
    )(x_nhwc_bf16, wmat_bf16)


# ----------------------------------------------------------------------------
# Kernel 2: fused BatchNorm (precomputed scale/shift) + ReLU, lane-dense tiles.
# ----------------------------------------------------------------------------
def _bn_relu_kernel(y_ref, scale_ref, shift_ref, o_ref):
    y = y_ref[...].astype(jnp.float32)
    o_ref[...] = jnp.maximum(y * scale_ref[...] + shift_ref[...], 0.0)


def bn_relu_rows(y2d, scale_row, shift_row, *, tm):
    R, C = y2d.shape
    need = 2 * (tm * C * 2 + tm * C * 4 + 4 * C * 4)
    vmem_limit = _vmem_limit_bytes(need)
    return pl.pallas_call(
        _bn_relu_kernel,
        out_shape=jax.ShapeDtypeStruct((R, C), jnp.float32),
        grid_spec=pltpu.PrefetchScalarGridSpec(
            num_scalar_prefetch=0,
            grid=(R // tm,),
            in_specs=[
                pl.BlockSpec((tm, C), lambda i: (i, 0)),
                pl.BlockSpec((1, C), lambda i: (0, 0)),
                pl.BlockSpec((1, C), lambda i: (0, 0)),
            ],
            out_specs=pl.BlockSpec((tm, C), lambda i: (i, 0)),
        ),
        compiler_params=pltpu.CompilerParams(
            dimension_semantics=("parallel",),
            vmem_limit_bytes=vmem_limit),
    )(y2d, scale_row, shift_row)


# ----------------------------------------------------------------------------
# Full DeConvBlock forward (NCHW in / NCHW out, matching the PyTorch module).
# ----------------------------------------------------------------------------
def deconv_block_forward(x_nchw, wt, gamma, beta, eps=1e-5,
                         max_rows_per_strip=512):
    # wt: ConvTranspose2d weight, shape (Cin, Cout, 3, 3) (PyTorch convention)
    N, Cin, H, W = x_nchw.shape
    Cout = wt.shape[1]
    # MXU N dim: 256-multiples when Cout allows (v6e/v7x), else 128.
    Cpad = _round_up(Cout, 256 if Cout >= 256 else 128)
    # K only padded to the bf16 sublane quantum, not 128.
    Kpad = _round_up(9 * Cin, 16)

    # NHWC, bf16 for the MXU (cast fused with the layout transpose).
    x_nhwc = jnp.transpose(x_nchw, (0, 2, 3, 1)).astype(jnp.bfloat16)

    # Equivalent regular-conv weight: W_conv[kh,kw,ci,co] = wt[ci,co,2-kh,2-kw],
    # flattened to (9*Cin, Cout) with K rows ordered (kh, kw, ci), zero-padded.
    w_hwio = jnp.transpose(jnp.flip(wt, axis=(2, 3)), (2, 3, 0, 1))
    wmat = w_hwio.reshape(9 * Cin, Cout).astype(jnp.bfloat16)
    wmat = jnp.pad(wmat, ((0, Kpad - 9 * Cin), (0, Cpad - Cout)))

    strip_h = _pick_strip_h(H, W, max_rows_per_strip)

    y_pad, stats = conv3x3_same_with_stats(
        x_nhwc, wmat, H=H, W=W, Cin=Cin, Kpad=Kpad, Cpad=Cpad,
        strip_h=strip_h)

    # BatchNorm2d training-mode batch statistics from the fused partial sums.
    cnt = jnp.float32(N * H * W)
    totals = jnp.sum(stats, axis=0)                        # (2, Cpad)
    mean = totals[0] / cnt
    var = jnp.maximum(totals[1] / cnt - mean * mean, 0.0)  # biased, eps-guarded
    gamma_p = jnp.pad(gamma.astype(jnp.float32), (0, Cpad - Cout))
    beta_p = jnp.pad(beta.astype(jnp.float32), (0, Cpad - Cout))
    scale = gamma_p * lax.rsqrt(var + eps)
    shift = beta_p - mean * scale

    # Fused BN + ReLU over large lane-dense row tiles of the bf16 activation.
    R = N * H * W
    tm = _pick_tm(R)
    y2d = y_pad.reshape(R, Cpad)
    out2d = bn_relu_rows(y2d, scale.reshape(1, Cpad), shift.reshape(1, Cpad),
                         tm=tm)

    out = out2d[:, :Cout].reshape(N, H, W, Cout)
    return jnp.transpose(out, (0, 3, 1, 2))


if __name__ == "__main__":
    key = jax.random.PRNGKey(0)
    kx, kw = jax.random.split(key)

    N, Cin, Cout, Hs, Ws = 2, 4, 8, 16, 16
    x = jax.random.normal(kx, (N, Cin, Hs, Ws), dtype=jnp.float32)
    # ConvTranspose2d weight: (in_channels, out_channels, kH, kW)
    wt = jax.random.normal(kw, (Cin, Cout, 3, 3), dtype=jnp.float32) * 0.1
    gamma = jnp.ones((Cout,), jnp.float32)   # BatchNorm2d init: weight = 1
    beta = jnp.zeros((Cout,), jnp.float32)   # BatchNorm2d init: bias  = 0

    # Force 2 row strips at this tiny size so the halo path is exercised.
    fwd = jax.jit(functools.partial(deconv_block_forward,
                                    max_rows_per_strip=128))
    out = jax.block_until_ready(fwd(x, wt, gamma, beta))

    # Pure-JAX reference (mirrors the kernel's bf16 matmul inputs and bf16
    # activation intermediate so the comparison tolerance can stay tight).
    x_bf = x.astype(jnp.bfloat16).astype(jnp.float32)
    wt_bf = wt.astype(jnp.bfloat16).astype(jnp.float32)
    x_nhwc = jnp.transpose(x_bf, (0, 2, 3, 1))
    w_hwio = jnp.transpose(jnp.flip(wt_bf, axis=(2, 3)), (2, 3, 0, 1))
    y_f32 = lax.conv_general_dilated(
        x_nhwc, w_hwio, window_strides=(1, 1), padding="SAME",
        dimension_numbers=("NHWC", "HWIO", "NHWC"))
    mean = jnp.mean(y_f32, axis=(0, 1, 2))
    var = jnp.var(y_f32, axis=(0, 1, 2))
    y_bf = y_f32.astype(jnp.bfloat16).astype(jnp.float32)
    y_bn = (y_bf - mean) * lax.rsqrt(var + 1e-5) * gamma + beta
    ref = jnp.transpose(jnp.maximum(y_bn, 0.0), (0, 3, 1, 2))

    assert out.shape == (N, Cout, Hs, Ws)
    assert jnp.allclose(out, ref, atol=1e-2, rtol=1e-2), "mismatch vs reference"
    print("KERNEL_OK")
</pallas_src>

<mosaic_0001>
module attributes {stable_mosaic.version = 11 : i64} {
  func.func @_bn_relu_kernel(%arg0: i32, %arg1: memref<512x128xbf16, #tpu.memory_space<vmem>>, %arg2: memref<1x128xf32, #tpu.memory_space<vmem>>, %arg3: memref<1x128xf32, #tpu.memory_space<vmem>>, %arg4: memref<512x128xf32, #tpu.memory_space<vmem>>) attributes {dimension_semantics = [#tpu.dimension_semantics<parallel>], iteration_bounds = array<i64: 1>, scalar_prefetch = 0 : i64, scratch_operands = 0 : i64, tpu.core_type = #tpu.core_type<tc>, window_params = [{transform_indices = @transform_0, window_bounds = array<i64: 512, 128>}, {pipeline_mode = #tpu.pipeline_mode<synchronous>, transform_indices = @transform_1, window_bounds = array<i64: 1, 128>}, {pipeline_mode = #tpu.pipeline_mode<synchronous>, transform_indices = @transform_2, window_bounds = array<i64: 1, 128>}, {transform_indices = @transform_3, window_bounds = array<i64: 512, 128>}]} {
    %c0 = arith.constant 0 : index
    %c0_0 = arith.constant 0 : index
    %0 = vector.load %arg1[%c0, %c0_0] : memref<512x128xbf16, #tpu.memory_space<vmem>>, vector<512x128xbf16>
    %1 = arith.extf %0 : vector<512x128xbf16> to vector<512x128xf32>
    %c0_1 = arith.constant 0 : index
    %c0_2 = arith.constant 0 : index
    %2 = vector.load %arg2[%c0_1, %c0_2] : memref<1x128xf32, #tpu.memory_space<vmem>>, vector<1x128xf32>
    %3 = vector.broadcast %2 : vector<1x128xf32> to vector<512x128xf32>
    %4 = arith.mulf %1, %3 : vector<512x128xf32>
    %c0_3 = arith.constant 0 : index
    %c0_4 = arith.constant 0 : index
    %5 = vector.load %arg3[%c0_3, %c0_4] : memref<1x128xf32, #tpu.memory_space<vmem>>, vector<1x128xf32>
    %6 = vector.broadcast %5 : vector<1x128xf32> to vector<512x128xf32>
    %7 = arith.addf %4, %6 : vector<512x128xf32>
    %cst = arith.constant 0.000000e+00 : f32
    %8 = vector.broadcast %cst : f32 to vector<512x128xf32>
    %9 = arith.maximumf %7, %8 : vector<512x128xf32>
    %c0_5 = arith.constant 0 : index
    %c0_6 = arith.constant 0 : index
    %10 = vector.load %arg4[%c0_5, %c0_6] : memref<512x128xf32, #tpu.memory_space<vmem>>, vector<512x128xf32>
    tpu.vector_store %arg4[%c0_5, %c0_6], %9 {strides = array<i32>} : memref<512x128xf32, #tpu.memory_space<vmem>>, vector<512x128xf32>,
    return
  }
  func.func @transform_0(%arg0: i32) -> (i32, i32) {
    %c0_i32 = arith.constant 0 : i32
    %c0_i32_0 = arith.constant 0 : i32
    return %arg0, %c0_i32 : i32, i32
  }
  func.func @transform_1(%arg0: i32) -> (i32, i32) {
    %c0_i32 = arith.constant 0 : i32
    %c0_i32_0 = arith.constant 0 : i32
    %c0_i32_1 = arith.constant 0 : i32
    return %c0_i32, %c0_i32_0 : i32, i32
  }
  func.func @transform_2(%arg0: i32) -> (i32, i32) {
    %c0_i32 = arith.constant 0 : i32
    %c0_i32_0 = arith.constant 0 : i32
    %c0_i32_1 = arith.constant 0 : i32
    return %c0_i32, %c0_i32_0 : i32, i32
  }
  func.func @transform_3(%arg0: i32) -> (i32, i32) {
    %c0_i32 = arith.constant 0 : i32
    %c0_i32_0 = arith.constant 0 : i32
    return %arg0, %c0_i32 : i32, i32
  }
}

module attributes {stable_mosaic.version = 11 : i64} {
  func.func @_conv3x3_bnstats_kernel(%arg0: i32, %arg1: i32, %arg2: memref<1x16x16x4xbf16, #tpu.memory_space<vmem>>, %arg3: memref<48x128xbf16, #tpu.memory_space<vmem>>, %arg4: memref<1x128x128xbf16, #tpu.memory_space<vmem>>, %arg5: memref<1x2x128xf32, #tpu.memory_space<vmem>>, %arg6: memref<10x18x4xbf16, #tpu.memory_space<vmem>>, %arg7: memref<128x48xbf16, #tpu.memory_space<vmem>>) attributes {dimension_semantics = [#tpu.dimension_semantics<parallel>, #tpu.dimension_semantics<parallel>], iteration_bounds = array<i64: 2, 2>, scalar_prefetch = 0 : i64, scratch_operands = 2 : i64, tpu.core_type = #tpu.core_type<tc>, window_params = [{transform_indices = @transform_0, window_bounds = array<i64: 1, 16, 16, 4>}, {pipeline_mode = #tpu.pipeline_mode<synchronous>, transform_indices = @transform_1, window_bounds = array<i64: 48, 128>}, {transform_indices = @transform_2, window_bounds = array<i64: 1, 128, 128>}, {transform_indices = @transform_3, window_bounds = array<i64: 1, 2, 128>}]} {
    %c8_i32 = arith.constant 8 : i32
    %0 = arith.muli %arg1, %c8_i32 : i32
    %cst = arith.constant 0.000000e+00 : bf16
    %1 = vector.broadcast %cst : bf16 to vector<1x16x4xbf16>
    %cst_0 = arith.constant 0.000000e+00 : bf16
    %2 = vector.broadcast %cst_0 : bf16 to vector<10x1x4xbf16>
    %c0 = arith.constant 0 : index
    %c0_1 = arith.constant 0 : index
    %c0_2 = arith.constant 0 : index
    %3 = vector.load %arg6[%c0, %c0_1, %c0_2] : memref<10x18x4xbf16, #tpu.memory_space<vmem>>, vector<10x1x4xbf16>
    tpu.vector_store %arg6[%c0, %c0_1, %c0_2], %2 {strides = array<i32>} : memref<10x18x4xbf16, #tpu.memory_space<vmem>>, vector<10x1x4xbf16>,
    %c0_3 = arith.constant 0 : index
    %c17 = arith.constant 17 : index
    %c0_4 = arith.constant 0 : index
    %4 = vector.load %arg6[%c0_3, %c17, %c0_4] : memref<10x18x4xbf16, #tpu.memory_space<vmem>>, vector<10x1x4xbf16>
    tpu.vector_store %arg6[%c0_3, %c17, %c0_4], %2 {strides = array<i32>} : memref<10x18x4xbf16, #tpu.memory_space<vmem>>, vector<10x1x4xbf16>,
    %c0_5 = arith.constant 0 : index
    %5 = arith.index_cast %0 : i32 to index
    %c0_6 = arith.constant 0 : index
    %c0_7 = arith.constant 0 : index
    %6 = vector.load %arg2[%c0_5, %5, %c0_6, %c0_7] : memref<1x16x16x4xbf16, #tpu.memory_space<vmem>>, vector<1x8x16x4xbf16>
    %7 = vector.shape_cast %6 : vector<1x8x16x4xbf16> to vector<8x16x4xbf16>
    %c1 = arith.constant 1 : index
    %c1_8 = arith.constant 1 : index
    %c0_9 = arith.constant 0 : index
    %8 = vector.load %arg6[%c1, %c1_8, %c0_9] : memref<10x18x4xbf16, #tpu.memory_space<vmem>>, vector<8x16x4xbf16>
    tpu.vector_store %arg6[%c1, %c1_8, %c0_9], %7 {strides = array<i32>} : memref<10x18x4xbf16, #tpu.memory_space<vmem>>, vector<8x16x4xbf16>,
    %c0_i32 = arith.constant 0 : i32
    %9 = arith.cmpi eq, %arg1, %c0_i32 : i32
    %10 = arith.extui %9 : i1 to i32
    %c0_i32_10 = arith.constant 0 : i32
    %11 = arith.cmpi ne, %10, %c0_i32_10 : i32
    scf.if %11 {
      %c0_70 = arith.constant 0 : index
      %c1_71 = arith.constant 1 : index
      %c0_72 = arith.constant 0 : index
      %68 = vector.load %arg6[%c0_70, %c1_71, %c0_72] : memref<10x18x4xbf16, #tpu.memory_space<vmem>>, vector<1x16x4xbf16>
      tpu.vector_store %arg6[%c0_70, %c1_71, %c0_72], %1 {strides = array<i32>} : memref<10x18x4xbf16, #tpu.memory_space<vmem>>, vector<1x16x4xbf16>,
    } else {
    }
    %c0_i32_11 = arith.constant 0 : i32
    %12 = arith.cmpi sgt, %arg1, %c0_i32_11 : i32
    %13 = arith.extui %12 : i1 to i32
    %c0_i32_12 = arith.constant 0 : i32
    %14 = arith.cmpi ne, %13, %c0_i32_12 : i32
    scf.if %14 {
      %c1_i32_70 = arith.constant 1 : i32
      %68 = arith.subi %0, %c1_i32_70 : i32
      %c0_71 = arith.constant 0 : index
      %69 = arith.index_cast %68 : i32 to index
      %c0_72 = arith.constant 0 : index
      %c0_73 = arith.constant 0 : index
      %70 = vector.load %arg2[%c0_71, %69, %c0_72, %c0_73] : memref<1x16x16x4xbf16, #tpu.memory_space<vmem>>, vector<1x1x16x4xbf16>
      %71 = vector.shape_cast %70 : vector<1x1x16x4xbf16> to vector<1x16x4xbf16>
      %c0_74 = arith.constant 0 : index
      %c1_75 = arith.constant 1 : index
      %c0_76 = arith.constant 0 : index
      %72 = vector.load %arg6[%c0_74, %c1_75, %c0_76] : memref<10x18x4xbf16, #tpu.memory_space<vmem>>, vector<1x16x4xbf16>
      tpu.vector_store %arg6[%c0_74, %c1_75, %c0_76], %71 {strides = array<i32>} : memref<10x18x4xbf16, #tpu.memory_space<vmem>>, vector<1x16x4xbf16>,
    } else {
    }
    %c1_i32 = arith.constant 1 : i32
    %15 = arith.cmpi eq, %arg1, %c1_i32 : i32
    %16 = arith.extui %15 : i1 to i32
    %c0_i32_13 = arith.constant 0 : i32
    %17 = arith.cmpi ne, %16, %c0_i32_13 : i32
    scf.if %17 {
      %c9 = arith.constant 9 : index
      %c1_70 = arith.constant 1 : index
      %c0_71 = arith.constant 0 : index
      %68 = vector.load %arg6[%c9, %c1_70, %c0_71] : memref<10x18x4xbf16, #tpu.memory_space<vmem>>, vector<1x16x4xbf16>
      tpu.vector_store %arg6[%c9, %c1_70, %c0_71], %1 {strides = array<i32>} : memref<10x18x4xbf16, #tpu.memory_space<vmem>>, vector<1x16x4xbf16>,
    } else {
    }
    %c1_i32_14 = arith.constant 1 : i32
    %18 = arith.cmpi slt, %arg1, %c1_i32_14 : i32
    %19 = arith.extui %18 : i1 to i32
    %c0_i32_15 = arith.constant 0 : i32
    %20 = arith.cmpi ne, %19, %c0_i32_15 : i32
    scf.if %20 {
      %c8_i32_70 = arith.constant 8 : i32
      %68 = arith.addi %0, %c8_i32_70 : i32
      %c0_71 = arith.constant 0 : index
      %69 = arith.index_cast %68 : i32 to index
      %c0_72 = arith.constant 0 : index
      %c0_73 = arith.constant 0 : index
      %70 = vector.load %arg2[%c0_71, %69, %c0_72, %c0_73] : memref<1x16x16x4xbf16, #tpu.memory_space<vmem>>, vector<1x1x16x4xbf16>
      %71 = vector.shape_cast %70 : vector<1x1x16x4xbf16> to vector<1x16x4xbf16>
      %c9 = arith.constant 9 : index
      %c1_74 = arith.constant 1 : index
      %c0_75 = arith.constant 0 : index
      %72 = vector.load %arg6[%c9, %c1_74, %c0_75] : memref<10x18x4xbf16, #tpu.memory_space<vmem>>, vector<1x16x4xbf16>
      tpu.vector_store %arg6[%c9, %c1_74, %c0_75], %71 {strides = array<i32>} : memref<10x18x4xbf16, #tpu.memory_space<vmem>>, vector<1x16x4xbf16>,
    } else {
    }
    %cst_16 = arith.constant 0.000000e+00 : bf16
    %21 = vector.broadcast %cst_16 : bf16 to vector<128x12xbf16>
    %c0_17 = arith.constant 0 : index
    %c36 = arith.constant 36 : index
    %22 = vector.load %arg7[%c0_17, %c36] : memref<128x48xbf16, #tpu.memory_space<vmem>>, vector<128x12xbf16>
    tpu.vector_store %arg7[%c0_17, %c36], %21 {strides = array<i32>} : memref<128x48xbf16, #tpu.memory_space<vmem>>, vector<128x12xbf16>,
    %c0_18 = arith.constant 0 : index
    %c0_19 = arith.constant 0 : index
    %c0_20 = arith.constant 0 : index
    %23 = vector.load %arg6[%c0_18, %c0_19, %c0_20] : memref<10x18x4xbf16, #tpu.memory_space<vmem>>, vector<8x16x4xbf16>
    %24 = vector.shape_cast %23 : vector<8x16x4xbf16> to vector<128x4xbf16>
    %c0_21 = arith.constant 0 : index
    %c0_22 = arith.constant 0 : index
    %25 = vector.load %arg7[%c0_21, %c0_22] : memref<128x48xbf16, #tpu.memory_space<vmem>>, vector<128x4xbf16>
    tpu.vector_store %arg7[%c0_21, %c0_22], %24 {strides = array<i32>} : memref<128x48xbf16, #tpu.memory_space<vmem>>, vector<128x4xbf16>,
    %c0_23 = arith.constant 0 : index
    %c1_24 = arith.constant 1 : index
    %c0_25 = arith.constant 0 : index
    %26 = vector.load %arg6[%c0_23, %c1_24, %c0_25] : memref<10x18x4xbf16, #tpu.memory_space<vmem>>, vector<8x16x4xbf16>
    %27 = vector.shape_cast %26 : vector<8x16x4xbf16> to vector<128x4xbf16>
    %c0_26 = arith.constant 0 : index
    %c4 = arith.constant 4 : index
    %28 = vector.load %arg7[%c0_26, %c4] : memref<128x48xbf16, #tpu.memory_space<vmem>>, vector<128x4xbf16>
    tpu.vector_store %arg7[%c0_26, %c4], %27 {strides = array<i32>} : memref<128x48xbf16, #tpu.memory_space<vmem>>, vector<128x4xbf16>,
    %c0_27 = arith.constant 0 : index
    %c2 = arith.constant 2 : index
    %c0_28 = arith.constant 0 : index
    %29 = vector.load %arg6[%c0_27, %c2, %c0_28] : memref<10x18x4xbf16, #tpu.memory_space<vmem>>, vector<8x16x4xbf16>
    %30 = vector.shape_cast %29 : vector<8x16x4xbf16> to vector<128x4xbf16>
    %c0_29 = arith.constant 0 : index
    %c8 = arith.constant 8 : index
    %31 = vector.load %arg7[%c0_29, %c8] : memref<128x48xbf16, #tpu.memory_space<vmem>>, vector<128x4xbf16>
    tpu.vector_store %arg7[%c0_29, %c8], %30 {strides = array<i32>} : memref<128x48xbf16, #tpu.memory_space<vmem>>, vector<128x4xbf16>,
    %c1_30 = arith.constant 1 : index
    %c0_31 = arith.constant 0 : index
    %c0_32 = arith.constant 0 : index
    %32 = vector.load %arg6[%c1_30, %c0_31, %c0_32] : memref<10x18x4xbf16, #tpu.memory_space<vmem>>, vector<8x16x4xbf16>
    %33 = vector.shape_cast %32 : vector<8x16x4xbf16> to vector<128x4xbf16>
    %c0_33 = arith.constant 0 : index
    %c12 = arith.constant 12 : index
    %34 = vector.load %arg7[%c0_33, %c12] : memref<128x48xbf16, #tpu.memory_space<vmem>>, vector<128x4xbf16>
    tpu.vector_store %arg7[%c0_33, %c12], %33 {strides = array<i32>} : memref<128x48xbf16, #tpu.memory_space<vmem>>, vector<128x4xbf16>,
    %c1_34 = arith.constant 1 : index
    %c1_35 = arith.constant 1 : index
    %c0_36 = arith.constant 0 : index
    %35 = vector.load %arg6[%c1_34, %c1_35, %c0_36] : memref<10x18x4xbf16, #tpu.memory_space<vmem>>, vector<8x16x4xbf16>
    %36 = vector.shape_cast %35 : vector<8x16x4xbf16> to vector<128x4xbf16>
    %c0_37 = arith.constant 0 : index
    %c16 = arith.constant 16 : index
    %37 = vector.load %arg7[%c0_37, %c16] : memref<128x48xbf16, #tpu.memory_space<vmem>>, vector<128x4xbf16>
    tpu.vector_store %arg7[%c0_37, %c16], %36 {strides = array<i32>} : memref<128x48xbf16, #tpu.memory_space<vmem>>, vector<128x4xbf16>,
    %c1_38 = arith.constant 1 : index
    %c2_39 = arith.constant 2 : index
    %c0_40 = arith.constant 0 : index
    %38 = vector.load %arg6[%c1_38, %c2_39, %c0_40] : memref<10x18x4xbf16, #tpu.memory_space<vmem>>, vector<8x16x4xbf16>
    %39 = vector.shape_cast %38 : vector<8x16x4xbf16> to vector<128x4xbf16>
    %c0_41 = arith.constant 0 : index
    %c20 = arith.constant 20 : index
    %40 = vector.load %arg7[%c0_41, %c20] : memref<128x48xbf16, #tpu.memory_space<vmem>>, vector<128x4xbf16>
    tpu.vector_store %arg7[%c0_41, %c20], %39 {strides = array<i32>} : memref<128x48xbf16, #tpu.memory_space<vmem>>, vector<128x4xbf16>,
    %c2_42 = arith.constant 2 : index
    %c0_43 = arith.constant 0 : index
    %c0_44 = arith.constant 0 : index
    %41 = vector.load %arg6[%c2_42, %c0_43, %c0_44] : memref<10x18x4xbf16, #tpu.memory_space<vmem>>, vector<8x16x4xbf16>
    %42 = vector.shape_cast %41 : vector<8x16x4xbf16> to vector<128x4xbf16>
    %c0_45 = arith.constant 0 : index
    %c24 = arith.constant 24 : index
    %43 = vector.load %arg7[%c0_45, %c24] : memref<128x48xbf16, #tpu.memory_space<vmem>>, vector<128x4xbf16>
    tpu.vector_store %arg7[%c0_45, %c24], %42 {strides = array<i32>} : memref<128x48xbf16, #tpu.memory_space<vmem>>, vector<128x4xbf16>,
    %c2_46 = arith.constant 2 : index
    %c1_47 = arith.constant 1 : index
    %c0_48 = arith.constant 0 : index
    %44 = vector.load %arg6[%c2_46, %c1_47, %c0_48] : memref<10x18x4xbf16, #tpu.memory_space<vmem>>, vector<8x16x4xbf16>
    %45 = vector.shape_cast %44 : vector<8x16x4xbf16> to vector<128x4xbf16>
    %c0_49 = arith.constant 0 : index
    %c28 = arith.constant 28 : index
    %46 = vector.load %arg7[%c0_49, %c28] : memref<128x48xbf16, #tpu.memory_space<vmem>>, vector<128x4xbf16>
    tpu.vector_store %arg7[%c0_49, %c28], %45 {strides = array<i32>} : memref<128x48xbf16, #tpu.memory_space<vmem>>, vector<128x4xbf16>,
    %c2_50 = arith.constant 2 : index
    %c2_51 = arith.constant 2 : index
    %c0_52 = arith.constant 0 : index
    %47 = vector.load %arg6[%c2_50, %c2_51, %c0_52] : memref<10x18x4xbf16, #tpu.memory_space<vmem>>, vector<8x16x4xbf16>
    %48 = vector.shape_cast %47 : vector<8x16x4xbf16> to vector<128x4xbf16>
    %c0_53 = arith.constant 0 : index
    %c32 = arith.constant 32 : index
    %49 = vector.load %arg7[%c0_53, %c32] : memref<128x48xbf16, #tpu.memory_space<vmem>>, vector<128x4xbf16>
    tpu.vector_store %arg7[%c0_53, %c32], %48 {strides = array<i32>} : memref<128x48xbf16, #tpu.memory_space<vmem>>, vector<128x4xbf16>,
    %c0_54 = arith.constant 0 : index
    %c0_55 = arith.constant 0 : index
    %50 = vector.load %arg7[%c0_54, %c0_55] : memref<128x48xbf16, #tpu.memory_space<vmem>>, vector<128x48xbf16>
    %c0_56 = arith.constant 0 : index
    %c0_57 = arith.constant 0 : index
    %51 = vector.load %arg3[%c0_56, %c0_57] : memref<48x128xbf16, #tpu.memory_space<vmem>>, vector<48x128xbf16>
    %cst_58 = arith.constant dense<0.000000e+00> : vector<128x128xf32>
    %52 = tpu.matmul %50, %51, %cst_58 {dimension_numbers = #tpu.dot_dimension_numbers<[1], [0], [0], [1], [0, 0, 1, 1], [], []>} : vector<128x48xbf16>, vector<48x128xbf16>, vector<128x128xf32> -> vector<128x128xf32>
    %53 = arith.truncf %52 : vector<128x128xf32> to vector<128x128xbf16>
    %c0_59 = arith.constant 0 : index
    %c0_60 = arith.constant 0 : index
    %c0_61 = arith.constant 0 : index
    %54 = vector.load %arg4[%c0_59, %c0_60, %c0_61] : memref<1x128x128xbf16, #tpu.memory_space<vmem>>, vector<1x128x128xbf16>
    %55 = vector.shape_cast %54 : vector<1x128x128xbf16> to vector<128x128xbf16>
    %56 = vector.shape_cast %53 : vector<128x128xbf16> to vector<1x128x128xbf16>
    tpu.vector_store %arg4[%c0_59, %c0_60, %c0_61], %56 {strides = array<i32>} : memref<1x128x128xbf16, #tpu.memory_space<vmem>>, vector<1x128x128xbf16>,
    %cst_62 = arith.constant dense<0.000000e+00> : vector<128xf32>
    %57 = vector.multi_reduction <add>, %52, %cst_62 [0] : vector<128x128xf32> to vector<128xf32>
    %58 = vector.shape_cast %57 : vector<128xf32> to vector<1x128xf32>
    %c0_63 = arith.constant 0 : index
    %c0_64 = arith.constant 0 : index
    %c0_65 = arith.constant 0 : index
    %59 = vector.load %arg5[%c0_63, %c0_64, %c0_65] : memref<1x2x128xf32, #tpu.memory_space<vmem>>, vector<1x1x128xf32>
    %60 = vector.shape_cast %59 : vector<1x1x128xf32> to vector<1x128xf32>
    %61 = vector.shape_cast %58 : vector<1x128xf32> to vector<1x1x128xf32>
    tpu.vector_store %arg5[%c0_63, %c0_64, %c0_65], %61 {strides = array<i32>} : memref<1x2x128xf32, #tpu.memory_space<vmem>>, vector<1x1x128xf32>,
    %62 = arith.mulf %52, %52 : vector<128x128xf32>
    %cst_66 = arith.constant dense<0.000000e+00> : vector<128xf32>
    %63 = vector.multi_reduction <add>, %62, %cst_66 [0] : vector<128x128xf32> to vector<128xf32>
    %64 = vector.shape_cast %63 : vector<128xf32> to vector<1x128xf32>
    %c0_67 = arith.constant 0 : index
    %c1_68 = arith.constant 1 : index
    %c0_69 = arith.constant 0 : index
    %65 = vector.load %arg5[%c0_67, %c1_68, %c0_69] : memref<1x2x128xf32, #tpu.memory_space<vmem>>, vector<1x1x128xf32>
    %66 = vector.shape_cast %65 : vector<1x1x128xf32> to vector<1x128xf32>
    %67 = vector.shape_cast %64 : vector<1x128xf32> to vector<1x1x128xf32>
    tpu.vector_store %arg5[%c0_67, %c1_68, %c0_69], %67 {strides = array<i32>} : memref<1x2x128xf32, #tpu.memory_space<vmem>>, vector<1x1x128xf32>,
    return
  }
  func.func @transform_0(%arg0: i32, %arg1: i32) -> (i32, i32, i32, i32) {
    %c0_i32 = arith.constant 0 : i32
    %c0_i32_0 = arith.constant 0 : i32
    %c0_i32_1 = arith.constant 0 : i32
    %c0_i32_2 = arith.constant 0 : i32
    return %arg0, %c0_i32, %c0_i32_0, %c0_i32_1 : i32, i32, i32, i32
  }
  func.func @transform_1(%arg0: i32, %arg1: i32) -> (i32, i32) {
    %c0_i32 = arith.constant 0 : i32
    %c0_i32_0 = arith.constant 0 : i32
    %c0_i32_1 = arith.constant 0 : i32
    return %c0_i32, %c0_i32_0 : i32, i32
  }
  func.func @transform_2(%arg0: i32, %arg1: i32) -> (i32, i32, i32) {
    %c0_i32 = arith.constant 0 : i32
    %c0_i32_0 = arith.constant 0 : i32
    return %arg0, %arg1, %c0_i32 : i32, i32, i32
  }
  func.func @transform_3(%arg0: i32, %arg1: i32) -> (i32, i32, i32) {
    %c2_i32 = arith.constant 2 : i32
    %0 = arith.muli %arg0, %c2_i32 : i32
    %1 = arith.addi %0, %arg1 : i32
    %c0_i32 = arith.constant 0 : i32
    %c0_i32_0 = arith.constant 0 : i32
    %c0_i32_1 = arith.constant 0 : i32
    return %1, %c0_i32, %c0_i32_0 : i32, i32, i32
  }
}

</mosaic_0001>

<bundles_post_ra>
// kernel: deconv_block_forward.3
= control target key start
LH: loop header
LB: loop body
LE: loop exit
PB: predicated region body
PF: predicated region fallthrough
CT: control target
= control target key end

     0   :  { %s1023_s0 = inlined_call_operand.vmem [shape: bf16[512,128], index: 0, kind: input, shape index: {}]   ;;  %s1024_s1 = inlined_call_operand.vmem [shape: f32[1,128], index: 1, kind: input, shape index: {}]   ;;  %s1025_s2 = inlined_call_operand.vmem [shape: f32[1,128], index: 2, kind: input, shape index: {}]   ;;  %s1026_s3 = inlined_call_operand.vmem [shape: f32[512,128], index: 3, kind: output, shape index: {}]  }
   0x1   :  { %v419_v0 = vld [vmem:[%s1023_s0] sm:$0xff]   ;;  %v546_v4 = vld [vmem:[%s1023_s0 + $0x8] sm:$0xff]   ;;  %v547_v5 = vld [vmem:[%s1023_s0 + $0x10] sm:$0xff]  }
   0x2   :  { %v603_v1 = vld [vmem:[%s1024_s1] ss:$0 sm:$0xff]  ;;  %v420_v2 = vunpack.c.l.bf16 %v419_v0  ;;  %v421_v3 = vunpack.c.h.bf16 %v419_v0  ;;  %v548_v6 = vld [vmem:[%s1023_s0 + $0x18] sm:$0xff]   ;;  %v424_v8 = vunpack.c.l.bf16 %v546_v4  ;;  %v425_v9 = vunpack.c.h.bf16 %v546_v4  ;;  %v550_v33 = vld [vmem:[%s1023_s0 + $0x28] sm:$0xff]  }
   0x3   :  { %v617_v7 = vld [vmem:[%s1025_s2] ss:$0 sm:$0xff]  ;;  %v428_v10 = vunpack.c.l.bf16 %v547_v5  ;;  %v429_v11 = vunpack.c.h.bf16 %v547_v5  ;;  %v432_v14 = vunpack.c.l.bf16 %v548_v6  ;;  %v433_v15 = vunpack.c.h.bf16 %v548_v6  ;;  %v551_v34 = vld [vmem:[%s1023_s0 + $0x30] sm:$0xff]   ;;  %v552_v39 = vld [vmem:[%s1023_s0 + $0x38] sm:$0xff]  }
   0x4   :  { %v149_v12 = vmul.f32 %v420_v2, %v603_v1  ;;  %v150_v13 = vmul.f32 %v421_v3, %v603_v1  ;;  %v151_v16 = vmul.f32 %v424_v8, %v603_v1  ;;  %v152_v17 = vmul.f32 %v425_v9, %v603_v1  ;;  %v549_v28 = vld [vmem:[%s1023_s0 + $0x20] sm:$0xff]   ;;  %v554_v6 = vld [vmem:[%s1023_s0 + $0x48] sm:$0xff]   ;;  %v555_v8 = vld [vmem:[%s1023_s0 + $0x50] sm:$0xff]  }
   0x5   :  { %v153_v18 = vmul.f32 %v428_v10, %v603_v1  ;;  %v154_v19 = vmul.f32 %v429_v11, %v603_v1  ;;  %v155_v22 = vmul.f32 %v432_v14, %v603_v1  ;;  %v156_v23 = vmul.f32 %v433_v15, %v603_v1  ;;  %v553_v0 = vld [vmem:[%s1023_s0 + $0x40] sm:$0xff]  }
   0x6   :  { %v220_v20 = vadd.f32 %v617_v7, %v149_v12  ;;  %v221_v21 = vadd.f32 %v617_v7, %v150_v13  ;;  %v222_v24 = vadd.f32 %v617_v7, %v151_v16  ;;  %v223_v25 = vadd.f32 %v617_v7, %v152_v17  ;;  %v556_v13 = vld [vmem:[%s1023_s0 + $0x58] sm:$0xff]  }
   0x7   :  { %v224_v26 = vadd.f32 %v617_v7, %v153_v18  ;;  %v225_v27 = vadd.f32 %v617_v7, %v154_v19  ;;  %v226_v31 = vadd.f32 %v617_v7, %v155_v22  ;;  %v227_v32 = vadd.f32 %v617_v7, %v156_v23 }
   0x8   :  { %v284_v29 = vmax.f32 %v220_v20, 0.0  ;;  %v285_v30 = vmax.f32 %v221_v21, 0.0  ;;  %v286_v35 = vmax.f32 %v222_v24, 0.0  ;;  %v287_v36 = vmax.f32 %v223_v25, 0.0 }
   0x9   :  { %v288_v37 = vmax.f32 %v224_v26, 0.0  ;;  %v289_v38 = vmax.f32 %v225_v27, 0.0  ;;  %v290_v40 = vmax.f32 %v226_v31, 0.0  ;;  %v291_v41 = vmax.f32 %v227_v32, 0.0 }
   0xa   :  { %348 = vst [vmem:[%s1026_s3] sm:$0xff] %v284_v29  ;;  %349 = vst [vmem:[%s1026_s3 + $0x8] sm:$0xff] %v285_v30  ;;  %v436_v42 = vunpack.c.l.bf16 %v549_v28  ;;  %v437_v43 = vunpack.c.h.bf16 %v549_v28  ;;  %v440_v44 = vunpack.c.l.bf16 %v550_v33  ;;  %v441_v45 = vunpack.c.h.bf16 %v550_v33 }
   0xb   :  { %350 = vst [vmem:[%s1026_s3 + $0x10] sm:$0xff] %v286_v35  ;;  %351 = vst [vmem:[%s1026_s3 + $0x18] sm:$0xff] %v287_v36  ;;  %v444_v46 = vunpack.c.l.bf16 %v551_v34  ;;  %v445_v47 = vunpack.c.h.bf16 %v551_v34  ;;  %v448_v50 = vunpack.c.l.bf16 %v552_v39  ;;  %v449_v51 = vunpack.c.h.bf16 %v552_v39 }
   0xc   :  { %352 = vst [vmem:[%s1026_s3 + $0x20] sm:$0xff] %v288_v37  ;;  %353 = vst [vmem:[%s1026_s3 + $0x28] sm:$0xff] %v289_v38  ;;  %v157_v48 = vmul.f32 %v436_v42, %v603_v1  ;;  %v158_v49 = vmul.f32 %v437_v43, %v603_v1  ;;  %v159_v52 = vmul.f32 %v440_v44, %v603_v1  ;;  %v452_v16 = vunpack.c.l.bf16 %v553_v0  ;;  %v557_v38 = vld [vmem:[%s1023_s0 + $0x60] sm:$0xff]   ;;  %v558_v43 = vld [vmem:[%s1023_s0 + $0x68] sm:$0xff]  }
   0xd   :  { %354 = vst [vmem:[%s1026_s3 + $0x30] sm:$0xff] %v290_v40  ;;  %355 = vst [vmem:[%s1026_s3 + $0x38] sm:$0xff] %v291_v41  ;;  %v160_v53 = vmul.f32 %v441_v45, %v603_v1  ;;  %v161_v54 = vmul.f32 %v444_v46, %v603_v1  ;;  %v162_v55 = vmul.f32 %v445_v47, %v603_v1  ;;  %v453_v17 = vunpack.c.h.bf16 %v553_v0  ;;  %v559_v44 = vld [vmem:[%s1023_s0 + $0x70] sm:$0xff]  }
   0xe   :  { %v228_v56 = vadd.f32 %v617_v7, %v157_v48  ;;  %v229_v57 = vadd.f32 %v617_v7, %v158_v49  ;;  %v163_v58 = vmul.f32 %v448_v50, %v603_v1  ;;  %v164_v59 = vmul.f32 %v449_v51, %v603_v1  ;;  %v560_v49 = vld [vmem:[%s1023_s0 + $0x78] sm:$0xff]  }
   0xf   :  { %v230_v60 = vadd.f32 %v617_v7, %v159_v52  ;;  %v231_v61 = vadd.f32 %v617_v7, %v160_v53  ;;  %v232_v62 = vadd.f32 %v617_v7, %v161_v54  ;;  %v233_v63 = vadd.f32 %v617_v7, %v162_v55 }
  0x10   :  { %v292_v2 = vmax.f32 %v228_v56, 0.0  ;;  %v293_v3 = vmax.f32 %v229_v57, 0.0  ;;  %v234_v4 = vadd.f32 %v617_v7, %v163_v58  ;;  %v235_v5 = vadd.f32 %v617_v7, %v164_v59 }
  0x11   :  { %v294_v9 = vmax.f32 %v230_v60, 0.0  ;;  %v295_v10 = vmax.f32 %v231_v61, 0.0  ;;  %v296_v11 = vmax.f32 %v232_v62, 0.0  ;;  %v297_v12 = vmax.f32 %v233_v63, 0.0 }
  0x12   :  { %356 = vst [vmem:[%s1026_s3 + $0x40] sm:$0xff] %v292_v2  ;;  %357 = vst [vmem:[%s1026_s3 + $0x48] sm:$0xff] %v293_v3  ;;  %v298_v14 = vmax.f32 %v234_v4, 0.0  ;;  %v299_v15 = vmax.f32 %v235_v5, 0.0  ;;  %v456_v18 = vunpack.c.l.bf16 %v554_v6  ;;  %v457_v19 = vunpack.c.h.bf16 %v554_v6 }
  0x13   :  { %358 = vst [vmem:[%s1026_s3 + $0x50] sm:$0xff] %v294_v9  ;;  %359 = vst [vmem:[%s1026_s3 + $0x58] sm:$0xff] %v295_v10  ;;  %v460_v20 = vunpack.c.l.bf16 %v555_v8  ;;  %v461_v21 = vunpack.c.h.bf16 %v555_v8  ;;  %v165_v22 = vmul.f32 %v452_v16, %v603_v1  ;;  %v166_v23 = vmul.f32 %v453_v17, %v603_v1  ;;  %v562_v17 = vld [vmem:[%s1023_s0 + $0x88] sm:$0xff]  }
  0x14   :  { %360 = vst [vmem:[%s1026_s3 + $0x60] sm:$0xff] %v296_v11  ;;  %361 = vst [vmem:[%s1026_s3 + $0x68] sm:$0xff] %v297_v12  ;;  %v464_v24 = vunpack.c.l.bf16 %v556_v13  ;;  %v465_v25 = vunpack.c.h.bf16 %v556_v13  ;;  %v167_v26 = vmul.f32 %v456_v18, %v603_v1  ;;  %v168_v27 = vmul.f32 %v457_v19, %v603_v1  ;;  %v561_v12 = vld [vmem:[%s1023_s0 + $0x80] sm:$0xff]   ;;  %v563_v18 = vld [vmem:[%s1023_s0 + $0x90] sm:$0xff]  }
  0x15   :  { %362 = vst [vmem:[%s1026_s3 + $0x70] sm:$0xff] %v298_v14  ;;  %363 = vst [vmem:[%s1026_s3 + $0x78] sm:$0xff] %v299_v15  ;;  %v169_v28 = vmul.f32 %v460_v20, %v603_v1  ;;  %v170_v29 = vmul.f32 %v461_v21, %v603_v1  ;;  %v236_v30 = vadd.f32 %v617_v7, %v165_v22  ;;  %v468_v52 = vunpack.c.l.bf16 %v557_v38 }
  0x16   :  { %v237_v31 = vadd.f32 %v617_v7, %v166_v23  ;;  %v171_v32 = vmul.f32 %v464_v24, %v603_v1  ;;  %v172_v33 = vmul.f32 %v465_v25, %v603_v1  ;;  %v238_v34 = vadd.f32 %v617_v7, %v167_v26  ;;  %v564_v23 = vld [vmem:[%s1023_s0 + $0x98] sm:$0xff]  }
  0x17   :  { %v239_v35 = vadd.f32 %v617_v7, %v168_v27  ;;  %v240_v36 = vadd.f32 %v617_v7, %v169_v28  ;;  %v241_v37 = vadd.f32 %v617_v7, %v170_v29  ;;  %v300_v39 = vmax.f32 %v236_v30, 0.0 }
  0x18   :  { %v301_v40 = vmax.f32 %v237_v31, 0.0  ;;  %v242_v41 = vadd.f32 %v617_v7, %v171_v32  ;;  %v243_v42 = vadd.f32 %v617_v7, %v172_v33  ;;  %v302_v45 = vmax.f32 %v238_v34, 0.0 }
  0x19   :  { %v303_v46 = vmax.f32 %v239_v35, 0.0  ;;  %v304_v47 = vmax.f32 %v240_v36, 0.0  ;;  %v305_v48 = vmax.f32 %v241_v37, 0.0  ;;  %364 = vst [vmem:[%s1026_s3 + $0x80] sm:$0xff] %v300_v39  ;;  %v469_v53 = vunpack.c.h.bf16 %v557_v38 }
  0x1a   :  { %365 = vst [vmem:[%s1026_s3 + $0x88] sm:$0xff] %v301_v40  ;;  %v306_v50 = vmax.f32 %v242_v41, 0.0  ;;  %v307_v51 = vmax.f32 %v243_v42, 0.0  ;;  %366 = vst [vmem:[%s1026_s3 + $0x90] sm:$0xff] %v302_v45  ;;  %v472_v54 = vunpack.c.l.bf16 %v558_v43  ;;  %v473_v55 = vunpack.c.h.bf16 %v558_v43 }
  0x1b   :  { %367 = vst [vmem:[%s1026_s3 + $0x98] sm:$0xff] %v303_v46  ;;  %368 = vst [vmem:[%s1026_s3 + $0xa0] sm:$0xff] %v304_v47  ;;  %v476_v56 = vunpack.c.l.bf16 %v559_v44  ;;  %v477_v57 = vunpack.c.h.bf16 %v559_v44  ;;  %v173_v58 = vmul.f32 %v468_v52, %v603_v1  ;;  %v174_v59 = vmul.f32 %v469_v53, %v603_v1  ;;  %v566_v53 = vld [vmem:[%s1023_s0 + $0xa8] sm:$0xff]  }
  0x1c   :  { %369 = vst [vmem:[%s1026_s3 + $0xa8] sm:$0xff] %v305_v48  ;;  %370 = vst [vmem:[%s1026_s3 + $0xb0] sm:$0xff] %v306_v50  ;;  %v480_v60 = vunpack.c.l.bf16 %v560_v49  ;;  %v481_v61 = vunpack.c.h.bf16 %v560_v49  ;;  %v175_v62 = vmul.f32 %v472_v54, %v603_v1  ;;  %v176_v63 = vmul.f32 %v473_v55, %v603_v1  ;;  %v565_v48 = vld [vmem:[%s1023_s0 + $0xa0] sm:$0xff]   ;;  %v567_v54 = vld [vmem:[%s1023_s0 + $0xb0] sm:$0xff]  }
  0x1d   :  { %371 = vst [vmem:[%s1026_s3 + $0xb8] sm:$0xff] %v307_v51  ;;  %v177_v0 = vmul.f32 %v476_v56, %v603_v1  ;;  %v178_v2 = vmul.f32 %v477_v57, %v603_v1  ;;  %v244_v3 = vadd.f32 %v617_v7, %v173_v58  ;;  %v245_v4 = vadd.f32 %v617_v7, %v174_v59  ;;  %v568_v59 = vld [vmem:[%s1023_s0 + $0xb8] sm:$0xff]  }
  0x1e   :  { %v179_v5 = vmul.f32 %v480_v60, %v603_v1  ;;  %v180_v6 = vmul.f32 %v481_v61, %v603_v1  ;;  %v246_v8 = vadd.f32 %v617_v7, %v175_v62  ;;  %v247_v9 = vadd.f32 %v617_v7, %v176_v63 }
  0x1f   :  { %v248_v10 = vadd.f32 %v617_v7, %v177_v0  ;;  %v249_v11 = vadd.f32 %v617_v7, %v178_v2  ;;  %v308_v13 = vmax.f32 %v244_v3, 0.0  ;;  %v309_v14 = vmax.f32 %v245_v4, 0.0 }
  0x20   :  { %v250_v15 = vadd.f32 %v617_v7, %v179_v5  ;;  %v251_v16 = vadd.f32 %v617_v7, %v180_v6  ;;  %v310_v19 = vmax.f32 %v246_v8, 0.0  ;;  %v311_v20 = vmax.f32 %v247_v9, 0.0 }
  0x21   :  { %v312_v21 = vmax.f32 %v248_v10, 0.0  ;;  %v313_v22 = vmax.f32 %v249_v11, 0.0  ;;  %372 = vst [vmem:[%s1026_s3 + $0xc0] sm:$0xff] %v308_v13  ;;  %373 = vst [vmem:[%s1026_s3 + $0xc8] sm:$0xff] %v309_v14  ;;  %v484_v26 = vunpack.c.l.bf16 %v561_v12  ;;  %v485_v27 = vunpack.c.h.bf16 %v561_v12 }
  0x22   :  { %v314_v24 = vmax.f32 %v250_v15, 0.0  ;;  %v315_v25 = vmax.f32 %v251_v16, 0.0  ;;  %374 = vst [vmem:[%s1026_s3 + $0xd0] sm:$0xff] %v310_v19  ;;  %375 = vst [vmem:[%s1026_s3 + $0xd8] sm:$0xff] %v311_v20  ;;  %v488_v28 = vunpack.c.l.bf16 %v562_v17  ;;  %v489_v29 = vunpack.c.h.bf16 %v562_v17 }
  0x23   :  { %376 = vst [vmem:[%s1026_s3 + $0xe0] sm:$0xff] %v312_v21  ;;  %377 = vst [vmem:[%s1026_s3 + $0xe8] sm:$0xff] %v313_v22  ;;  %v492_v30 = vunpack.c.l.bf16 %v563_v18  ;;  %v493_v31 = vunpack.c.h.bf16 %v563_v18  ;;  %v181_v32 = vmul.f32 %v484_v26, %v603_v1  ;;  %v182_v33 = vmul.f32 %v485_v27, %v603_v1  ;;  %v569_v22 = vld [vmem:[%s1023_s0 + $0xc0] sm:$0xff]   ;;  %v570_v27 = vld [vmem:[%s1023_s0 + $0xc8] sm:$0xff]  }
  0x24   :  { %378 = vst [vmem:[%s1026_s3 + $0xf0] sm:$0xff] %v314_v24  ;;  %379 = vst [vmem:[%s1026_s3 + $0xf8] sm:$0xff] %v315_v25  ;;  %v496_v34 = vunpack.c.l.bf16 %v564_v23  ;;  %v497_v35 = vunpack.c.h.bf16 %v564_v23  ;;  %v183_v36 = vmul.f32 %v488_v28, %v603_v1  ;;  %v184_v37 = vmul.f32 %v489_v29, %v603_v1  ;;  %v571_v28 = vld [vmem:[%s1023_s0 + $0xd0] sm:$0xff]  }
  0x25   :  { %v185_v38 = vmul.f32 %v492_v30, %v603_v1  ;;  %v186_v39 = vmul.f32 %v493_v31, %v603_v1  ;;  %v252_v40 = vadd.f32 %v617_v7, %v181_v32  ;;  %v253_v41 = vadd.f32 %v617_v7, %v182_v33  ;;  %v572_v33 = vld [vmem:[%s1023_s0 + $0xd8] sm:$0xff]  }
  0x26   :  { %v187_v42 = vmul.f32 %v496_v34, %v603_v1  ;;  %v188_v43 = vmul.f32 %v497_v35, %v603_v1  ;;  %v254_v44 = vadd.f32 %v617_v7, %v183_v36  ;;  %v255_v45 = vadd.f32 %v617_v7, %v184_v37 }
  0x27   :  { %v256_v46 = vadd.f32 %v617_v7, %v185_v38  ;;  %v257_v47 = vadd.f32 %v617_v7, %v186_v39  ;;  %v316_v49 = vmax.f32 %v252_v40, 0.0  ;;  %v317_v50 = vmax.f32 %v253_v41, 0.0 }
  0x28   :  { %v258_v51 = vadd.f32 %v617_v7, %v187_v42  ;;  %v259_v52 = vadd.f32 %v617_v7, %v188_v43  ;;  %v318_v55 = vmax.f32 %v254_v44, 0.0  ;;  %v319_v56 = vmax.f32 %v255_v45, 0.0 }
  0x29   :  { %v320_v57 = vmax.f32 %v256_v46, 0.0  ;;  %v321_v58 = vmax.f32 %v257_v47, 0.0  ;;  %380 = vst [vmem:[%s1026_s3 + $0x100] sm:$0xff] %v316_v49  ;;  %381 = vst [vmem:[%s1026_s3 + $0x108] sm:$0xff] %v317_v50  ;;  %v500_v62 = vunpack.c.l.bf16 %v565_v48  ;;  %v501_v63 = vunpack.c.h.bf16 %v565_v48 }
  0x2a   :  { %v322_v60 = vmax.f32 %v258_v51, 0.0  ;;  %v323_v61 = vmax.f32 %v259_v52, 0.0  ;;  %382 = vst [vmem:[%s1026_s3 + $0x110] sm:$0xff] %v318_v55  ;;  %383 = vst [vmem:[%s1026_s3 + $0x118] sm:$0xff] %v319_v56  ;;  %v504_v0 = vunpack.c.l.bf16 %v566_v53  ;;  %v505_v2 = vunpack.c.h.bf16 %v566_v53 }
  0x2b   :  { %384 = vst [vmem:[%s1026_s3 + $0x120] sm:$0xff] %v320_v57  ;;  %385 = vst [vmem:[%s1026_s3 + $0x128] sm:$0xff] %v321_v58  ;;  %v508_v3 = vunpack.c.l.bf16 %v567_v54  ;;  %v509_v4 = vunpack.c.h.bf16 %v567_v54  ;;  %v189_v5 = vmul.f32 %v500_v62, %v603_v1  ;;  %v190_v6 = vmul.f32 %v501_v63, %v603_v1  ;;  %v573_v58 = vld [vmem:[%s1023_s0 + $0xe0] sm:$0xff]   ;;  %v574_v63 = vld [vmem:[%s1023_s0 + $0xe8] sm:$0xff]  }
  0x2c   :  { %386 = vst [vmem:[%s1026_s3 + $0x130] sm:$0xff] %v322_v60  ;;  %387 = vst [vmem:[%s1026_s3 + $0x138] sm:$0xff] %v323_v61  ;;  %v512_v8 = vunpack.c.l.bf16 %v568_v59  ;;  %v513_v9 = vunpack.c.h.bf16 %v568_v59  ;;  %v191_v10 = vmul.f32 %v504_v0, %v603_v1  ;;  %v192_v11 = vmul.f32 %v505_v2, %v603_v1  ;;  %v575_v0 = vld [vmem:[%s1023_s0 + $0xf0] sm:$0xff]  }
  0x2d   :  { %v193_v12 = vmul.f32 %v508_v3, %v603_v1  ;;  %v194_v13 = vmul.f32 %v509_v4, %v603_v1  ;;  %v260_v14 = vadd.f32 %v617_v7, %v189_v5  ;;  %v261_v15 = vadd.f32 %v617_v7, %v190_v6  ;;  %v576_v6 = vld [vmem:[%s1023_s0 + $0xf8] sm:$0xff]  }
  0x2e   :  { %v195_v16 = vmul.f32 %v512_v8, %v603_v1  ;;  %v196_v17 = vmul.f32 %v513_v9, %v603_v1  ;;  %v262_v18 = vadd.f32 %v617_v7, %v191_v10  ;;  %v263_v19 = vadd.f32 %v617_v7, %v192_v11 }
  0x2f   :  { %v264_v20 = vadd.f32 %v617_v7, %v193_v12  ;;  %v265_v21 = vadd.f32 %v617_v7, %v194_v13  ;;  %v324_v23 = vmax.f32 %v260_v14, 0.0  ;;  %v325_v24 = vmax.f32 %v261_v15, 0.0 }
  0x30   :  { %v266_v25 = vadd.f32 %v617_v7, %v195_v16  ;;  %v267_v26 = vadd.f32 %v617_v7, %v196_v17  ;;  %v326_v29 = vmax.f32 %v262_v18, 0.0  ;;  %v327_v30 = vmax.f32 %v263_v19, 0.0 }
  0x31   :  { %v328_v31 = vmax.f32 %v264_v20, 0.0  ;;  %v329_v32 = vmax.f32 %v265_v21, 0.0  ;;  %388 = vst [vmem:[%s1026_s3 + $0x140] sm:$0xff] %v324_v23  ;;  %389 = vst [vmem:[%s1026_s3 + $0x148] sm:$0xff] %v325_v24  ;;  %v516_v36 = vunpack.c.l.bf16 %v569_v22  ;;  %v517_v37 = vunpack.c.h.bf16 %v569_v22 }
  0x32   :  { %v330_v34 = vmax.f32 %v266_v25, 0.0  ;;  %v331_v35 = vmax.f32 %v267_v26, 0.0  ;;  %390 = vst [vmem:[%s1026_s3 + $0x150] sm:$0xff] %v326_v29  ;;  %391 = vst [vmem:[%s1026_s3 + $0x158] sm:$0xff] %v327_v30  ;;  %v520_v38 = vunpack.c.l.bf16 %v570_v27  ;;  %v521_v39 = vunpack.c.h.bf16 %v570_v27 }
  0x33   :  { %392 = vst [vmem:[%s1026_s3 + $0x160] sm:$0xff] %v328_v31  ;;  %393 = vst [vmem:[%s1026_s3 + $0x168] sm:$0xff] %v329_v32  ;;  %v524_v40 = vunpack.c.l.bf16 %v571_v28  ;;  %v525_v41 = vunpack.c.h.bf16 %v571_v28  ;;  %v197_v42 = vmul.f32 %v516_v36, %v603_v1  ;;  %v198_v43 = vmul.f32 %v517_v37, %v603_v1 }
  0x34   :  { %394 = vst [vmem:[%s1026_s3 + $0x170] sm:$0xff] %v330_v34  ;;  %395 = vst [vmem:[%s1026_s3 + $0x178] sm:$0xff] %v331_v35  ;;  %v528_v44 = vunpack.c.l.bf16 %v572_v33  ;;  %v529_v45 = vunpack.c.h.bf16 %v572_v33  ;;  %v199_v46 = vmul.f32 %v520_v38, %v603_v1  ;;  %v200_v47 = vmul.f32 %v521_v39, %v603_v1 }
  0x35   :  { %v201_v48 = vmul.f32 %v524_v40, %v603_v1  ;;  %v202_v49 = vmul.f32 %v525_v41, %v603_v1  ;;  %v268_v50 = vadd.f32 %v617_v7, %v197_v42  ;;  %v269_v51 = vadd.f32 %v617_v7, %v198_v43 }
  0x36   :  { %v203_v52 = vmul.f32 %v528_v44, %v603_v1  ;;  %v204_v53 = vmul.f32 %v529_v45, %v603_v1  ;;  %v270_v54 = vadd.f32 %v617_v7, %v199_v46  ;;  %v271_v55 = vadd.f32 %v617_v7, %v200_v47 }
  0x37   :  { %v272_v56 = vadd.f32 %v617_v7, %v201_v48  ;;  %v273_v57 = vadd.f32 %v617_v7, %v202_v49  ;;  %v332_v59 = vmax.f32 %v268_v50, 0.0  ;;  %v333_v60 = vmax.f32 %v269_v51, 0.0 }
  0x38   :  { %v274_v61 = vadd.f32 %v617_v7, %v203_v52  ;;  %v275_v62 = vadd.f32 %v617_v7, %v204_v53  ;;  %v334_v2 = vmax.f32 %v270_v54, 0.0  ;;  %v335_v3 = vmax.f32 %v271_v55, 0.0 }
  0x39   :  { %v336_v4 = vmax.f32 %v272_v56, 0.0  ;;  %v337_v5 = vmax.f32 %v273_v57, 0.0  ;;  %396 = vst [vmem:[%s1026_s3 + $0x180] sm:$0xff] %v332_v59  ;;  %397 = vst [vmem:[%s1026_s3 + $0x188] sm:$0xff] %v333_v60  ;;  %v532_v10 = vunpack.c.l.bf16 %v573_v58  ;;  %v533_v11 = vunpack.c.h.bf16 %v573_v58 }
  0x3a   :  { %v338_v8 = vmax.f32 %v274_v61, 0.0  ;;  %v339_v9 = vmax.f32 %v275_v62, 0.0  ;;  %398 = vst [vmem:[%s1026_s3 + $0x190] sm:$0xff] %v334_v2  ;;  %399 = vst [vmem:[%s1026_s3 + $0x198] sm:$0xff] %v335_v3  ;;  %v536_v12 = vunpack.c.l.bf16 %v574_v63  ;;  %v537_v13 = vunpack.c.h.bf16 %v574_v63 }
  0x3b   :  { %400 = vst [vmem:[%s1026_s3 + $0x1a0] sm:$0xff] %v336_v4  ;;  %401 = vst [vmem:[%s1026_s3 + $0x1a8] sm:$0xff] %v337_v5  ;;  %v540_v14 = vunpack.c.l.bf16 %v575_v0  ;;  %v541_v15 = vunpack.c.h.bf16 %v575_v0  ;;  %v205_v16 = vmul.f32 %v532_v10, %v603_v1  ;;  %v206_v17 = vmul.f32 %v533_v11, %v603_v1 }
  0x3c   :  { %402 = vst [vmem:[%s1026_s3 + $0x1b0] sm:$0xff] %v338_v8  ;;  %403 = vst [vmem:[%s1026_s3 + $0x1b8] sm:$0xff] %v339_v9  ;;  %v544_v18 = vunpack.c.l.bf16 %v576_v6  ;;  %v545_v19 = vunpack.c.h.bf16 %v576_v6  ;;  %v207_v20 = vmul.f32 %v536_v12, %v603_v1  ;;  %v208_v21 = vmul.f32 %v537_v13, %v603_v1 }
  0x3d   :  { %v209_v22 = vmul.f32 %v540_v14, %v603_v1  ;;  %v210_v23 = vmul.f32 %v541_v15, %v603_v1  ;;  %v276_v24 = vadd.f32 %v617_v7, %v205_v16  ;;  %v277_v25 = vadd.f32 %v617_v7, %v206_v17 }
  0x3e   :  { %v211_v26 = vmul.f32 %v544_v18, %v603_v1  ;;  %v212_v27 = vmul.f32 %v545_v19, %v603_v1  ;;  %v278_v28 = vadd.f32 %v617_v7, %v207_v20  ;;  %v279_v29 = vadd.f32 %v617_v7, %v208_v21 }
  0x3f   :  { %v280_v30 = vadd.f32 %v617_v7, %v209_v22  ;;  %v281_v31 = vadd.f32 %v617_v7, %v210_v23  ;;  %v340_v32 = vmax.f32 %v276_v24, 0.0  ;;  %v341_v33 = vmax.f32 %v277_v25, 0.0 }
  0x40   :  { %v282_v34 = vadd.f32 %v617_v7, %v211_v26  ;;  %v283_v35 = vadd.f32 %v617_v7, %v212_v27  ;;  %v342_v36 = vmax.f32 %v278_v28, 0.0  ;;  %v343_v37 = vmax.f32 %v279_v29, 0.0 }
  0x41   :  { %v344_v38 = vmax.f32 %v280_v30, 0.0  ;;  %v345_v39 = vmax.f32 %v281_v31, 0.0  ;;  %404 = vst [vmem:[%s1026_s3 + $0x1c0] sm:$0xff] %v340_v32  ;;  %405 = vst [vmem:[%s1026_s3 + $0x1c8] sm:$0xff] %v341_v33 }
  0x42   :  { %v346_v1 = vmax.f32 %v282_v34, 0.0  ;;  %v347_v40 = vmax.f32 %v283_v35, 0.0  ;;  %406 = vst [vmem:[%s1026_s3 + $0x1d0] sm:$0xff] %v342_v36  ;;  %407 = vst [vmem:[%s1026_s3 + $0x1d8] sm:$0xff] %v343_v37 }
  0x43   :  { %408 = vst [vmem:[%s1026_s3 + $0x1e0] sm:$0xff] %v344_v38  ;;  %409 = vst [vmem:[%s1026_s3 + $0x1e8] sm:$0xff] %v345_v39 }
  0x44   :  { %410 = vst [vmem:[%s1026_s3 + $0x1f0] sm:$0xff] %v346_v1  ;;  %411 = vst [vmem:[%s1026_s3 + $0x1f8] sm:$0xff] %v347_v40 }

// kernel: deconv_block_forward.2
= control target key start
LH: loop header
LB: loop body
LE: loop exit
PB: predicated region body
PF: predicated region fallthrough
CT: control target
= control target key end

     0   :  { %s3022_s12 = smov 0   ;;  %s3024_s13 = smov 0   ;;  %s3662_s0 = inlined_call_operand.vmem [shape: bf16[2,16,16,4], index: 0, kind: input, shape index: {}]   ;;  %s3663_s1 = inlined_call_operand.vmem [shape: bf16[48,128], index: 1, kind: input, shape index: {}]   ;;  %s3664_s2 = inlined_call_operand.vmem [shape: bf16[2,256,128], index: 2, kind: output, shape index: {0}]   ;;  %s3665_s3 = inlined_call_operand.vmem [shape: f32[4,2,128], index: 3, kind: output, shape index: {1}]  }
   0x1   :  { %s3026_s14 = smov 0   ;;  %s3028_s15 = smov 0  }
   0x2   :  { %s3030_s16 = smov 0  }
   0x3 LB: > { %s23_s17 = sadd.s32 1, %s2981_s14  ;;  %s26_s18 = sadd.s32 1, %s2985_s15  ;;  %s2989_s16 = sphi %s3030_s16, %s14_s16   ;;  %s2985_s15 = sphi %s3028_s15, %s3681_s15   ;;  %s2981_s14 = sphi %s3026_s14, %s3680_s14   ;;  %s2977_s13 = sphi %s3024_s13, %s3679_s13   ;;  %s2973_s12 = sphi %s3022_s12, %s3678_s12  }
   0x4   : > { %p24_p0 = scmp.ge.s32.totalorder %s23_s17, 2  ;;  %p2619_p1 = scmp.ge.s32.totalorder %s2989_s16, 1 }
   0x5   : > { %p158_p2 = scmp.lt.s32.totalorder %s2989_s16, 5 }
   0x6   : > { %s3683_s17 = smov (%p24_p0, %s23_s17), 0  ;;  %s3685_s18 = smov (!%p24_p0, %s26_s18), %s2985_s15 }
   0x7   : > { %p159_p3 = pnand %p2619_p1, %p158_p2  ;;  %p28_p4 = scmp.ge.s32.totalorder %s3685_s18, 2 }
   0x8   : > { %vm217_vm0 = vcmask (!%p159_p3), 24576   ;;  %vm218_vm1 = vsmask.f32 (!%p159_p3), 256  ;;  %v223_v0 = vld [vmem:[#allocation2 + $0xc] sm:$0x1] (!%p159_p3)  ;;  %s2625_s19 = sshll.u32 (!%p159_p3), %s2977_s13, 1 }
   0x9   : > { %s3687_s18 = smov (%p28_p4, %s3685_s18), 0  ;;  %162 = sbr.rel (%p159_p3) target bundleno = 613 (0x265), region = 28 }
   0xa   : > { %vm3059_vm2 = vmand (!%p159_p3), %vm217_vm0, %vm218_vm1  ;;  %v226_v2 = vld [vmem:[#allocation2 + $0x18] sm:$0x1] (!%p159_p3)  ;;  %v229_v3 = vld [vmem:[#allocation2 + $0x24] sm:$0x1] (!%p159_p3)  ;;  %vm250_vm3 = vsmask.f32 (!%p159_p3), 7938  ;;  %s3064_s20 = sadd.s32 (!%p159_p3), %s2973_s12, %s2625_s19 }
   0xb   : > { %v224_v4 = vsel (!%p159_p3), %vm3059_vm2, 0, %v223_v0  ;;  %v227_v5 = vsel (!%p159_p3), %vm3059_vm2, 0, %v226_v2  ;;  %v230_v6 = vsel (!%p159_p3), %vm3059_vm2, 0, %v229_v3  ;;  %v232_v7 = vld [vmem:[#allocation2 + $0x30] sm:$0x1] (!%p159_p3)  ;;  %p209_p5 = scmp.lt.s32.totalorder (!%p159_p3), %s3064_s20, 3  ;;  %vm3077_vm4 = vmand (!%p159_p3), %vm217_vm0, %vm250_vm3 }
   0xc   : > { %225 = vst [vmem:[#allocation2 + $0xc] sm:$0x1] (!%p159_p3), %v224_v4  ;;  %228 = vst [vmem:[#allocation2 + $0x18] sm:$0x1] (!%p159_p3), %v227_v5  ;;  %v233_v8 = vsel (!%p159_p3), %vm3059_vm2, 0, %v232_v7  ;;  %s2627_s21 = sshll.u32 (!%p159_p3), %s2973_s12, 3 }
   0xd   : > { %231 = vst [vmem:[#allocation2 + $0x24] sm:$0x1] (!%p159_p3), %v230_v6  ;;  %v235_v9 = vld [vmem:[#allocation2 + $0x3c] sm:$0x1] (!%p159_p3)  ;;  %v238_v10 = vld [vmem:[#allocation2 + $0x48] sm:$0x1] (!%p159_p3) }
   0xe   : > { %234 = vst [vmem:[#allocation2 + $0x30] sm:$0x1] (!%p159_p3), %v233_v8  ;;  %v236_v12 = vsel (!%p159_p3), %vm3059_vm2, 0, %v235_v9  ;;  %v239_v13 = vsel (!%p159_p3), %vm3059_vm2, 0, %v238_v10  ;;  %v241_v14 = vld [vmem:[#allocation2 + $0x54] sm:$0x1] (!%p159_p3) }
   0xf   : > { %v244_v15 = vld [vmem:[#allocation2 + $0x60] sm:$0x1] (!%p159_p3)  ;;  %237 = vst [vmem:[#allocation2 + $0x3c] sm:$0x1] (!%p159_p3), %v236_v12  ;;  %240 = vst [vmem:[#allocation2 + $0x48] sm:$0x1] (!%p159_p3), %v239_v13 }
  0x10   : > { %v242_v16 = vsel %vm3059_vm2, 0, %v241_v14  ;;  %v245_v17 = vsel %vm3059_vm2, 0, %v244_v15  ;;  %v255_v18 = vld [vmem:[#allocation2 + $0x14] sm:$0x1]  ;;  %v258_v19 = vld [vmem:[#allocation2 + $0x20] sm:$0x1] }
  0x11   : > { %243 = vst [vmem:[#allocation2 + $0x54] sm:$0x1] %v242_v16  ;;  %246 = vst [vmem:[#allocation2 + $0x60] sm:$0x1] %v245_v17  ;;  %v256_v20 = vsel %vm3077_vm4, 0, %v255_v18  ;;  %v259_v21 = vsel %vm3077_vm4, 0, %v258_v19 }
  0x12   : > { %v261_v22 = vld [vmem:[#allocation2 + $0x2c] sm:$0x1]  ;;  %v264_v23 = vld [vmem:[#allocation2 + $0x38] sm:$0x1]  ;;  %257 = vst [vmem:[#allocation2 + $0x14] sm:$0x1] %v256_v20 }
  0x13   : > { %260 = vst [vmem:[#allocation2 + $0x20] sm:$0x1] %v259_v21  ;;  %v262_v24 = vsel %vm3077_vm4, 0, %v261_v22  ;;  %v265_v25 = vsel %vm3077_vm4, 0, %v264_v23  ;;  %v267_v26 = vld [vmem:[#allocation2 + $0x44] sm:$0x1] }
  0x14   : > { %v270_v27 = vld [vmem:[#allocation2 + $0x50] sm:$0x1]  ;;  %263 = vst [vmem:[#allocation2 + $0x2c] sm:$0x1] %v262_v24  ;;  %266 = vst [vmem:[#allocation2 + $0x38] sm:$0x1] %v265_v25 }
  0x15   : > { %v268_v28 = vsel %vm3077_vm4, 0, %v267_v26  ;;  %v271_v29 = vsel %vm3077_vm4, 0, %v270_v27  ;;  %v273_v30 = vld [vmem:[#allocation2 + $0x5c] sm:$0x1]  ;;  %v276_v31 = vld [vmem:[#allocation2 + $0x68] sm:$0x1] }
  0x16   : > { %269 = vst [vmem:[#allocation2 + $0x44] sm:$0x1] %v268_v28  ;;  %272 = vst [vmem:[#allocation2 + $0x50] sm:$0x1] %v271_v29  ;;  %v274_v32 = vsel %vm3077_vm4, 0, %v273_v30  ;;  %v277_v33 = vsel %vm3077_vm4, 0, %v276_v31 }
  0x17   : > { %s3689_s20 = smov (!%p209_p5, %s3064_s20), 3  ;;  %v220_v34 = vld [vmem:[#allocation2] sm:$0x1]  ;;  %275 = vst [vmem:[#allocation2 + $0x5c] sm:$0x1] %v274_v32  ;;  %p192_p6 = scmp.lt.s32.totalorder %s2977_s13, 1 }
  0x18   : > { %278 = vst [vmem:[#allocation2 + $0x68] sm:$0x1] %v277_v33  ;;  %v221_v35 = vsel %vm3059_vm2, 0, %v220_v34  ;;  %v247_v36 = vld [vmem:[#allocation2 + $0x6c] sm:$0x1]  ;;  %s2626_s22 = sshll.u32 %s3689_s20, 1 }
  0x19   : > { %v252_v37 = vld [vmem:[#allocation2 + $0x8] sm:$0x1]  ;;  %222 = vst [vmem:[#allocation2] sm:$0x1] %v221_v35  ;;  %v248_v38 = vsel %vm3059_vm2, 0, %v247_v36  ;;  %s2622_s23 = sshll.u32 %s2973_s12, 4  ;;  %s3120_s26 = scalar_lea.vmem %s3665_s3, %s2626_s22 }
  0x1a   : > { %v253_v39 = vsel %vm3077_vm4, 0, %v252_v37  ;;  %v279_v40 = vld [vmem:[#allocation2 + $0x74] sm:$0x1]  ;;  %249 = vst [vmem:[#allocation2 + $0x6c] sm:$0x1] %v248_v38  ;;  %p200_p7 = scmp.lt.s32.totalorder %s2622_s23, 31 }
  0x1b   : > { %254 = vst [vmem:[#allocation2 + $0x8] sm:$0x1] %v253_v39  ;;  %v280_v41 = vsel %vm3077_vm4, 0, %v279_v40  ;;  %s3691_s13 = smov (!%p192_p6, %s2977_s13), 1  ;;  %s2768_s7 = sshll.u32 %s2973_s12, 6  ;;  %vm464_vm5 = vcmask 27648  }
  0x1c   : > { %281 = vst [vmem:[#allocation2 + $0x74] sm:$0x1] %v280_v41  ;;  %s3693_s23 = smov (!%p200_p7, %s2622_s23), 31  ;;  %s2766_s27 = sshll.u32 %s3691_s13, 7  ;;  %vm301_vm6 = vsmask.f32 4368  ;;  %vm3146_vm7 = vmand %vm464_vm5, %vm250_vm3 }
  0x1d   : > { %s2623_s28 = sshll.u32 %s3691_s13, 5  ;;  %s3128_s4 = scalar_lea.vmem %s3662_s0, %s2766_s27  ;;  %v466_v50 = vld [vmem:[#allocation2 + $0xc] sm:$0xf]  ;;  %vm3153_vm8 = vmor %vm218_vm1, %vm301_vm6  ;;  %v471_v63 = vld [vmem:[#allocation2 + $0x14] sm:$0x1] }
  0x1e   : > { %s203_s5 = sadd.s32 %s2623_s28, %s3693_s23  ;;  %s3137_s11 = scalar_lea.vmem %s3128_s4, %s2768_s7  ;;  %v474_v9 = vld [vmem:[#allocation2 + $0x18] sm:$0xf]  ;;  %v478_v10 = vld [vmem:[#allocation2 + $0x20] sm:$0x1]  ;;  %v481_v20 = vld [vmem:[#allocation2 + $0x24] sm:$0xf] }
  0x1f   : > { %s2624_s6 = sshll.u32 %s203_s5, 2  ;;  %v285_v42 = vld [vmem:[%s3137_s11] sm:$0xf]  ;;  %v286_v43 = vld [vmem:[%s3137_s11 + $0x4] sm:$0xf]  ;;  %p2630_p8 = scmp.ne.s32.totalorder %s2973_s12, 0 }
  0x20   : > { %s3134_s10 = scalar_lea.vmem %s3664_s2, %s2624_s6  ;;  %v287_v44 = vld [vmem:[%s3137_s11 + $0x8] sm:$0xf]  ;;  %v304_v45 = vshrl.u32 %v285_v42, 16  ;;  %v307_v46 = vshll.u32 %v285_v42, 16  ;;  %v312_v47 = vshrl.u32 %v286_v43, 16  ;;  %v315_v48 = vshll.u32 %v286_v43, 16 }
  0x21   : > { %v288_v49 = vld [vmem:[%s3137_s11 + $0xc] sm:$0xf]  ;;  %v321_v51 = vshrl.u32 %v287_v44, 16  ;;  %v324_v52 = vshll.u32 %v287_v44, 16  ;;  %v289_v55 = vld [vmem:[%s3137_s11 + $0x10] sm:$0xf] }
  0x22   : > { %v329_v53 = vshrl.u32 %v288_v49, 16  ;;  %v332_v54 = vshll.u32 %v288_v49, 16  ;;  %v306_v56 = vrot.slane %v304_v45, 7  ;;  %v314_v58 = vrot.slane %v312_v47, 7  ;;  %v290_v61 = vld [vmem:[%s3137_s11 + $0x14] sm:$0xf] }
  0x23   : > { %v338_v59 = vshrl.u32 %v289_v55, 16  ;;  %v341_v60 = vshll.u32 %v289_v55, 16  ;;  %v323_v0 = vrot.slane %v321_v51, 7  ;;  %v346_v3 = vshrl.u32 %v290_v61, 16  ;;  %v291_v15 = vld [vmem:[%s3137_s11 + $0x18] sm:$0xf] }
  0x24   : > { %v331_v2 = vrot.slane %v329_v53, 7  ;;  %v349_v4 = vshll.u32 %v290_v61, 16  ;;  %v309_v5 = vor.u32 %v307_v46, %v306_v56  ;;  %v310_v6 = vrot.slane %v306_v56, 4  ;;  %v292_v21 = vld [vmem:[%s3137_s11 + $0x1c] sm:$0xf] }
  0x25   : > { %v317_v7 = vor.u32 %v315_v48, %v314_v58  ;;  %v319_v8 = vrot.slane %v314_v58, 4  ;;  %v326_v11 = vor.u32 %v324_v52, %v323_v0  ;;  %v327_v12 = vrot.slane %v323_v0, 4  ;;  %v485_v26 = vld [vmem:[#allocation2 + $0x2c] sm:$0x1]  ;;  %v293_v27 = vld [vmem:[%s3137_s11 + $0x20] sm:$0xf] }
  0x26   : > { %v334_v13 = vor.u32 %v332_v54, %v331_v2  ;;  %v336_v14 = vrot.slane %v331_v2, 4  ;;  %v467_v16 = vsel %vm3146_vm7, %v309_v5, %v466_v50  ;;  %v340_v19 = vrot.slane %v338_v59, 7  ;;  %v294_v32 = vld [vmem:[%s3137_s11 + $0x24] sm:$0xf]  ;;  %v295_v41 = vld [vmem:[%s3137_s11 + $0x28] sm:$0xf] }
  0x27   : > { %v318_v17 = vsel %vm3153_vm8, %v310_v6, %v317_v7  ;;  %v472_v18 = vsel %vm3059_vm2, %v319_v8, %v471_v63  ;;  %468 = vst [vmem:[#allocation2 + $0xc] sm:$0xf] %v467_v16  ;;  %v475_v22 = vsel %vm3146_vm7, %v326_v11, %v474_v9  ;;  %v348_v25 = vrot.slane %v346_v3, 7  ;;  %v488_v44 = vld [vmem:[#allocation2 + $0x30] sm:$0xf] }
  0x28   : > { %470 = vst.msk [vmem:[#allocation2 + $0x10] sm:$0xf] %vm464_vm5, %v318_v17  ;;  %473 = vst [vmem:[#allocation2 + $0x14] sm:$0x1] %v472_v18  ;;  %v335_v23 = vsel %vm3153_vm8, %v327_v12, %v334_v13  ;;  %v479_v24 = vsel %vm3059_vm2, %v336_v14, %v478_v10  ;;  %v343_v28 = vor.u32 %v341_v60, %v340_v19  ;;  %v344_v29 = vrot.slane %v340_v19, 4 }
  0x29   : > { %476 = vst [vmem:[#allocation2 + $0x18] sm:$0xf] %v475_v22  ;;  %477 = vst.msk [vmem:[#allocation2 + $0x1c] sm:$0xf] %vm464_vm5, %v335_v23  ;;  %v355_v30 = vshrl.u32 %v291_v15, 16  ;;  %v358_v31 = vshll.u32 %v291_v15, 16  ;;  %v351_v33 = vor.u32 %v349_v4, %v348_v25 }
  0x2a   : > { %480 = vst [vmem:[#allocation2 + $0x20] sm:$0x1] %v479_v24  ;;  %v353_v34 = vrot.slane %v348_v25, 4  ;;  %v363_v35 = vshrl.u32 %v292_v21, 16  ;;  %v366_v36 = vshll.u32 %v292_v21, 16  ;;  %v482_v37 = vsel %vm3146_vm7, %v343_v28, %v481_v20 }
  0x2b   : > { %v357_v38 = vrot.slane %v355_v30, 7  ;;  %v372_v39 = vshrl.u32 %v293_v27, 16  ;;  %v375_v40 = vshll.u32 %v293_v27, 16  ;;  %483 = vst [vmem:[#allocation2 + $0x24] sm:$0xf] %v482_v37  ;;  %v352_v42 = vsel %vm3153_vm8, %v344_v29, %v351_v33 }
  0x2c   : > { %v486_v43 = vsel %vm3059_vm2, %v353_v34, %v485_v26  ;;  %v365_v45 = vrot.slane %v363_v35, 7  ;;  %v492_v46 = vld [vmem:[#allocation2 + $0x38] sm:$0x1]  ;;  %v380_v47 = vshrl.u32 %v294_v32, 16  ;;  %484 = vst.msk [vmem:[#allocation2 + $0x28] sm:$0xf] %vm464_vm5, %v352_v42 }
  0x2d   : > { %487 = vst [vmem:[#allocation2 + $0x2c] sm:$0x1] %v486_v43  ;;  %v360_v48 = vor.u32 %v358_v31, %v357_v38  ;;  %v361_v49 = vrot.slane %v357_v38, 4  ;;  %v374_v50 = vrot.slane %v372_v39, 7  ;;  %v495_v51 = vld [vmem:[#allocation2 + $0x3c] sm:$0xf] }
  0x2e   : > { %v383_v52 = vshll.u32 %v294_v32, 16  ;;  %v368_v53 = vor.u32 %v366_v36, %v365_v45  ;;  %v370_v54 = vrot.slane %v365_v45, 4  ;;  %v382_v55 = vrot.slane %v380_v47, 7  ;;  %v296_v58 = vld [vmem:[%s3137_s11 + $0x2c] sm:$0xf] }
  0x2f   : > { %v389_v56 = vshrl.u32 %v295_v41, 16  ;;  %v489_v59 = vsel %vm3146_vm7, %v360_v48, %v488_v44  ;;  %v377_v60 = vor.u32 %v375_v40, %v374_v50  ;;  %v378_v61 = vrot.slane %v374_v50, 4  ;;  %v499_v63 = vld [vmem:[#allocation2 + $0x44] sm:$0x1]  ;;  %v297_v2 = vld [vmem:[%s3137_s11 + $0x30] sm:$0xf] }
  0x30   : > { %v392_v0 = vshll.u32 %v295_v41, 16  ;;  %490 = vst [vmem:[#allocation2 + $0x30] sm:$0xf] %v489_v59  ;;  %v369_v3 = vsel %vm3153_vm8, %v361_v49, %v368_v53  ;;  %v493_v4 = vsel %vm3059_vm2, %v370_v54, %v492_v46  ;;  %v385_v5 = vor.u32 %v383_v52, %v382_v55  ;;  %v298_v7 = vld [vmem:[%s3137_s11 + $0x34] sm:$0xf] }
  0x31   : > { %v387_v6 = vrot.slane %v382_v55, 4  ;;  %491 = vst.msk [vmem:[#allocation2 + $0x34] sm:$0xf] %vm464_vm5, %v369_v3  ;;  %494 = vst [vmem:[#allocation2 + $0x38] sm:$0x1] %v493_v4  ;;  %v496_v8 = vsel %vm3146_vm7, %v377_v60, %v495_v51  ;;  %v391_v9 = vrot.slane %v389_v56, 7 }
  0x32   : > { %v397_v10 = vshrl.u32 %v296_v58, 16  ;;  %v400_v11 = vshll.u32 %v296_v58, 16  ;;  %v299_v12 = vld [vmem:[%s3137_s11 + $0x38] sm:$0xf]  ;;  %497 = vst [vmem:[#allocation2 + $0x3c] sm:$0xf] %v496_v8  ;;  %v386_v13 = vsel %vm3153_vm8, %v378_v61, %v385_v5 }
  0x33   : > { %v500_v14 = vsel %vm3059_vm2, %v387_v6, %v499_v63  ;;  %v502_v15 = vld [vmem:[#allocation2 + $0x48] sm:$0xf]  ;;  %v406_v16 = vshrl.u32 %v297_v2, 16  ;;  %v409_v17 = vshll.u32 %v297_v2, 16  ;;  %498 = vst.msk [vmem:[#allocation2 + $0x40] sm:$0xf] %vm464_vm5, %v386_v13  ;;  %v394_v18 = vor.u32 %v392_v0, %v391_v9 }
  0x34   : > { %501 = vst [vmem:[#allocation2 + $0x44] sm:$0x1] %v500_v14  ;;  %v395_v19 = vrot.slane %v391_v9, 4  ;;  %v399_v20 = vrot.slane %v397_v10, 7  ;;  %v414_v21 = vshrl.u32 %v298_v7, 16  ;;  %v417_v25 = vshll.u32 %v298_v7, 16 }
  0x35   : > { %v300_v22 = vld [vmem:[%s3137_s11 + $0x3c] sm:$0xf]  ;;  %v506_v23 = vld [vmem:[#allocation2 + $0x50] sm:$0x1]  ;;  %v408_v24 = vrot.slane %v406_v16, 7  ;;  %v423_v26 = vshrl.u32 %v299_v12, 16  ;;  %v503_v28 = vsel %vm3146_vm7, %v394_v18, %v502_v15 }
  0x36   : > { %v426_v27 = vshll.u32 %v299_v12, 16  ;;  %v402_v29 = vor.u32 %v400_v11, %v399_v20  ;;  %v404_v30 = vrot.slane %v399_v20, 4  ;;  %v509_v31 = vld [vmem:[#allocation2 + $0x54] sm:$0xf]  ;;  %v416_v32 = vrot.slane %v414_v21, 7 }
  0x37   : > { %504 = vst [vmem:[#allocation2 + $0x48] sm:$0xf] %v503_v28  ;;  %v411_v33 = vor.u32 %v409_v17, %v408_v24  ;;  %v412_v34 = vrot.slane %v408_v24, 4  ;;  %v513_v35 = vld [vmem:[#allocation2 + $0x5c] sm:$0x1]  ;;  %v425_v36 = vrot.slane %v423_v26, 7 }
  0x38   : > { %v431_v37 = vshrl.u32 %v300_v22, 16  ;;  %v403_v38 = vsel %vm3153_vm8, %v395_v19, %v402_v29  ;;  %v507_v39 = vsel %vm3059_vm2, %v404_v30, %v506_v23  ;;  %v419_v40 = vor.u32 %v417_v25, %v416_v32  ;;  %v516_v42 = vld [vmem:[#allocation2 + $0x60] sm:$0xf]  ;;  %v520_v50 = vld [vmem:[#allocation2 + $0x68] sm:$0x1] }
  0x39   : > { %v421_v41 = vrot.slane %v416_v32, 4  ;;  %505 = vst.msk [vmem:[#allocation2 + $0x4c] sm:$0xf] %vm464_vm5, %v403_v38  ;;  %508 = vst [vmem:[#allocation2 + $0x50] sm:$0x1] %v507_v39  ;;  %v510_v43 = vsel %vm3146_vm7, %v411_v33, %v509_v31  ;;  %v428_v44 = vor.u32 %v426_v27, %v425_v36  ;;  %v429_v48 = vrot.slane %v425_v36, 4 }
  0x3a   : > { %v433_v45 = vrot.slane %v431_v37, 7  ;;  %511 = vst [vmem:[#allocation2 + $0x54] sm:$0xf] %v510_v43  ;;  %v420_v46 = vsel %vm3153_vm8, %v412_v34, %v419_v40  ;;  %v434_v49 = vshll.u32 %v300_v22, 16  ;;  %526 = sbr.rel (%p2630_p8) target bundleno = 65 (0x41), region = 32  ;;  %v2991_v60 = vmov (!%p2630_p8), 0  }
  0x3b   : > { %v514_v47 = vsel %vm3059_vm2, %v421_v41, %v513_v35  ;;  %512 = vst.msk [vmem:[#allocation2 + $0x58] sm:$0xf] %vm464_vm5, %v420_v46  ;;  %v517_v51 = vsel %vm3146_vm7, %v428_v44, %v516_v42  ;;  %v527_v56 = vld [vmem:[#allocation2] sm:$0xf] (!%p2630_p8)  ;;  %v531_v58 = vld [vmem:[#allocation2 + $0x8] sm:$0x1] (!%p2630_p8) }
  0x3c   : > { %515 = vst [vmem:[#allocation2 + $0x5c] sm:$0x1] %v514_v47  ;;  %v438_v52 = vrot.slane %v433_v45, 4  ;;  %518 = vst [vmem:[#allocation2 + $0x60] sm:$0xf] %v517_v51  ;;  %v436_v53 = vor.u32 %v434_v49, %v433_v45  ;;  %v528_v59 = vsel (!%p2630_p8), %vm3146_vm7, 0, %v527_v56 }
  0x3d   : > { %530 = vst.msk [vmem:[#allocation2 + $0x4] sm:$0xf] (!%p2630_p8), %vm464_vm5, %v2991_v60  ;;  %v532_v61 = vsel (!%p2630_p8), %vm3059_vm2, 0, %v531_v58  ;;  %529 = vst [vmem:[#allocation2] sm:$0xf] (!%p2630_p8), %v528_v59 }
  0x3e   : > { %v521_v54 = vsel %vm3059_vm2, %v438_v52, %v520_v50  ;;  %v437_v55 = vsel %vm3153_vm8, %v429_v48, %v436_v53  ;;  %533 = vst [vmem:[#allocation2 + $0x8] sm:$0x1] (!%p2630_p8), %v532_v61 }
  0x3f   : > { %522 = vst [vmem:[#allocation2 + $0x68] sm:$0x1] %v521_v54  ;;  %519 = vst.msk [vmem:[#allocation2 + $0x64] sm:$0xf] %vm464_vm5, %v437_v55 }
  0x41 PF: > { %p2631_p9 = scmp.le.s32.totalorder %s2973_s12, 0 }
  0x42   : > { %s2632_s13 = sadd.s32 (!%p2631_p9), 4294967295, %s2627_s21 }
  0x43   : > { %537 = sbr.rel (%p2631_p9) target bundleno = 79 (0x4f), region = 36  ;;  %s2769_s19 = sshll.u32 (!%p2631_p9), %s2632_s13, 3 }
  0x44   : > { %s541_s20 = scalar_lea.vmem (!%p2631_p9), %s3128_s4, %s2769_s19  ;;  %v564_v8 = vld [vmem:[#allocation2] sm:$0xf] (!%p2631_p9) }
  0x45   : > { %v542_v63 = vld [vmem:[%s541_s20] sm:$0xf] (!%p2631_p9)  ;;  %v543_v0 = vld [vmem:[%s541_s20 + $0x4] sm:$0xf] (!%p2631_p9)  ;;  %v568_v9 = vld [vmem:[#allocation2 + $0x8] sm:$0x1] (!%p2631_p9) }
  0x46   : > { %v545_v2 = vshrl.u32 (!%p2631_p9), %v542_v63, 16  ;;  %v548_v3 = vshll.u32 (!%p2631_p9), %v542_v63, 16  ;;  %v553_v4 = vshrl.u32 (!%p2631_p9), %v543_v0, 16  ;;  %v556_v5 = vshll.u32 (!%p2631_p9), %v543_v0, 16 }
  0x48   : > { %v547_v6 = vrot.slane (!%p2631_p9), %v545_v2, 7  ;;  %v555_v7 = vrot.slane (!%p2631_p9), %v553_v4, 7 }
  0x4a   : > { %v550_v10 = vor.u32 %v548_v3, %v547_v6  ;;  %v551_v11 = vrot.slane %v547_v6, 4  ;;  %v558_v12 = vor.u32 %v556_v5, %v555_v7  ;;  %v560_v13 = vrot.slane %v555_v7, 4 }
  0x4c   : > { %v565_v14 = vsel %vm3146_vm7, %v550_v10, %v564_v8  ;;  %v559_v15 = vsel %vm3153_vm8, %v551_v11, %v558_v12  ;;  %v569_v16 = vsel %vm3059_vm2, %v560_v13, %v568_v9 }
  0x4d   : > { %566 = vst [vmem:[#allocation2] sm:$0xf] %v565_v14  ;;  %567 = vst.msk [vmem:[#allocation2 + $0x4] sm:$0xf] %vm464_vm5, %v559_v15 }
  0x4e   : > { %570 = vst [vmem:[#allocation2 + $0x8] sm:$0x1] %v569_v16 }
  0x4f PF: > { %p2635_p10 = scmp.ne.s32.totalorder %s2973_s12, 1 }
  0x50   : > { %v576_v17 = vld [vmem:[#allocation2 + $0x6c] sm:$0xf] (!%p2635_p10)  ;;  %v580_v18 = vld [vmem:[#allocation2 + $0x74] sm:$0x1] (!%p2635_p10)  ;;  %v2992_v20 = vmov (!%p2635_p10), 0  }
  0x51   : > { %574 = sbr.rel (%p2635_p10) target bundleno = 88 (0x58), region = 40  ;;  %v577_v19 = vsel (!%p2635_p10), %vm3146_vm7, 0, %v576_v17  ;;  %579 = vst.msk [vmem:[#allocation2 + $0x70] sm:$0xf] (!%p2635_p10), %vm464_vm5, %v2992_v20  ;;  %v581_v21 = vsel (!%p2635_p10), %vm3059_vm2, 0, %v580_v18 }
  0x52   : > { %578 = vst [vmem:[#allocation2 + $0x6c] sm:$0xf] (!%p2635_p10), %v577_v19  ;;  %582 = vst [vmem:[#allocation2 + $0x74] sm:$0x1] (!%p2635_p10), %v581_v21 }
  0x58 PF: > { %p2636_p11 = scmp.ge.s32.totalorder %s2973_s12, 1 }
  0x59   : > { %v2639_v22 = vld [vmem:[%s3137_s11 + $0x40] sm:$0xf] (!%p2636_p11)  ;;  %v2640_v23 = vld [vmem:[%s3137_s11 + $0x44] sm:$0xf] (!%p2636_p11)  ;;  %v614_v30 = vld [vmem:[#allocation2 + $0x6c] sm:$0xf] (!%p2636_p11) }
  0x5a   : > { %586 = sbr.rel (%p2636_p11) target bundleno = 99 (0x63), region = 44  ;;  %v594_v24 = vshrl.u32 (!%p2636_p11), %v2639_v22, 16  ;;  %v597_v25 = vshll.u32 (!%p2636_p11), %v2639_v22, 16  ;;  %v602_v26 = vshrl.u32 (!%p2636_p11), %v2640_v23, 16  ;;  %v605_v27 = vshll.u32 (!%p2636_p11), %v2640_v23, 16 }
  0x5b   : > { %v618_v31 = vld [vmem:[#allocation2 + $0x74] sm:$0x1] (!%p2636_p11) }
  0x5c   : > { %v596_v28 = vrot.slane (!%p2636_p11), %v594_v24, 7  ;;  %v604_v29 = vrot.slane (!%p2636_p11), %v602_v26, 7 }
  0x5e   : > { %v599_v32 = vor.u32 (!%p2636_p11), %v597_v25, %v596_v28  ;;  %v600_v33 = vrot.slane (!%p2636_p11), %v596_v28, 4  ;;  %v607_v34 = vor.u32 (!%p2636_p11), %v605_v27, %v604_v29  ;;  %v609_v35 = vrot.slane (!%p2636_p11), %v604_v29, 4 }
  0x60   : > { %v615_v36 = vsel (!%p2636_p11), %vm3146_vm7, %v599_v32, %v614_v30  ;;  %v608_v37 = vsel (!%p2636_p11), %vm3153_vm8, %v600_v33, %v607_v34  ;;  %v619_v38 = vsel (!%p2636_p11), %vm3059_vm2, %v609_v35, %v618_v31 }
  0x61   : > { %616 = vst [vmem:[#allocation2 + $0x6c] sm:$0xf] %v615_v36  ;;  %617 = vst.msk [vmem:[#allocation2 + $0x70] sm:$0xf] %vm464_vm5, %v608_v37 }
  0x62   : > { %620 = vst [vmem:[#allocation2 + $0x74] sm:$0x1] %v619_v38 }
  0x63 PF: > { %v2924_v39 = vld [vmem:[#allocation2 + $0xc] sm:$0xff]   ;;  %v2925_v40 = vld [vmem:[#allocation2 + $0x18] sm:$0xff]   ;;  %s2993_s12 = smov 12   ;;  %v703_v41 = vld [vmem:[#allocation2] sm:$0xf]  ;;  %vm1027_vm11 = vcmask 1042432  }
  0x64   : > { %1199 = vrot.lane.b32.xlu0 %v2924_v39, %s2993_s12  ;;  %v704_v42 = vld [vmem:[#allocation2 + $0x4] sm:$0xf]  ;;  %v705_v57 = vld [vmem:[#allocation2 + $0x8] sm:$0x1]  ;;  %1201 = vrot.lane.b32.xlu1 %v2925_v40, %s2993_s12  ;;  %vm727_vm9 = vsmask.f32 3328 }
  0x65   : > { %vm728_vm10 = vsmask.f32 7440  ;;  %v731_v62 = vshrl.u32 %v703_v41, 16  ;;  %v734_v1 = vshll.u32 %v703_v41, 16  ;;  %v740_v43 = vshll.u32 %v704_v42, 16  ;;  %s2994_s21 = smov 8  }
  0x66   : > { %v744_v44 = vshrl.u32 %v704_v42, 16  ;;  %v750_v45 = vshll.u32 %v705_v57, 16  ;;  %v979_v46 = vld [vmem:[#allocation2] sm:$0xe]  ;;  %v980_v49 = vld [vmem:[#allocation2 + $0x4] sm:$0xf]  ;;  %vm3264_vm14 = vmor %vm727_vm9, %vm728_vm10 }
  0x67   : > { %v733_v47 = vrot.slane %v731_v62, 4  ;;  %v736_v48 = vrot.slane %v734_v1, 5  ;;  %v981_v50 = vld [vmem:[#allocation2 + $0x8] sm:$0x1]  ;;  %v742_v51 = vrot.slane %v740_v43, 5  ;;  %vm1028_vm12 = vcmask 1046532  }
  0x68   : > { %v746_v52 = vrot.slane %v744_v44, 4  ;;  %v752_v53 = vrot.slane %v750_v45, 5  ;;  %vm3258_vm13 = vmor %vm1027_vm11, %vm1028_vm12  ;;  %v2657_v56 = vrot.slane %v979_v46, 9  ;;  %v1032_v58 = vrot.slane %v980_v49, 5  ;;  %v706_v60 = vld [vmem:[#allocation2 + $0xc] sm:$0xf] }
  0x69   : > { %v737_v54 = vor.u32 %v736_v48, %v733_v47  ;;  %v1035_v59 = vrot.slane %v981_v50, 5  ;;  %v707_v0 = vld [vmem:[#allocation2 + $0x10] sm:$0xf]  ;;  %v708_v2 = vld [vmem:[#allocation2 + $0x14] sm:$0x1]  ;;  %v755_v3 = vshrl.u32 %v706_v60, 16 }
  0x6a   : > { %v747_v63 = vor.u32 %v746_v52, %v742_v51  ;;  %v758_v4 = vshll.u32 %v706_v60, 16  ;;  %v1033_v6 = vsel %vm3258_vm13, %v2657_v56, %v1032_v58  ;;  %v1034_v7 = vrot.slane %v1032_v58, 4  ;;  %v982_v9 = vld [vmem:[#allocation2 + $0xc] sm:$0xe]  ;;  %v983_v14 = vld [vmem:[#allocation2 + $0x10] sm:$0xf] }
  0x6b   : > { %v738_v5 = vrot.slane %v737_v54, 4  ;;  %v764_v8 = vshll.u32 %v707_v0, 16  ;;  %v757_v11 = vrot.slane %v755_v3, 4  ;;  %v768_v13 = vshrl.u32 %v707_v0, 16  ;;  %v984_v19 = vld [vmem:[#allocation2 + $0x14] sm:$0x1] }
  0x6c   : > { %v748_v10 = vrot.slane %v747_v63, 4  ;;  %v760_v12 = vrot.slane %v758_v4, 5  ;;  %v1036_v16 = vsel %vm3258_vm13, %v1034_v7, %v1035_v59  ;;  %v774_v18 = vshll.u32 %v708_v2, 16  ;;  %v1232_v20 = vld [vmem:[#allocation2 + $0xc] sm:$0xf]  ;;  %s2995_s22 = smov 4  }
  0x6d   : > { %v743_v15 = vsel %vm3264_vm14, %v738_v5, %v742_v51  ;;  %v766_v17 = vrot.slane %v764_v8, 5  ;;  %v2665_v22 = vcombine.low %v1033_v6, %v1036_v16  ;;  %v770_v24 = vrot.slane %v768_v13, 4  ;;  %v1233_v25 = vld [vmem:[#allocation2 + $0x10] sm:$0xf]  ;;  %v1234_v33 = vld [vmem:[#allocation2 + $0x14] sm:$0x1] }
  0x6e   : > { %v753_v21 = vsel %vm3264_vm14, %v748_v10, %v752_v53  ;;  %v761_v23 = vor.u32 %v760_v12, %v757_v11  ;;  %v776_v27 = vrot.slane %v774_v18, 5  ;;  %v2658_v28 = vrot.slane %v982_v9, 9  ;;  %v1235_v39 = vld [vmem:[#allocation2 + $0x18] sm:$0xf]  ;;  %v1236_v45 = vld [vmem:[#allocation2 + $0x1c] sm:$0xf] }
  0x6f   : > { %v2649_v26 = vcombine.low %v743_v15, %v753_v21  ;;  %v1039_v29 = vrot.slane %v983_v14, 5  ;;  %1110 = vrot.lane.b32.xlu1 %v2665_v22, %s2994_s21  ;;  %v771_v31 = vor.u32 %v770_v24, %v766_v17  ;;  %v1042_v32 = vrot.slane %v984_v19, 5  ;;  %v1237_v49 = vld [vmem:[#allocation2 + $0x20] sm:$0x1]  ;;  %v1505_v51 = vld [vmem:[#allocation2 + $0xc] sm:$0xe] }
  0x70   : > { %v762_v30 = vrot.slane %v761_v23, 4  ;;  %v1257_v34 = vshrl.u32 %v1232_v20, 16  ;;  %v1260_v37 = vshll.u32 %v1232_v20, 16  ;;  %v1266_v38 = vshll.u32 %v1233_v25, 16  ;;  %v1506_v58 = vld [vmem:[#allocation2 + $0x10] sm:$0xf] }
  0x71   : > { %946 = vrot.lane.b32.xlu0 %v2649_v26, %s2995_s22  ;;  %v1040_v35 = vsel %vm3258_vm13, %v2658_v28, %v1039_v29  ;;  %v1041_v36 = vrot.slane %v1039_v29, 4  ;;  %v772_v41 = vrot.slane %v771_v31, 4  ;;  %v1270_v57 = vshrl.u32 %v1233_v25, 16  ;;  %v1507_v59 = vld [vmem:[#allocation2 + $0x14] sm:$0x1]  ;;  %s2996_s23 = smov 16  }
  0x72   : > { %v767_v40 = vsel %vm3264_vm14, %v762_v30, %v766_v17  ;;  %v1259_v42 = vrot.slane %v1257_v34, 4  ;;  %v1262_v1 = vrot.slane %v1260_v37, 5  ;;  %v1268_v43 = vrot.slane %v1266_v38, 5  ;;  %v1508_v3 = vld [vmem:[#allocation2 + $0x18] sm:$0xe]  ;;  %s2997_s24 = smov 20  }
  0x73   : > { %v1043_v62 = vsel %vm3258_vm13, %v1041_v36, %v1042_v32  ;;  %v1276_v44 = vshll.u32 %v1234_v33, 16  ;;  %v777_v46 = vsel %vm3264_vm14, %v772_v41, %v776_v27  ;;  %v1272_v48 = vrot.slane %v1270_v57, 4  ;;  %v1509_v4 = vld [vmem:[#allocation2 + $0x1c] sm:$0xf]  ;;  %v1510_v9 = vld [vmem:[#allocation2 + $0x20] sm:$0x1] }
  0x74   : > { %v2666_v47 = vcombine.low %v1040_v35, %v1043_v62  ;;  %v1281_v50 = vshrl.u32 %v1235_v39, 16  ;;  %v2650_v52 = vcombine.low %v767_v40, %v777_v46  ;;  %v1263_v53 = vor.u32 %v1262_v1, %v1259_v42  ;;  %v1756_v18 = vld [vmem:[#allocation2 + $0x18] sm:$0xf]  ;;  %v1757_v27 = vld [vmem:[#allocation2 + $0x1c] sm:$0xf]  ;;  %s2998_s25 = smov 24  }
  0x75   : > { %v1278_v54 = vrot.slane %v1276_v44, 5  ;;  %v1284_v56 = vshll.u32 %v1235_v39, 16  ;;  %v1273_v60 = vor.u32 %v1272_v48, %v1268_v43  ;;  %v1290_v0 = vshll.u32 %v1236_v45, 16  ;;  %v1758_v31 = vld [vmem:[#allocation2 + $0x20] sm:$0x1]  ;;  %s2999_s27 = smov 28  }
  0x76   : > { %1112 = vrot.lane.b32.xlu1 %v2666_v47, %s2994_s21  ;;  %v1283_v63 = vrot.slane %v1281_v50, 4  ;;  %v1294_v2 = vshrl.u32 %v1236_v45, 16  ;;  %948 = vrot.lane.b32.xlu0 %v2650_v52, %s2995_s22  ;;  %v1264_v5 = vrot.slane %v1263_v53, 4  ;;  %v1300_v7 = vshll.u32 %v1237_v49, 16  ;;  %v1759_v37 = vld [vmem:[#allocation2 + $0x24] sm:$0xf] }
  0x77   : > { %v1286_v6 = vrot.slane %v1284_v56, 5  ;;  %v2689_v8 = vrot.slane %v1505_v51, 9  ;;  %v1274_v10 = vrot.slane %v1273_v60, 4  ;;  %v1292_v11 = vrot.slane %v1290_v0, 5  ;;  %v1760_v42 = vld [vmem:[#allocation2 + $0x28] sm:$0xf] }
  0x78   : > { %v1296_v12 = vrot.slane %v1294_v2, 4  ;;  %v1555_v13 = vrot.slane %v1506_v58, 5  ;;  %v1269_v14 = vsel %vm3264_vm14, %v1264_v5, %v1268_v43  ;;  %v1302_v16 = vrot.slane %v1300_v7, 5  ;;  %v1761_v44 = vld [vmem:[#allocation2 + $0x2c] sm:$0x1]  ;;  %v2926_v47 = vld [vmem:[#allocation2 + $0x18] sm:$0xff]  }
  0x79   : > { %v1287_v15 = vor.u32 %v1286_v6, %v1283_v63  ;;  %v1558_v17 = vrot.slane %v1507_v59, 5  ;;  %v1279_v19 = vsel %vm3264_vm14, %v1274_v10, %v1278_v54  ;;  %v2690_v25 = vrot.slane %v1508_v3, 9  ;;  %v2029_v45 = vld [vmem:[#allocation2 + $0x18] sm:$0xe]  ;;  %v2030_v51 = vld [vmem:[#allocation2 + $0x1c] sm:$0xf] }
  0x7a   : > { %v1297_v20 = vor.u32 %v1296_v12, %v1292_v11  ;;  %v1556_v21 = vsel %vm3258_vm13, %v2689_v8, %v1555_v13  ;;  %v1557_v22 = vrot.slane %v1555_v13, 4  ;;  %v2681_v23 = vcombine.low %v1269_v14, %v1279_v19  ;;  %v2031_v58 = vld [vmem:[#allocation2 + $0x20] sm:$0x1]  ;;  %v709_v2 = vld [vmem:[#allocation2 + $0x18] sm:$0xf]  ;;  %s3000_s30 = smov 32  }
  0x7b   : > { %v1288_v24 = vrot.slane %v1287_v15, 4  ;;  %v1562_v26 = vrot.slane %v1509_v4, 5  ;;  %v1565_v30 = vrot.slane %v1510_v9, 5  ;;  %v1781_v32 = vshrl.u32 %v1756_v18, 16  ;;  %v710_v15 = vld [vmem:[#allocation2 + $0x1c] sm:$0xf] }
  0x7c   : > { %v1298_v28 = vrot.slane %v1297_v20, 4  ;;  %v1559_v29 = vsel %vm3258_vm13, %v1557_v22, %v1558_v17  ;;  %1472 = vrot.lane.b32.xlu0 %v2681_v23, %s2996_s23  ;;  %v1784_v40 = vshll.u32 %v1756_v18, 16  ;;  %v1790_v41 = vshll.u32 %v1757_v27, 16 }
  0x7d   : > { %v1293_v33 = vsel %vm3264_vm14, %v1288_v24, %v1292_v11  ;;  %v2697_v34 = vcombine.low %v1556_v21, %v1559_v29  ;;  %v1563_v35 = vsel %vm3258_vm13, %v2690_v25, %v1562_v26  ;;  %v1564_v36 = vrot.slane %v1562_v26, 4  ;;  %v2927_v11 = vld [vmem:[#allocation2 + $0x24] sm:$0xff]   ;;  %v711_v21 = vld [vmem:[#allocation2 + $0x20] sm:$0x1] }
  0x7e   : > { %v1303_v38 = vsel %vm3264_vm14, %v1298_v28, %v1302_v16  ;;  %v1783_v39 = vrot.slane %v1781_v32, 4  ;;  %v1794_v1 = vshrl.u32 %v1757_v27, 16  ;;  %v1800_v43 = vshll.u32 %v1758_v31, 16  ;;  %v2032_v26 = vld [vmem:[#allocation2 + $0x24] sm:$0xe] }
  0x7f   : > { %v2682_v57 = vcombine.low %v1293_v33, %v1303_v38  ;;  %v1566_v62 = vsel %vm3258_vm13, %v1564_v36, %v1565_v30  ;;  %v1786_v48 = vrot.slane %v1784_v40, 5  ;;  %v1792_v49 = vrot.slane %v1790_v41, 5  ;;  %v2033_v31 = vld [vmem:[#allocation2 + $0x28] sm:$0xf]  ;;  %v2034_v32 = vld [vmem:[#allocation2 + $0x2c] sm:$0x1] }
  0x80   : > { %v2698_v46 = vcombine.low %v1563_v35, %v1566_v62  ;;  %v1805_v50 = vshrl.u32 %v1759_v37, 16  ;;  %1633 = vrot.lane.b32.xlu0 %v2697_v34, %s2997_s24  ;;  %v1796_v52 = vrot.slane %v1794_v1, 4  ;;  %v1802_v53 = vrot.slane %v1800_v43, 5  ;;  %v713_v38 = vld [vmem:[#allocation2 + $0x28] sm:$0xf]  ;;  %v2942_v62 = vld [vmem:[%s3663_s1] sm:$0xff]  }
  0x81   : > { %1474 = vrot.lane.b32.xlu1 %v2682_v57, %s2996_s23  ;;  %v1808_v54 = vshll.u32 %v1759_v37, 16  ;;  %v1814_v56 = vshll.u32 %v1760_v42, 16  ;;  %v1787_v59 = vor.u32 %v1786_v48, %v1783_v39  ;;  %v1818_v63 = vshrl.u32 %v1760_v42, 16  ;;  %v712_v37 = vld [vmem:[#allocation2 + $0x24] sm:$0xf]  ;;  %2845 = vmatprep.subr.bf16.mxu0 %v2942_v62 }
  0x82   : > { %v1807_v60 = vrot.slane %v1805_v50, 4  ;;  %v1824_v0 = vshll.u32 %v1761_v44, 16  ;;  %v1797_v3 = vor.u32 %v1796_v52, %v1792_v49  ;;  %v2721_v6 = vrot.slane %v2029_v45, 9  ;;  %v714_v57 = vld [vmem:[#allocation2 + $0x2c] sm:$0x1]  ;;  %2867 = vmatprep.subr.bf16.mxu1 %v2942_v62  ;;  %2846 = vmatpush3.bf16.msra.mxu0 %v2942_v62 }
  0x83   : > { %v1810_v4 = vrot.slane %v1808_v54, 5  ;;  %v1816_v5 = vrot.slane %v1814_v56, 5  ;;  %v1788_v7 = vrot.slane %v1787_v59, 4  ;;  %v1820_v8 = vrot.slane %v1818_v63, 4  ;;  %v985_v54 = vld [vmem:[#allocation2 + $0x18] sm:$0xe]  ;;  %2870 = vmatpush3.bf16.msra.mxu1 %v2942_v62 }
  0x84   : > { %v1826_v9 = vrot.slane %v1824_v0, 5  ;;  %v2079_v10 = vrot.slane %v2030_v51, 5  ;;  %1723 = vrot.lane.b32.xlu0 %v2926_v47, %s2998_s25  ;;  %v1798_v12 = vrot.slane %v1797_v3, 4  ;;  %v2082_v14 = vrot.slane %v2031_v58, 5  ;;  %v986_v63 = vld [vmem:[#allocation2 + $0x1c] sm:$0xf] }
  0x85   : > { %1635 = vrot.lane.b32.xlu1 %v2698_v46, %s2997_s24  ;;  %v1811_v13 = vor.u32 %v1810_v4, %v1807_v60  ;;  %v779_v16 = vshrl.u32 %v709_v2, 16  ;;  %v1793_v17 = vsel %vm3264_vm14, %v1788_v7, %v1792_v49  ;;  %v1821_v18 = vor.u32 %v1820_v8, %v1816_v5 }
  0x86   : > { %v2080_v19 = vsel %vm3258_vm13, %v2721_v6, %v2079_v10  ;;  %v2081_v20 = vrot.slane %v2079_v10, 4  ;;  %v1803_v22 = vsel %vm3264_vm14, %v1798_v12, %v1802_v53  ;;  %v782_v25 = vshll.u32 %v709_v2, 16  ;;  %v988_v6 = vld [vmem:[#allocation2 + $0x24] sm:$0xe]  ;;  %v990_v12 = vld [vmem:[#allocation2 + $0x2c] sm:$0x1] }
  0x87   : > { %v1812_v23 = vrot.slane %v1811_v13, 4  ;;  %v781_v24 = vrot.slane %v779_v16, 4  ;;  %v2713_v27 = vcombine.low %v1793_v17, %v1803_v22  ;;  %v1822_v28 = vrot.slane %v1821_v18, 4  ;;  %v1238_v17 = vld [vmem:[#allocation2 + $0x24] sm:$0xf] }
  0x88   : > { %v2083_v29 = vsel %vm3258_vm13, %v2081_v20, %v2082_v14  ;;  %v788_v30 = vshll.u32 %v710_v15, 16  ;;  %v784_v35 = vrot.slane %v782_v25, 5  ;;  %v792_v36 = vshrl.u32 %v710_v15, 16  ;;  %v1239_v22 = vld [vmem:[#allocation2 + $0x28] sm:$0xf] }
  0x89   : > { %1725 = vrot.lane.b32.xlu1 %v2927_v11, %s2998_s25  ;;  %v1817_v33 = vsel %vm3264_vm14, %v1812_v23, %v1816_v5  ;;  %v2729_v34 = vcombine.low %v2080_v19, %v2083_v29  ;;  %1996 = vrot.lane.b32.xlu0 %v2713_v27, %s2999_s27  ;;  %v1827_v39 = vsel %vm3264_vm14, %v1822_v28, %v1826_v9  ;;  %v798_v41 = vshll.u32 %v711_v21, 16  ;;  %v987_v5 = vld [vmem:[#allocation2 + $0x20] sm:$0x1]  ;;  %v989_v11 = vld [vmem:[#allocation2 + $0x28] sm:$0xf] }
  0x8a   : > { %v790_v40 = vrot.slane %v788_v30, 5  ;;  %v2722_v42 = vrot.slane %v2032_v26, 9  ;;  %v2714_v1 = vcombine.low %v1817_v33, %v1827_v39  ;;  %v785_v43 = vor.u32 %v784_v35, %v781_v24  ;;  %v1240_v27 = vld [vmem:[#allocation2 + $0x2c] sm:$0x1]  ;;  %v1241_v28 = vld [vmem:[#allocation2 + $0x30] sm:$0xf] }
  0x8b   : > { %v794_v44 = vrot.slane %v792_v36, 4  ;;  %v2086_v45 = vrot.slane %v2033_v31, 5  ;;  %v800_v46 = vrot.slane %v798_v41, 5  ;;  %v2089_v47 = vrot.slane %v2034_v32, 5  ;;  %v2944_v29 = vld [vmem:[%s3663_s1 + $0x8] sm:$0xff]  }
  0x8c   : > { %v803_v48 = vshrl.u32 %v712_v37, 16  ;;  %v806_v49 = vshll.u32 %v712_v37, 16  ;;  %v786_v50 = vrot.slane %v785_v43, 4  ;;  %v812_v59 = vshll.u32 %v713_v38, 16  ;;  %v1243_v39 = vld [vmem:[#allocation2 + $0x38] sm:$0x1]  ;;  %2847 = vmatprep.subr.bf16.mxu0 %v2944_v29  ;;  %2868 = vmatprep.subr.bf16.mxu1 %v2944_v29 }
  0x8d   : > { %1998 = vrot.lane.b32.xlu1 %v2714_v1, %s2999_s27  ;;  %v795_v51 = vor.u32 %v794_v44, %v790_v40  ;;  %v2087_v52 = vsel %vm3258_vm13, %v2722_v42, %v2086_v45  ;;  %v2088_v53 = vrot.slane %v2086_v45, 4  ;;  %2157 = vrot.lane.b32.xlu0 %v2729_v34, %s3000_s30  ;;  %v816_v60 = vshrl.u32 %v713_v38, 16  ;;  %v1242_v34 = vld [vmem:[#allocation2 + $0x34] sm:$0xf]  ;;  %v2928_v42 = vld [vmem:[#allocation2 + $0x24] sm:$0xff]  }
  0x8e   : > { %v805_v56 = vrot.slane %v803_v48, 4  ;;  %v808_v58 = vrot.slane %v806_v49, 5  ;;  %v791_v0 = vsel %vm3264_vm14, %v786_v50, %v790_v40  ;;  %v822_v4 = vshll.u32 %v714_v57, 16  ;;  %2848 = vmatpush3.bf16.msra.mxu0 %v2944_v29  ;;  %2871 = vmatpush3.bf16.msra.mxu1 %v2944_v29 }
  0x8f   : > { %v796_v2 = vrot.slane %v795_v51, 4  ;;  %v2090_v3 = vsel %vm3258_vm13, %v2088_v53, %v2089_v47  ;;  %v814_v9 = vrot.slane %v812_v59, 5  ;;  %v818_v10 = vrot.slane %v816_v60, 4  ;;  %v1512_v51 = vld [vmem:[#allocation2 + $0x28] sm:$0xf] }
  0x90   : > { %v2730_v7 = vcombine.low %v2087_v52, %v2090_v3  ;;  %v809_v8 = vor.u32 %v808_v58, %v805_v56  ;;  %v824_v14 = vrot.slane %v822_v4, 5  ;;  %v2659_v15 = vrot.slane %v985_v54, 9  ;;  %v2946_v52 = vld [vmem:[%s3663_s1 + $0x10] sm:$0xff]   ;;  %v1513_v59 = vld [vmem:[#allocation2 + $0x2c] sm:$0x1] }
  0x91   : > { %v801_v13 = vsel %vm3264_vm14, %v796_v2, %v800_v46  ;;  %v1046_v16 = vrot.slane %v986_v63, 5  ;;  %v819_v20 = vor.u32 %v818_v10, %v814_v9  ;;  %v1049_v21 = vrot.slane %v987_v5, 5  ;;  %v1511_v46 = vld [vmem:[#allocation2 + $0x24] sm:$0xe]  ;;  %v1514_v3 = vld [vmem:[#allocation2 + $0x30] sm:$0xe]  ;;  %2849 = vmatprep.subr.bf16.mxu0 %v2946_v52  ;;  %2869 = vmatprep.subr.bf16.mxu1 %v2946_v52 }
  0x92   : > { %v2651_v18 = vcombine.low %v791_v0, %v801_v13  ;;  %2159 = vrot.lane.b32.xlu0 %v2730_v7, %s3000_s30  ;;  %v810_v19 = vrot.slane %v809_v8, 4  ;;  %v2660_v25 = vrot.slane %v988_v6, 9  ;;  %v1053_v26 = vrot.slane %v989_v11, 5  ;;  %v1515_v8 = vld [vmem:[#allocation2 + $0x34] sm:$0xf]  ;;  %2850 = vmatpush3.bf16.msra.mxu0 %v2946_v52 }
  0x93   : > { %v1047_v23 = vsel %vm3258_vm13, %v2659_v15, %v1046_v16  ;;  %v1048_v24 = vrot.slane %v1046_v16, 4  ;;  %v820_v31 = vrot.slane %v819_v20, 4  ;;  %v1056_v32 = vrot.slane %v990_v12, 5  ;;  %2872 = vmatpush3.bf16.msra.mxu1 %v2946_v52  ;;  %v1516_v13 = vld [vmem:[#allocation2 + $0x38] sm:$0x1] }
  0x94   : > { %950 = vrot.lane.b32.xlu1 %v2651_v18, %s2995_s22  ;;  %v815_v30 = vsel %vm3264_vm14, %v810_v19, %v814_v9  ;;  %v1305_v33 = vshrl.u32 %v1238_v17, 16  ;;  %v1054_v36 = vsel %vm3258_vm13, %v2660_v25, %v1053_v26  ;;  %v1055_v37 = vrot.slane %v1053_v26, 4  ;;  %v1762_v19 = vld [vmem:[#allocation2 + $0x30] sm:$0xf] }
  0x95   : > { %v1050_v35 = vsel %vm3258_vm13, %v1048_v24, %v1049_v21  ;;  %v1308_v38 = vshll.u32 %v1238_v17, 16  ;;  %v825_v40 = vsel %vm3264_vm14, %v820_v31, %v824_v14  ;;  %v1314_v62 = vshll.u32 %v1239_v22, 16  ;;  %v2929_v14 = vld [vmem:[#allocation2 + $0x30] sm:$0xff]  }
  0x96   : > { %v2667_v41 = vcombine.low %v1047_v23, %v1050_v35  ;;  %v1307_v57 = vrot.slane %v1305_v33, 4  ;;  %v2652_v1 = vcombine.low %v815_v30, %v825_v40  ;;  %v1057_v43 = vsel %vm3258_vm13, %v1055_v37, %v1056_v32  ;;  %v1764_v32 = vld [vmem:[#allocation2 + $0x38] sm:$0x1] }
  0x97   : > { %v1310_v44 = vrot.slane %v1308_v38, 5  ;;  %v1318_v45 = vshrl.u32 %v1239_v22, 16  ;;  %v2668_v47 = vcombine.low %v1054_v36, %v1057_v43  ;;  %v1316_v48 = vrot.slane %v1314_v62, 5  ;;  %v1765_v38 = vld [vmem:[#allocation2 + $0x3c] sm:$0xf] }
  0x98   : > { %1114 = vrot.lane.b32.xlu0 %v2667_v41, %s2994_s21  ;;  %v1324_v49 = vshll.u32 %v1240_v27, 16  ;;  %v1329_v50 = vshrl.u32 %v1241_v28, 16  ;;  %952 = vrot.lane.b32.xlu1 %v2652_v1, %s2995_s22  ;;  %v1332_v56 = vshll.u32 %v1241_v28, 16  ;;  %v1338_v58 = vshll.u32 %v1242_v34, 16  ;;  %v1763_v28 = vld [vmem:[#allocation2 + $0x34] sm:$0xf] }
  0x99   : > { %v1311_v53 = vor.u32 %v1310_v44, %v1307_v57  ;;  %v1320_v54 = vrot.slane %v1318_v45, 4  ;;  %v1342_v0 = vshrl.u32 %v1242_v34, 16  ;;  %v1348_v2 = vshll.u32 %v1243_v39, 16  ;;  %v1766_v57 = vld [vmem:[#allocation2 + $0x40] sm:$0xf] }
  0x9a   : > { %v1326_v60 = vrot.slane %v1324_v49, 5  ;;  %v1331_v63 = vrot.slane %v1329_v50, 4  ;;  %v1334_v6 = vrot.slane %v1332_v56, 5  ;;  %v1340_v7 = vrot.slane %v1338_v58, 5  ;;  %v1767_v45 = vld [vmem:[#allocation2 + $0x44] sm:$0x1] }
  0x9b   : > { %v1312_v4 = vrot.slane %v1311_v53, 4  ;;  %v1321_v5 = vor.u32 %v1320_v54, %v1316_v48  ;;  %v1344_v9 = vrot.slane %v1342_v0, 4  ;;  %v1350_v10 = vrot.slane %v1348_v2, 5  ;;  %v2037_v58 = vld [vmem:[#allocation2 + $0x38] sm:$0x1] }
  0x9c   : > { %1203 = vrot.lane.b32.xlu0 %v2928_v42, %s2993_s12  ;;  %v2691_v11 = vrot.slane %v1511_v46, 9  ;;  %v1569_v12 = vrot.slane %v1512_v51, 5  ;;  %1116 = vrot.lane.b32.xlu1 %v2668_v47, %s2994_s21  ;;  %v1335_v17 = vor.u32 %v1334_v6, %v1331_v63  ;;  %v1572_v18 = vrot.slane %v1513_v59, 5  ;;  %v2035_v46 = vld [vmem:[#allocation2 + $0x30] sm:$0xe] }
  0x9d   : > { %v1317_v15 = vsel %vm3264_vm14, %v1312_v4, %v1316_v48  ;;  %v1322_v16 = vrot.slane %v1321_v5, 4  ;;  %v1345_v20 = vor.u32 %v1344_v9, %v1340_v7  ;;  %v2692_v23 = vrot.slane %v1514_v3, 9  ;;  %v2036_v51 = vld [vmem:[#allocation2 + $0x34] sm:$0xf]  ;;  %v715_v3 = vld [vmem:[#allocation2 + $0x30] sm:$0xf] }
  0x9e   : > { %v1570_v21 = vsel %vm3258_vm13, %v2691_v11, %v1569_v12  ;;  %v1571_v22 = vrot.slane %v1569_v12, 4  ;;  %v1336_v25 = vrot.slane %v1335_v17, 4  ;;  %v1576_v26 = vrot.slane %v1515_v8, 5  ;;  %v2930_v59 = vld [vmem:[#allocation2 + $0x30] sm:$0xff]   ;;  %v717_v17 = vld [vmem:[#allocation2 + $0x38] sm:$0x1] }
  0x9f   : > { %v1327_v24 = vsel %vm3264_vm14, %v1322_v16, %v1326_v60  ;;  %v1579_v27 = vrot.slane %v1516_v13, 5  ;;  %v1346_v30 = vrot.slane %v1345_v20, 4  ;;  %v1829_v33 = vshrl.u32 %v1762_v19, 16  ;;  %v716_v12 = vld [vmem:[#allocation2 + $0x34] sm:$0xf]  ;;  %v2931_v13 = vld [vmem:[#allocation2 + $0x3c] sm:$0xff]  }
  0xa0   : > { %v2683_v29 = vcombine.low %v1317_v15, %v1327_v24  ;;  %v1573_v31 = vsel %vm3258_vm13, %v1571_v22, %v1572_v18  ;;  %1205 = vrot.lane.b32.xlu1 %v2929_v14, %s2993_s12  ;;  %v1341_v34 = vsel %vm3264_vm14, %v1336_v25, %v1340_v7  ;;  %v1577_v36 = vsel %vm3258_vm13, %v2692_v23, %v1576_v26 }
  0xa1   : > { %v2699_v35 = vcombine.low %v1570_v21, %v1573_v31  ;;  %v1578_v37 = vrot.slane %v1576_v26, 4  ;;  %v1351_v39 = vsel %vm3264_vm14, %v1346_v30, %v1350_v10  ;;  %v1831_v40 = vrot.slane %v1829_v33, 4 }
  0xa2   : > { %1476 = vrot.lane.b32.xlu0 %v2683_v29, %s2996_s23  ;;  %v1832_v41 = vshll.u32 %v1762_v19, 16  ;;  %v1838_v42 = vshll.u32 %v1763_v28, 16  ;;  %v2684_v62 = vcombine.low %v1341_v34, %v1351_v39  ;;  %v1842_v43 = vshrl.u32 %v1763_v28, 16  ;;  %v2038_v19 = vld [vmem:[#allocation2 + $0x3c] sm:$0xe] }
  0xa3   : > { %v1580_v1 = vsel %vm3258_vm13, %v1578_v37, %v1579_v27  ;;  %v1848_v44 = vshll.u32 %v1764_v32, 16  ;;  %v1853_v50 = vshrl.u32 %v1765_v38, 16  ;;  %v1856_v54 = vshll.u32 %v1765_v38, 16  ;;  %v2039_v32 = vld [vmem:[#allocation2 + $0x40] sm:$0xf] }
  0xa4   : > { %v2700_v47 = vcombine.low %v1577_v36, %v1580_v1  ;;  %v1834_v48 = vrot.slane %v1832_v41, 5  ;;  %v1840_v49 = vrot.slane %v1838_v42, 5  ;;  %1478 = vrot.lane.b32.xlu1 %v2684_v62, %s2996_s23  ;;  %v1844_v52 = vrot.slane %v1842_v43, 4  ;;  %v2040_v37 = vld [vmem:[#allocation2 + $0x44] sm:$0x1] }
  0xa5   : > { %v1850_v53 = vrot.slane %v1848_v44, 5  ;;  %v1862_v56 = vshll.u32 %v1766_v57, 16  ;;  %v1855_v63 = vrot.slane %v1853_v50, 4  ;;  %v1866_v0 = vshrl.u32 %v1766_v57, 16  ;;  %v718_v38 = vld [vmem:[#allocation2 + $0x3c] sm:$0xf] }
  0xa6   : > { %1637 = vrot.lane.b32.xlu0 %v2699_v35, %s2997_s24  ;;  %v1835_v60 = vor.u32 %v1834_v48, %v1831_v40  ;;  %v1872_v2 = vshll.u32 %v1767_v45, 16  ;;  %v1845_v4 = vor.u32 %v1844_v52, %v1840_v49  ;;  %v1858_v5 = vrot.slane %v1856_v54, 5  ;;  %v719_v44 = vld [vmem:[#allocation2 + $0x40] sm:$0xf]  ;;  %v720_v45 = vld [vmem:[#allocation2 + $0x44] sm:$0x1] }
  0xa7   : > { %v1864_v6 = vrot.slane %v1862_v56, 5  ;;  %v2723_v7 = vrot.slane %v2035_v46, 9  ;;  %v1868_v9 = vrot.slane %v1866_v0, 4  ;;  %v2093_v11 = vrot.slane %v2036_v51, 5  ;;  %v991_v50 = vld [vmem:[#allocation2 + $0x30] sm:$0xe] }
  0xa8   : > { %v1836_v8 = vrot.slane %v1835_v60, 4  ;;  %v1874_v10 = vrot.slane %v1872_v2, 5  ;;  %1639 = vrot.lane.b32.xlu1 %v2700_v47, %s2997_s24  ;;  %v1846_v14 = vrot.slane %v1845_v4, 4  ;;  %v1859_v15 = vor.u32 %v1858_v5, %v1855_v63  ;;  %v992_v56 = vld [vmem:[#allocation2 + $0x34] sm:$0xf] }
  0xa9   : > { %v2096_v16 = vrot.slane %v2037_v58, 5  ;;  %v827_v18 = vshrl.u32 %v715_v3, 16  ;;  %v1869_v21 = vor.u32 %v1868_v9, %v1864_v6  ;;  %v2094_v22 = vsel %vm3258_vm13, %v2723_v7, %v2093_v11  ;;  %v993_v58 = vld [vmem:[#allocation2 + $0x38] sm:$0x1]  ;;  %v994_v2 = vld [vmem:[#allocation2 + $0x3c] sm:$0xe] }
  0xaa   : > { %1727 = vrot.lane.b32.xlu0 %v2930_v59, %s2998_s25  ;;  %v1841_v20 = vsel %vm3264_vm14, %v1836_v8, %v1840_v49  ;;  %v2095_v23 = vrot.slane %v2093_v11, 4  ;;  %v1851_v24 = vsel %vm3264_vm14, %v1846_v14, %v1850_v53  ;;  %v1860_v25 = vrot.slane %v1859_v15, 4  ;;  %v996_v8 = vld [vmem:[#allocation2 + $0x44] sm:$0x1]  ;;  %v1244_v9 = vld [vmem:[#allocation2 + $0x3c] sm:$0xf] }
  0xab   : > { %v829_v26 = vrot.slane %v827_v18, 4  ;;  %v830_v27 = vshll.u32 %v715_v3, 16  ;;  %v2715_v28 = vcombine.low %v1841_v20, %v1851_v24  ;;  %v1870_v29 = vrot.slane %v1869_v21, 4  ;;  %v995_v3 = vld [vmem:[#allocation2 + $0x40] sm:$0xf] }
  0xac   : > { %v2097_v30 = vsel %vm3258_vm13, %v2095_v23, %v2096_v16  ;;  %v836_v31 = vshll.u32 %v716_v12, 16  ;;  %1729 = vrot.lane.b32.xlu1 %v2931_v13, %s2998_s25  ;;  %v1865_v33 = vsel %vm3264_vm14, %v1860_v25, %v1864_v6  ;;  %v840_v36 = vshrl.u32 %v716_v12, 16 }
  0xad   : > { %v2731_v34 = vcombine.low %v2094_v22, %v2097_v30  ;;  %v832_v35 = vrot.slane %v830_v27, 5  ;;  %v1875_v39 = vsel %vm3264_vm14, %v1870_v29, %v1874_v10  ;;  %v846_v41 = vshll.u32 %v717_v17, 16 }
  0xae   : > { %2000 = vrot.lane.b32.xlu0 %v2715_v28, %s2999_s27  ;;  %v838_v40 = vrot.slane %v836_v31, 5  ;;  %v2724_v42 = vrot.slane %v2038_v19, 9  ;;  %v2716_v57 = vcombine.low %v1865_v33, %v1875_v39  ;;  %v842_v1 = vrot.slane %v840_v36, 4  ;;  %v1247_v36 = vld [vmem:[#allocation2 + $0x48] sm:$0xf] }
  0xaf   : > { %v833_v62 = vor.u32 %v832_v35, %v829_v26  ;;  %v2100_v43 = vrot.slane %v2039_v32, 5  ;;  %v848_v46 = vrot.slane %v846_v41, 5  ;;  %v2103_v47 = vrot.slane %v2040_v37, 5  ;;  %v1245_v26 = vld [vmem:[#allocation2 + $0x40] sm:$0xf] }
  0xb0   : > { %v851_v48 = vshrl.u32 %v718_v38, 16  ;;  %v854_v49 = vshll.u32 %v718_v38, 16  ;;  %2002 = vrot.lane.b32.xlu1 %v2716_v57, %s2999_s27  ;;  %v843_v52 = vor.u32 %v842_v1, %v838_v40  ;;  %v860_v63 = vshll.u32 %v719_v44, 16  ;;  %v1248_v41 = vld [vmem:[#allocation2 + $0x4c] sm:$0xf] }
  0xb1   : > { %v834_v51 = vrot.slane %v833_v62, 4  ;;  %v2101_v53 = vsel %vm3258_vm13, %v2724_v42, %v2100_v43  ;;  %v2102_v54 = vrot.slane %v2100_v43, 4  ;;  %v864_v0 = vshrl.u32 %v719_v44, 16  ;;  %v1249_v43 = vld [vmem:[#allocation2 + $0x50] sm:$0x1] }
  0xb2   : > { %2161 = vrot.lane.b32.xlu0 %v2731_v34, %s3000_s30  ;;  %v853_v59 = vrot.slane %v851_v48, 4  ;;  %v856_v60 = vrot.slane %v854_v49, 5  ;;  %v844_v5 = vrot.slane %v843_v52, 4  ;;  %v870_v7 = vshll.u32 %v720_v45, 16  ;;  %v1246_v34 = vld [vmem:[#allocation2 + $0x44] sm:$0x1] }
  0xb3   : > { %v839_v4 = vsel %vm3264_vm14, %v834_v51, %v838_v40  ;;  %v2104_v6 = vsel %vm3258_vm13, %v2102_v54, %v2103_v47  ;;  %v862_v12 = vrot.slane %v860_v63, 5  ;;  %v866_v13 = vrot.slane %v864_v0, 4  ;;  %v1517_v44 = vld [vmem:[#allocation2 + $0x3c] sm:$0xe]  ;;  %v1520_v0 = vld [vmem:[#allocation2 + $0x48] sm:$0xe] }
  0xb4   : > { %v2732_v10 = vcombine.low %v2101_v53, %v2104_v6  ;;  %v857_v11 = vor.u32 %v856_v60, %v853_v59  ;;  %v849_v14 = vsel %vm3264_vm14, %v844_v5, %v848_v46  ;;  %v872_v15 = vrot.slane %v870_v7, 5  ;;  %v2932_v46 = vld [vmem:[#allocation2 + $0x3c] sm:$0xff]   ;;  %v1521_v6 = vld [vmem:[#allocation2 + $0x4c] sm:$0xf] }
  0xb5   : > { %v2661_v16 = vrot.slane %v991_v50, 9  ;;  %v1060_v17 = vrot.slane %v992_v56, 5  ;;  %v2653_v18 = vcombine.low %v839_v4, %v849_v14  ;;  %v867_v20 = vor.u32 %v866_v13, %v862_v12  ;;  %v1518_v50 = vld [vmem:[#allocation2 + $0x40] sm:$0xf]  ;;  %v1519_v56 = vld [vmem:[#allocation2 + $0x44] sm:$0x1] }
  0xb6   : > { %2163 = vrot.lane.b32.xlu0 %v2732_v10, %s3000_s30  ;;  %v858_v19 = vrot.slane %v857_v11, 4  ;;  %v1063_v21 = vrot.slane %v993_v58, 5  ;;  %v2662_v24 = vrot.slane %v994_v2, 9  ;;  %v1067_v25 = vrot.slane %v995_v3, 5  ;;  %v1522_v11 = vld [vmem:[#allocation2 + $0x50] sm:$0x1] }
  0xb7   : > { %v1061_v22 = vsel %vm3258_vm13, %v2661_v16, %v1060_v17  ;;  %v1062_v23 = vrot.slane %v1060_v17, 4  ;;  %954 = vrot.lane.b32.xlu1 %v2653_v18, %s2995_s22  ;;  %v868_v28 = vrot.slane %v867_v20, 4  ;;  %v1070_v29 = vrot.slane %v996_v8, 5  ;;  %v1768_v17 = vld [vmem:[#allocation2 + $0x48] sm:$0xf] }
  0xb8   : > { %v863_v27 = vsel %vm3264_vm14, %v858_v19, %v862_v12  ;;  %v1353_v30 = vshrl.u32 %v1244_v9, 16  ;;  %v1068_v32 = vsel %vm3258_vm13, %v2662_v24, %v1067_v25  ;;  %v1069_v33 = vrot.slane %v1067_v25, 4  ;;  %v2933_v12 = vld [vmem:[#allocation2 + $0x48] sm:$0xff]  }
  0xb9   : > { %v1064_v31 = vsel %vm3258_vm13, %v1062_v23, %v1063_v21  ;;  %v1356_v35 = vshll.u32 %v1244_v9, 16  ;;  %v873_v37 = vsel %vm3264_vm14, %v868_v28, %v872_v15  ;;  %v1362_v40 = vshll.u32 %v1245_v26, 16 }
  0xba   : > { %v2669_v38 = vcombine.low %v1061_v22, %v1064_v31  ;;  %v1355_v39 = vrot.slane %v1353_v30, 4  ;;  %v2654_v42 = vcombine.low %v863_v27, %v873_v37  ;;  %v1071_v57 = vsel %vm3258_vm13, %v1069_v33, %v1070_v29  ;;  %v1770_v30 = vld [vmem:[#allocation2 + $0x50] sm:$0x1]  ;;  %v1772_v37 = vld [vmem:[#allocation2 + $0x58] sm:$0xf] }
  0xbb   : > { %v1358_v62 = vrot.slane %v1356_v35, 5  ;;  %v1366_v1 = vshrl.u32 %v1245_v26, 16  ;;  %v2670_v45 = vcombine.low %v1068_v32, %v1071_v57  ;;  %v1364_v47 = vrot.slane %v1362_v40, 5  ;;  %v1769_v26 = vld [vmem:[#allocation2 + $0x4c] sm:$0xf] }
  0xbc   : > { %1118 = vrot.lane.b32.xlu0 %v2669_v38, %s2994_s21  ;;  %v1372_v48 = vshll.u32 %v1246_v34, 16  ;;  %v1377_v49 = vshrl.u32 %v1247_v36, 16  ;;  %956 = vrot.lane.b32.xlu1 %v2654_v42, %s2995_s22  ;;  %v1380_v53 = vshll.u32 %v1247_v36, 16  ;;  %v1386_v54 = vshll.u32 %v1248_v41, 16  ;;  %v1771_v32 = vld [vmem:[#allocation2 + $0x54] sm:$0xf] }
  0xbd   : > { %v1359_v51 = vor.u32 %v1358_v62, %v1355_v39  ;;  %v1368_v52 = vrot.slane %v1366_v1, 4  ;;  %v1390_v60 = vshrl.u32 %v1248_v41, 16  ;;  %v1396_v63 = vshll.u32 %v1249_v43, 16  ;;  %v1773_v38 = vld [vmem:[#allocation2 + $0x5c] sm:$0x1] }
  0xbe   : > { %v1374_v58 = vrot.slane %v1372_v48, 5  ;;  %v1379_v59 = vrot.slane %v1377_v49, 4  ;;  %v1382_v4 = vrot.slane %v1380_v53, 5  ;;  %v1388_v5 = vrot.slane %v1386_v54, 5  ;;  %v2041_v57 = vld [vmem:[#allocation2 + $0x48] sm:$0xe] }
  0xbf   : > { %v1360_v2 = vrot.slane %v1359_v51, 4  ;;  %v1369_v3 = vor.u32 %v1368_v52, %v1364_v47  ;;  %v1392_v7 = vrot.slane %v1390_v60, 4  ;;  %v1398_v8 = vrot.slane %v1396_v63, 5 }
  0xc0   : > { %1207 = vrot.lane.b32.xlu0 %v2932_v46, %s2993_s12  ;;  %v2693_v9 = vrot.slane %v1517_v44, 9  ;;  %v1583_v10 = vrot.slane %v1518_v50, 5  ;;  %1120 = vrot.lane.b32.xlu1 %v2670_v45, %s2994_s21  ;;  %v1383_v15 = vor.u32 %v1382_v4, %v1379_v59  ;;  %v1586_v16 = vrot.slane %v1519_v56, 5  ;;  %v2042_v45 = vld [vmem:[#allocation2 + $0x4c] sm:$0xf] }
  0xc1   : > { %v1365_v13 = vsel %vm3264_vm14, %v1360_v2, %v1364_v47  ;;  %v1370_v14 = vrot.slane %v1369_v3, 4  ;;  %v1393_v18 = vor.u32 %v1392_v7, %v1388_v5  ;;  %v2694_v21 = vrot.slane %v1520_v0, 9  ;;  %v2043_v50 = vld [vmem:[#allocation2 + $0x50] sm:$0x1]  ;;  %v2934_v56 = vld [vmem:[#allocation2 + $0x48] sm:$0xff]  }
  0xc2   : > { %v1584_v19 = vsel %vm3258_vm13, %v2693_v9, %v1583_v10  ;;  %v1585_v20 = vrot.slane %v1583_v10, 4  ;;  %v1384_v23 = vrot.slane %v1383_v15, 4  ;;  %v1590_v24 = vrot.slane %v1521_v6, 5  ;;  %v721_v0 = vld [vmem:[#allocation2 + $0x48] sm:$0xf]  ;;  %v2935_v10 = vld [vmem:[#allocation2 + $0x54] sm:$0xff]  }
  0xc3   : > { %v1375_v22 = vsel %vm3264_vm14, %v1370_v14, %v1374_v58  ;;  %v1593_v25 = vrot.slane %v1522_v11, 5  ;;  %v1394_v28 = vrot.slane %v1393_v18, 4  ;;  %v1877_v31 = vshrl.u32 %v1768_v17, 16  ;;  %v722_v14 = vld [vmem:[#allocation2 + $0x4c] sm:$0xf] }
  0xc4   : > { %v2685_v27 = vcombine.low %v1365_v13, %v1375_v22  ;;  %v1587_v29 = vsel %vm3258_vm13, %v1585_v20, %v1586_v16  ;;  %1209 = vrot.lane.b32.xlu1 %v2933_v12, %s2993_s12  ;;  %v1389_v33 = vsel %vm3264_vm14, %v1384_v23, %v1388_v5  ;;  %v1591_v35 = vsel %vm3258_vm13, %v2694_v21, %v1590_v24  ;;  %v723_v20 = vld [vmem:[#allocation2 + $0x50] sm:$0x1] }
  0xc5   : > { %v2701_v34 = vcombine.low %v1584_v19, %v1587_v29  ;;  %v1592_v36 = vrot.slane %v1590_v24, 4  ;;  %v1399_v39 = vsel %vm3264_vm14, %v1394_v28, %v1398_v8  ;;  %v1879_v40 = vrot.slane %v1877_v31, 4  ;;  %v2046_v31 = vld [vmem:[#allocation2 + $0x5c] sm:$0x1] }
  0xc6   : > { %1480 = vrot.lane.b32.xlu0 %v2685_v27, %s2996_s23  ;;  %v1880_v41 = vshll.u32 %v1768_v17, 16  ;;  %v1886_v42 = vshll.u32 %v1769_v26, 16  ;;  %v2686_v62 = vcombine.low %v1389_v33, %v1399_v39  ;;  %v1890_v43 = vshrl.u32 %v1769_v26, 16 }
  0xc7   : > { %v1594_v1 = vsel %vm3258_vm13, %v1592_v36, %v1593_v25  ;;  %v1896_v44 = vshll.u32 %v1770_v30, 16  ;;  %v1901_v49 = vshrl.u32 %v1771_v32, 16  ;;  %v1904_v53 = vshll.u32 %v1771_v32, 16  ;;  %v2044_v25 = vld [vmem:[#allocation2 + $0x54] sm:$0xe] }
  0xc8   : > { %v2702_v46 = vcombine.low %v1591_v35, %v1594_v1  ;;  %v1882_v47 = vrot.slane %v1880_v41, 5  ;;  %v1888_v48 = vrot.slane %v1886_v42, 5  ;;  %1482 = vrot.lane.b32.xlu1 %v2686_v62, %s2996_s23  ;;  %v1892_v51 = vrot.slane %v1890_v43, 4  ;;  %v2045_v30 = vld [vmem:[#allocation2 + $0x58] sm:$0xf] }
  0xc9   : > { %v1898_v52 = vrot.slane %v1896_v44, 5  ;;  %v1910_v54 = vshll.u32 %v1772_v37, 16  ;;  %v1903_v59 = vrot.slane %v1901_v49, 4  ;;  %v1914_v60 = vshrl.u32 %v1772_v37, 16  ;;  %v724_v36 = vld [vmem:[#allocation2 + $0x54] sm:$0xf] }
  0xca   : > { %1641 = vrot.lane.b32.xlu0 %v2701_v34, %s2997_s24  ;;  %v1883_v58 = vor.u32 %v1882_v47, %v1879_v40  ;;  %v1920_v63 = vshll.u32 %v1773_v38, 16  ;;  %v1893_v2 = vor.u32 %v1892_v51, %v1888_v48  ;;  %v1906_v3 = vrot.slane %v1904_v53, 5  ;;  %v725_v37 = vld [vmem:[#allocation2 + $0x58] sm:$0xf]  ;;  %v726_v42 = vld [vmem:[#allocation2 + $0x5c] sm:$0x1] }
  0xcb   : > { %v1912_v4 = vrot.slane %v1910_v54, 5  ;;  %v2725_v5 = vrot.slane %v2041_v57, 9  ;;  %v1916_v7 = vrot.slane %v1914_v60, 4  ;;  %v2107_v9 = vrot.slane %v2042_v45, 5  ;;  %v998_v49 = vld [vmem:[#allocation2 + $0x4c] sm:$0xf] }
  0xcc   : > { %v1884_v6 = vrot.slane %v1883_v58, 4  ;;  %v1922_v8 = vrot.slane %v1920_v63, 5  ;;  %1643 = vrot.lane.b32.xlu1 %v2702_v46, %s2997_s24  ;;  %v1894_v11 = vrot.slane %v1893_v2, 4  ;;  %v1907_v12 = vor.u32 %v1906_v3, %v1903_v59  ;;  %v999_v3 = vld [vmem:[#allocation2 + $0x50] sm:$0x1] }
  0xcd   : > { %v2110_v13 = vrot.slane %v2043_v50, 5  ;;  %v875_v15 = vshrl.u32 %v721_v0, 16  ;;  %v1917_v17 = vor.u32 %v1916_v7, %v1912_v4  ;;  %v2108_v18 = vsel %vm3258_vm13, %v2725_v5, %v2107_v9 }
  0xce   : > { %1731 = vrot.lane.b32.xlu0 %v2934_v56, %s2998_s25  ;;  %v1889_v16 = vsel %vm3264_vm14, %v1884_v6, %v1888_v48  ;;  %v2109_v19 = vrot.slane %v2107_v9, 4  ;;  %v1899_v21 = vsel %vm3264_vm14, %v1894_v11, %v1898_v52  ;;  %v1908_v22 = vrot.slane %v1907_v12, 4  ;;  %v997_v48 = vld [vmem:[#allocation2 + $0x48] sm:$0xe]  ;;  %v1001_v9 = vld [vmem:[#allocation2 + $0x58] sm:$0xf] }
  0xcf   : > { %v877_v23 = vrot.slane %v875_v15, 4  ;;  %v878_v24 = vshll.u32 %v721_v0, 16  ;;  %v2717_v26 = vcombine.low %v1889_v16, %v1899_v21  ;;  %v1918_v27 = vrot.slane %v1917_v17, 4  ;;  %v1250_v15 = vld [vmem:[#allocation2 + $0x54] sm:$0xf] }
  0xd0   : > { %v2111_v28 = vsel %vm3258_vm13, %v2109_v19, %v2110_v13  ;;  %v884_v29 = vshll.u32 %v722_v14, 16  ;;  %1733 = vrot.lane.b32.xlu1 %v2935_v10, %s2998_s25  ;;  %v1913_v32 = vsel %vm3264_vm14, %v1908_v22, %v1912_v4  ;;  %v888_v35 = vshrl.u32 %v722_v14, 16  ;;  %v1000_v4 = vld [vmem:[#allocation2 + $0x54] sm:$0xe]  ;;  %v1002_v10 = vld [vmem:[#allocation2 + $0x5c] sm:$0x1] }
  0xd1   : > { %v2733_v33 = vcombine.low %v2108_v18, %v2111_v28  ;;  %v880_v34 = vrot.slane %v878_v24, 5  ;;  %v1923_v38 = vsel %vm3264_vm14, %v1918_v27, %v1922_v8  ;;  %v894_v40 = vshll.u32 %v723_v20, 16  ;;  %v1251_v20 = vld [vmem:[#allocation2 + $0x58] sm:$0xf] }
  0xd2   : > { %2004 = vrot.lane.b32.xlu0 %v2717_v26, %s2999_s27  ;;  %v886_v39 = vrot.slane %v884_v29, 5  ;;  %v2726_v41 = vrot.slane %v2044_v25, 9  ;;  %v2718_v57 = vcombine.low %v1913_v32, %v1923_v38  ;;  %v890_v1 = vrot.slane %v888_v35, 4  ;;  %v1252_v32 = vld [vmem:[#allocation2 + $0x5c] sm:$0x1] }
  0xd3   : > { %v881_v62 = vor.u32 %v880_v34, %v877_v23  ;;  %v2114_v43 = vrot.slane %v2045_v30, 5  ;;  %v896_v44 = vrot.slane %v894_v40, 5  ;;  %v2117_v45 = vrot.slane %v2046_v31, 5  ;;  %v1253_v34 = vld [vmem:[#allocation2 + $0x60] sm:$0xf] }
  0xd4   : > { %v899_v46 = vshrl.u32 %v724_v36, 16  ;;  %v902_v47 = vshll.u32 %v724_v36, 16  ;;  %2006 = vrot.lane.b32.xlu1 %v2718_v57, %s2999_s27  ;;  %v891_v51 = vor.u32 %v890_v1, %v886_v39  ;;  %v908_v58 = vshll.u32 %v725_v37, 16  ;;  %v1254_v40 = vld [vmem:[#allocation2 + $0x64] sm:$0xf] }
  0xd5   : > { %v882_v50 = vrot.slane %v881_v62, 4  ;;  %v2115_v52 = vsel %vm3258_vm13, %v2726_v41, %v2114_v43  ;;  %v2116_v53 = vrot.slane %v2114_v43, 4  ;;  %v912_v59 = vshrl.u32 %v725_v37, 16  ;;  %v1255_v41 = vld [vmem:[#allocation2 + $0x68] sm:$0x1] }
  0xd6   : > { %2165 = vrot.lane.b32.xlu0 %v2733_v33, %s3000_s30  ;;  %v901_v54 = vrot.slane %v899_v46, 4  ;;  %v904_v56 = vrot.slane %v902_v47, 5  ;;  %v892_v63 = vrot.slane %v891_v51, 4  ;;  %v918_v2 = vshll.u32 %v726_v42, 16  ;;  %v3480_v35 = vpop.permute.xlu0 %1199  ;;  %v1523_v43 = vld [vmem:[#allocation2 + $0x54] sm:$0xe] }
  0xd7   : > { %v887_v60 = vsel %vm3264_vm14, %v882_v50, %v886_v39  ;;  %v2118_v0 = vsel %vm3258_vm13, %v2116_v53, %v2117_v45  ;;  %v910_v7 = vrot.slane %v908_v58, 5  ;;  %v914_v8 = vrot.slane %v912_v59, 4  ;;  %v3486_v45 = vpop.permute.xlu1 %1201  ;;  %v2936_v47 = vld [vmem:[#allocation2 + $0x54] sm:$0xff]   ;;  %v1525_v51 = vld [vmem:[#allocation2 + $0x5c] sm:$0x1] }
  0xd8   : > { %v2734_v5 = vcombine.low %v2115_v52, %v2118_v0  ;;  %v905_v6 = vor.u32 %v904_v56, %v901_v54  ;;  %v897_v11 = vsel %vm3264_vm14, %v892_v63, %v896_v44  ;;  %v920_v12 = vrot.slane %v918_v2, 5  ;;  %v1524_v44 = vld [vmem:[#allocation2 + $0x58] sm:$0xf]  ;;  %v1526_v58 = vld [vmem:[#allocation2 + $0x60] sm:$0xe] }
  0xd9   : > { %v2663_v13 = vrot.slane %v997_v48, 9  ;;  %v1074_v14 = vrot.slane %v998_v49, 5  ;;  %v2655_v16 = vcombine.low %v887_v60, %v897_v11  ;;  %v915_v18 = vor.u32 %v914_v8, %v910_v7  ;;  %v1527_v2 = vld [vmem:[#allocation2 + $0x64] sm:$0xf] }
  0xda   : > { %2167 = vrot.lane.b32.xlu0 %v2734_v5, %s3000_s30  ;;  %v906_v17 = vrot.slane %v905_v6, 4  ;;  %v1077_v19 = vrot.slane %v999_v3, 5  ;;  %v2664_v23 = vrot.slane %v1000_v4, 9  ;;  %v1081_v24 = vrot.slane %v1001_v9, 5  ;;  %v1528_v3 = vld [vmem:[#allocation2 + $0x68] sm:$0x1] }
  0xdb   : > { %v1075_v21 = vsel %vm3258_vm13, %v2663_v13, %v1074_v14  ;;  %v1076_v22 = vrot.slane %v1074_v14, 4  ;;  %958 = vrot.lane.b32.xlu1 %v2655_v16, %s2995_s22  ;;  %v916_v26 = vrot.slane %v915_v18, 4  ;;  %v1084_v27 = vrot.slane %v1002_v10, 5  ;;  %v2937_v4 = vld [vmem:[#allocation2 + $0x60] sm:$0xff]  }
  0xdc   : > { %v911_v25 = vsel %vm3264_vm14, %v906_v17, %v910_v7  ;;  %v1401_v28 = vshrl.u32 %v1250_v15, 16  ;;  %v1082_v30 = vsel %vm3258_vm13, %v2664_v23, %v1081_v24  ;;  %v1083_v31 = vrot.slane %v1081_v24, 4  ;;  %v2940_v23 = vld [vmem:[#allocation2] sm:$0xff]  }
  0xdd   : > { %v1078_v29 = vsel %vm3258_vm13, %v1076_v22, %v1077_v19  ;;  %v1404_v33 = vshll.u32 %v1250_v15, 16  ;;  %v921_v36 = vsel %vm3264_vm14, %v916_v26, %v920_v12  ;;  %v1410_v39 = vshll.u32 %v1251_v20, 16  ;;  %v3502_v24 = vld [vmem:[#allocation2 + $0x60] sm:$0xf]  ;;  %v2943_v26 = vld [vmem:[#allocation2 + $0x18] sm:$0xff]  }
  0xde   : > { %v2671_v37 = vcombine.low %v1075_v21, %v1078_v29  ;;  %v1403_v38 = vrot.slane %v1401_v28, 4  ;;  %v2656_v42 = vcombine.low %v911_v25, %v921_v36  ;;  %v1085_v57 = vsel %vm3258_vm13, %v1083_v31, %v1084_v27  ;;  %v2941_v25 = vld [vmem:[#allocation2 + $0xc] sm:$0xff]   ;;  %v2945_v27 = vld [vmem:[#allocation2 + $0x24] sm:$0xff]   ;;  %v2948_v29 = vld [vmem:[#allocation2 + $0x3c] sm:$0xff]  }
  0xdf   : > { %v1406_v62 = vrot.slane %v1404_v33, 5  ;;  %v1414_v1 = vshrl.u32 %v1251_v20, 16  ;;  %v2672_v46 = vcombine.low %v1082_v30, %v1085_v57  ;;  %v1412_v48 = vrot.slane %v1410_v39, 5  ;;  %v2947_v28 = vld [vmem:[#allocation2 + $0x30] sm:$0xff]   ;;  %v2949_v30 = vld [vmem:[#allocation2 + $0x48] sm:$0xff]  }
  0xe0   : > { %1122 = vrot.lane.b32.xlu0 %v2671_v37, %s2994_s21  ;;  %v1420_v49 = vshll.u32 %v1252_v32, 16  ;;  %v1425_v50 = vshrl.u32 %v1253_v34, 16  ;;  %960 = vrot.lane.b32.xlu1 %v2656_v42, %s2995_s22  ;;  %v1428_v54 = vshll.u32 %v1253_v34, 16  ;;  %v1434_v56 = vshll.u32 %v1254_v40, 16  ;;  %v1775_v36 = vld [vmem:[#allocation2 + $0x64] sm:$0xf] }
  0xe1   : > { %v1407_v52 = vor.u32 %v1406_v62, %v1403_v38  ;;  %v1416_v53 = vrot.slane %v1414_v1, 4  ;;  %v1438_v63 = vshrl.u32 %v1254_v40, 16  ;;  %v1444_v0 = vshll.u32 %v1255_v41, 16  ;;  %v3496_v18 = vpop.permute.xlu1 %1110  ;;  %v2950_v37 = vld [vmem:[#allocation2 + $0x54] sm:$0xff]   ;;  %v1776_v41 = vld [vmem:[#allocation2 + $0x68] sm:$0x1] }
  0xe2   : > { %v1422_v59 = vrot.slane %v1420_v49, 5  ;;  %v1427_v60 = vrot.slane %v1425_v50, 4  ;;  %v1430_v7 = vrot.slane %v1428_v54, 5  ;;  %v1436_v8 = vrot.slane %v1434_v56, 5  ;;  %v1777_v42 = vld [vmem:[#allocation2 + $0x6c] sm:$0xf] }
  0xe3   : > { %v1408_v5 = vrot.slane %v1407_v52, 4  ;;  %v1417_v6 = vor.u32 %v1416_v53, %v1412_v48  ;;  %v3490_v9 = vpop.permute.xlu0 %946  ;;  %v1440_v10 = vrot.slane %v1438_v63, 4  ;;  %v1446_v11 = vrot.slane %v1444_v0, 5  ;;  %v2938_v54 = vld [vmem:[#allocation2 + $0x60] sm:$0xff]  }
  0xe4   : > { %1211 = vrot.lane.b32.xlu0 %v2936_v47, %s2993_s12  ;;  %v2695_v12 = vrot.slane %v1523_v43, 9  ;;  %v1597_v13 = vrot.slane %v1524_v44, 5  ;;  %1124 = vrot.lane.b32.xlu1 %v2672_v46, %s2994_s21  ;;  %v1431_v16 = vor.u32 %v1430_v7, %v1427_v60  ;;  %v1600_v17 = vrot.slane %v1525_v51, 5  ;;  %v3516_v44 = vld [vmem:[#allocation2 + $0x70] sm:$0xf] }
  0xe5   : > { %v1413_v14 = vsel %vm3264_vm14, %v1408_v5, %v1412_v48  ;;  %v1418_v15 = vrot.slane %v1417_v6, 4  ;;  %v1441_v19 = vor.u32 %v1440_v10, %v1436_v8  ;;  %v2696_v22 = vrot.slane %v1526_v58, 9  ;;  %v1779_v60 = vld [vmem:[#allocation2 + $0x74] sm:$0x1] }
  0xe6   : > { %v3500_v20 = vsel %vm3258_vm13, %v2695_v12, %v1597_v13  ;;  %v1599_v21 = vrot.slane %v1597_v13, 4  ;;  %v1432_v32 = vrot.slane %v1431_v16, 4  ;;  %v1604_v33 = vrot.slane %v1527_v2, 5 }
  0xe7   : > { %v1423_v31 = vsel %vm3264_vm14, %v1418_v15, %v1422_v59  ;;  %v1607_v34 = vrot.slane %v1528_v3, 5  ;;  %v1442_v39 = vrot.slane %v1441_v19, 4  ;;  %vm970_vm15 = vcmask 64544  }
  0xe8   : > { %v2687_v38 = vcombine.low %v1413_v14, %v1423_v31  ;;  %v1601_v40 = vsel %vm3258_vm13, %v1599_v21, %v1600_v17  ;;  %1213 = vrot.lane.b32.xlu1 %v2937_v4, %s2993_s12  ;;  %v1437_v57 = vsel %vm3264_vm14, %v1432_v32, %v1436_v8  ;;  %v3514_v1 = vsel %vm3258_vm13, %v2696_v22, %v1604_v33  ;;  %v949_v46 = vpop.permute.xlu0 %948  ;;  %v1113_v52 = vpop.permute.xlu1 %1112  ;;  %v2047_v4 = vld [vmem:[#allocation2 + $0x60] sm:$0xe]  ;;  %v2049_v14 = vld [vmem:[#allocation2 + $0x68] sm:$0x1]  ;;  %v2939_v21 = vld [vmem:[#allocation2 + $0x6c] sm:$0xff]  }
  0xe9   : > { %v2703_v62 = vcombine.low %v3500_v20, %v1601_v40  ;;  %v1606_v43 = vrot.slane %v1604_v33, 4  ;;  %v1447_v47 = vsel %vm3264_vm14, %v1442_v39, %v1446_v11  ;;  %vm621_vm0 = vcmask 392480  }
  0xea   : > { %1484 = vrot.lane.b32.xlu0 %v2687_v38, %s2996_s23  ;;  %vm694_vm1 = vcmask 31744   ;;  %v2688_v48 = vcombine.low %v1437_v57, %v1447_v47  ;;  %v3001_v50 = vmov 0   ;;  %vm1134_vm2 = vcmask 97344  }
  0xeb   : > { %v1608_v49 = vsel %vm3258_vm13, %v1606_v43, %v1607_v34  ;;  %622 = vst.msk [vmem:[#allocation3] sm:$0xff] %vm621_vm0, %v3001_v50  ;;  %623 = vst.msk [vmem:[#allocation3 + $0x8] sm:$0xff] %vm621_vm0, %v3001_v50  ;;  %v1925_v51 = vshrl.u32 %v3502_v24, 16  ;;  %v1928_v56 = vshll.u32 %v3502_v24, 16  ;;  %v1934_v58 = vshll.u32 %v1775_v36, 16 }
  0xec   : > { %624 = vst.msk [vmem:[#allocation3 + $0x10] sm:$0xff] %vm621_vm0, %v3001_v50  ;;  %625 = vst.msk [vmem:[#allocation3 + $0x18] sm:$0xff] %vm621_vm0, %v3001_v50  ;;  %v2704_v53 = vcombine.low %v3514_v1, %v1608_v49  ;;  %v1938_v59 = vshrl.u32 %v1775_v36, 16  ;;  %1486 = vrot.lane.b32.xlu1 %v2688_v48, %s2996_s23  ;;  %v1944_v0 = vshll.u32 %v1776_v41, 16  ;;  %v1949_v2 = vshrl.u32 %v1777_v42, 16 }
  0xed   : > { %626 = vst.msk [vmem:[#allocation3 + $0x20] sm:$0xff] %vm621_vm0, %v3001_v50  ;;  %627 = vst.msk [vmem:[#allocation3 + $0x28] sm:$0xff] %vm621_vm0, %v3001_v50  ;;  %v1927_v63 = vrot.slane %v1925_v51, 4  ;;  %v1952_v3 = vshll.u32 %v1777_v42, 16  ;;  %v1930_v5 = vrot.slane %v1928_v56, 5  ;;  %v1936_v6 = vrot.slane %v1934_v58, 5 }
  0xee   : > { %628 = vst.msk [vmem:[#allocation3 + $0x30] sm:$0xff] %vm621_vm0, %v3001_v50  ;;  %629 = vst.msk [vmem:[#allocation3 + $0x38] sm:$0xff] %vm621_vm0, %v3001_v50  ;;  %1645 = vrot.lane.b32.xlu0 %v2703_v62, %s2997_s24  ;;  %v1940_v7 = vrot.slane %v1938_v59, 4  ;;  %v1958_v8 = vshll.u32 %v3516_v44, 16  ;;  %v1946_v10 = vrot.slane %v1944_v0, 5  ;;  %v1951_v11 = vrot.slane %v1949_v2, 4  ;;  %v1473_v15 = vpop.permute.xlu0 %1472 }
  0xef   : > { %695 = vst.msk [vmem:[#allocation3] sm:$0xff] %vm694_vm1, %v2940_v23  ;;  %696 = vst.msk [vmem:[#allocation3 + $0x8] sm:$0xff] %vm694_vm1, %v2941_v25  ;;  %v1954_v12 = vrot.slane %v1952_v3, 5  ;;  %v1962_v13 = vshrl.u32 %v3516_v44, 16  ;;  %v1931_v16 = vor.u32 %v1930_v5, %v1927_v63  ;;  %v1968_v20 = vshll.u32 %v1779_v60, 16 }
  0xf0   : > { %697 = vst.msk [vmem:[#allocation3 + $0x10] sm:$0xff] %vm694_vm1, %v2943_v26  ;;  %698 = vst.msk [vmem:[#allocation3 + $0x18] sm:$0xff] %vm694_vm1, %v2945_v27  ;;  %v1941_v17 = vor.u32 %v1940_v7, %v1936_v6  ;;  %v1960_v19 = vrot.slane %v1958_v8, 5  ;;  %1647 = vrot.lane.b32.xlu1 %v2704_v53, %s2997_s24  ;;  %v2727_v24 = vrot.slane %v2047_v4, 9  ;;  %v2051_v26 = vld [vmem:[#allocation2 + $0x70] sm:$0xf] }
  0xf1   : > { %699 = vst.msk [vmem:[#allocation3 + $0x20] sm:$0xff] %vm694_vm1, %v2947_v28  ;;  %700 = vst.msk [vmem:[#allocation3 + $0x28] sm:$0xff] %vm694_vm1, %v2948_v29  ;;  %v1955_v22 = vor.u32 %v1954_v12, %v1951_v11  ;;  %v1964_v23 = vrot.slane %v1962_v13, 4  ;;  %v1932_v27 = vrot.slane %v1931_v16, 4  ;;  %v1970_v29 = vrot.slane %v1968_v20, 5 }
  0xf2   : > { %701 = vst.msk [vmem:[#allocation3 + $0x30] sm:$0xff] %vm694_vm1, %v2949_v30  ;;  %702 = vst.msk [vmem:[#allocation3 + $0x38] sm:$0xff] %vm694_vm1, %v2950_v37  ;;  %1735 = vrot.lane.b32.xlu0 %v2938_v54, %s2998_s25  ;;  %v1942_v28 = vrot.slane %v1941_v17, 4  ;;  %v2124_v30 = vrot.slane %v2049_v14, 5  ;;  %v2052_v36 = vld [vmem:[#allocation2 + $0x74] sm:$0x1]  ;;  %v1634_v38 = vpop.permute.xlu0 %1633 }
  0xf3   : > { %971 = vst.msk [vmem:[#allocation3] sm:$0xff] %vm970_vm15, %v3490_v9  ;;  %972 = vst.msk [vmem:[#allocation3 + $0x8] sm:$0xff] %vm970_vm15, %v949_v46  ;;  %v2048_v9 = vld [vmem:[#allocation2 + $0x64] sm:$0xf]  ;;  %v1956_v31 = vrot.slane %v1955_v22, 4  ;;  %v1965_v32 = vor.u32 %v1964_v23, %v1960_v19  ;;  %v1475_v37 = vpop.permute.xlu1 %1474  ;;  %v1937_v39 = vsel %vm3264_vm14, %v1932_v27, %v1936_v6  ;;  %v2128_v42 = vrot.slane %v2051_v26, 5 }
  0xf4   : > { %1135 = vst.msk [vmem:[#allocation3] sm:$0xff] %vm1134_vm2, %v3496_v18  ;;  %1136 = vst.msk [vmem:[#allocation3 + $0x8] sm:$0xff] %vm1134_vm2, %v1113_v52  ;;  %v2050_v18 = vld [vmem:[#allocation2 + $0x6c] sm:$0xe]  ;;  %v2121_v25 = vrot.slane %v2048_v9, 5  ;;  %v1947_v40 = vsel %vm3264_vm14, %v1942_v28, %v1946_v10  ;;  %1737 = vrot.lane.b32.xlu1 %v2939_v21, %s2998_s25  ;;  %v2131_v48 = vrot.slane %v2052_v36, 5 }
  0xf5   : > { %v2728_v41 = vrot.slane %v2050_v18, 9  ;;  %v2719_v57 = vcombine.low %v1937_v39, %v1947_v40  ;;  %v1961_v62 = vsel %vm3264_vm14, %v1956_v31, %v1960_v19  ;;  %v1966_v1 = vrot.slane %v1965_v32, 4 }
  0xf6   : > { %v2122_v33 = vsel %vm3258_vm13, %v2727_v24, %v2121_v25  ;;  %v2123_v34 = vrot.slane %v2121_v25, 4  ;;  %v2130_v47 = vrot.slane %v2128_v42, 4  ;;  %vm1223_vm3 = vcmask 130144   ;;  %v1724_v51 = vpop.permute.xlu0 %1723 }
  0xf7   : > { %v2129_v46 = vsel %vm3258_vm13, %v2728_v41, %v2128_v42  ;;  %2008 = vrot.lane.b32.xlu0 %v2719_v57, %s2999_s27  ;;  %v1971_v49 = vsel %vm3264_vm14, %v1966_v1, %v1970_v29  ;;  %vm1496_vm4 = vcmask 162944   ;;  %vm1657_vm5 = vcmask 195744   ;;  %v1636_v50 = vpop.permute.xlu1 %1635  ;;  %1224 = vst.msk [vmem:[#allocation3] sm:$0xff] %vm1223_vm3, %v3480_v35  ;;  %1225 = vst.msk [vmem:[#allocation3 + $0x8] sm:$0xff] %vm1223_vm3, %v3486_v45 }
  0xf8   : > { %v2125_v43 = vsel %vm3258_vm13, %v2123_v34, %v2124_v30  ;;  %v2720_v52 = vcombine.low %v1961_v62, %v1971_v49  ;;  %v2132_v53 = vsel %vm3258_vm13, %v2130_v47, %v2131_v48  ;;  %vm1747_vm6 = vcmask 228544   ;;  %1497 = vst.msk [vmem:[#allocation3] sm:$0xff] %vm1496_vm4, %v1473_v15  ;;  %1498 = vst.msk [vmem:[#allocation3 + $0x8] sm:$0xff] %vm1496_vm4, %v1475_v37 }
  0xf9   : > { %v2735_v44 = vcombine.low %v2122_v33, %v2125_v43  ;;  %v2736_v61 = vcombine.low %v2129_v46, %v2132_v53  ;;  %1658 = vst.msk [vmem:[#allocation3] sm:$0xff] %vm1657_vm5, %v1634_v38  ;;  %1659 = vst.msk [vmem:[#allocation3 + $0x8] sm:$0xff] %vm1657_vm5, %v1636_v50  ;;  %vm2020_vm7 = vcmask 261344   ;;  %vm2181_vm8 = vcmask 294144  }
  0xfa   : > { %2010 = vrot.lane.b32.xlu1 %v2720_v52, %s2999_s27  ;;  %1748 = vst.msk [vmem:[#allocation3] sm:$0xff] %vm1747_vm6, %v1724_v51  ;;  %vm2222_vm9 = vcmask 392192  }
  0xfb   : > { %2169 = vrot.lane.b32.xlu0 %v2735_v44, %s3000_s30  ;;  %v1726_v55 = vpop.permute.xlu1 %1725  ;;  %v1997_v35 = vpop.permute.xlu0 %1996 }
  0xfc   : > { %1749 = vst.msk [vmem:[#allocation3 + $0x8] sm:$0xff] %vm1747_vm6, %v1726_v55 }
  0xfd   : > { %2021 = vst.msk [vmem:[#allocation3] sm:$0xff] %vm2020_vm7, %v1997_v35 }
  0xfe   : > { %2171 = vrot.lane.b32.xlu1 %v2736_v61, %s3000_s30 }
  0xff   : > { %v1999_v45 = vpop.permute.xlu1 %1998  ;;  %v2158_v54 = vpop.permute.xlu0 %2157 }
 0x100   : > { %2022 = vst.msk [vmem:[#allocation3 + $0x8] sm:$0xff] %vm2020_vm7, %v1999_v45 }
 0x101   : > { %2182 = vst.msk [vmem:[#allocation3] sm:$0xff] %vm2181_vm8, %v2158_v54 }
 0x104   : > { %v2160_v56 = vpop.permute.xlu0 %2159 }
 0x105   : > { %2183 = vst.msk [vmem:[#allocation3 + $0x8] sm:$0xff] %vm2181_vm8, %v2160_v56 }
 0x106   : > { %v951_v58 = vpop.permute.xlu1 %950 }
 0x107   : > { %973 = vst.msk [vmem:[#allocation3 + $0x10] sm:$0xff] %vm970_vm15, %v951_v58 }
 0x108   : > { %v2190_v59 = vld [vmem:[#allocation3] sm:$0xff] }
 0x109   : > { %2851 = vmatprep.mubr.msk.bf16.mxu0 %vm2222_vm9, %v2190_v59 }
 0x10a   : > { %v1115_v60 = vpop.permute.xlu0 %1114  ;;  %v953_v63 = vpop.permute.xlu1 %952 }
 0x10b   : > { %1137 = vst.msk [vmem:[#allocation3 + $0x10] sm:$0xff] %vm1134_vm2, %v1115_v60 }
 0x10c   : > { %974 = vst.msk [vmem:[#allocation3 + $0x18] sm:$0xff] %vm970_vm15, %v953_v63  ;;  %v2191_v0 = vld [vmem:[#allocation3 + $0x8] sm:$0xff] }
 0x10d   : > { %2852 = vmatmul.mubr.msk.bf16.vlgmr.msra.gmra.mrb[0].mxu0 %vm2222_vm9, %v2191_v0 }
 0x10e   : > { %v1204_v2 = vpop.permute.xlu0 %1203  ;;  %v1117_v3 = vpop.permute.xlu1 %1116 }
 0x10f   : > { %1226 = vst.msk [vmem:[#allocation3 + $0x10] sm:$0xff] %vm1223_vm3, %v1204_v2 }
 0x110   : > { %1138 = vst.msk [vmem:[#allocation3 + $0x18] sm:$0xff] %vm1134_vm2, %v1117_v3 }
 0x112   : > { %v1206_v4 = vpop.permute.xlu1 %1205 }
 0x113   : > { %1227 = vst.msk [vmem:[#allocation3 + $0x18] sm:$0xff] %vm1223_vm3, %v1206_v4 }
 0x114   : > { %v1477_v5 = vpop.permute.xlu0 %1476 }
 0x115   : > { %1499 = vst.msk [vmem:[#allocation3 + $0x10] sm:$0xff] %vm1496_vm4, %v1477_v5 }
 0x116   : > { %v1479_v6 = vpop.permute.xlu1 %1478 }
 0x117   : > { %1500 = vst.msk [vmem:[#allocation3 + $0x18] sm:$0xff] %vm1496_vm4, %v1479_v6 }
 0x118   : > { %v1638_v7 = vpop.permute.xlu0 %1637 }
 0x119   : > { %1660 = vst.msk [vmem:[#allocation3 + $0x10] sm:$0xff] %vm1657_vm5, %v1638_v7 }
 0x11a   : > { %v1640_v8 = vpop.permute.xlu1 %1639 }
 0x11b   : > { %1661 = vst.msk [vmem:[#allocation3 + $0x18] sm:$0xff] %vm1657_vm5, %v1640_v8 }
 0x11c   : > { %v1728_v9 = vpop.permute.xlu0 %1727 }
 0x11d   : > { %1750 = vst.msk [vmem:[#allocation3 + $0x10] sm:$0xff] %vm1747_vm6, %v1728_v9 }
 0x11e   : > { %v1730_v10 = vpop.permute.xlu1 %1729 }
 0x11f   : > { %1751 = vst.msk [vmem:[#allocation3 + $0x18] sm:$0xff] %vm1747_vm6, %v1730_v10 }
 0x120   : > { %v2001_v11 = vpop.permute.xlu0 %2000 }
 0x121   : > { %2023 = vst.msk [vmem:[#allocation3 + $0x10] sm:$0xff] %vm2020_vm7, %v2001_v11 }
 0x122   : > { %v2003_v12 = vpop.permute.xlu1 %2002 }
 0x123   : > { %2024 = vst.msk [vmem:[#allocation3 + $0x18] sm:$0xff] %vm2020_vm7, %v2003_v12 }
 0x124   : > { %v2162_v13 = vpop.permute.xlu0 %2161 }
 0x125   : > { %2184 = vst.msk [vmem:[#allocation3 + $0x10] sm:$0xff] %vm2181_vm8, %v2162_v13 }
 0x128   : > { %v2164_v14 = vpop.permute.xlu0 %2163 }
 0x129   : > { %2185 = vst.msk [vmem:[#allocation3 + $0x18] sm:$0xff] %vm2181_vm8, %v2164_v14  ;;  %v955_v15 = vpop.permute.xlu1 %954 }
 0x12a   : > { %975 = vst.msk [vmem:[#allocation3 + $0x20] sm:$0xff] %vm970_vm15, %v955_v15 }
 0x12c   : > { %v2192_v16 = vld [vmem:[#allocation3 + $0x10] sm:$0xff] }
 0x12d   : > { %2855 = vmatprep.mubr.msk.bf16.mxu0 %vm2222_vm9, %v2192_v16 }
 0x12e   : > { %v1119_v17 = vpop.permute.xlu0 %1118  ;;  %v957_v19 = vpop.permute.xlu1 %956 }
 0x12f   : > { %1139 = vst.msk [vmem:[#allocation3 + $0x20] sm:$0xff] %vm1134_vm2, %v1119_v17 }
 0x130   : > { %976 = vst.msk [vmem:[#allocation3 + $0x28] sm:$0xff] %vm970_vm15, %v957_v19  ;;  %v2193_v20 = vld [vmem:[#allocation3 + $0x18] sm:$0xff] }
 0x131   : > { %2856 = vmatmul.mubr.msk.bf16.gmra.mrb[4].mxu0 %vm2222_vm9, %v2193_v20 }
 0x132   : > { %v1208_v18 = vpop.permute.xlu0 %1207  ;;  %v1121_v21 = vpop.permute.xlu1 %1120 }
 0x133   : > { %1228 = vst.msk [vmem:[#allocation3 + $0x20] sm:$0xff] %vm1223_vm3, %v1208_v18 }
 0x134   : > { %1140 = vst.msk [vmem:[#allocation3 + $0x28] sm:$0xff] %vm1134_vm2, %v1121_v21 }
 0x136   : > { %v1210_v22 = vpop.permute.xlu1 %1209 }
 0x137   : > { %1229 = vst.msk [vmem:[#allocation3 + $0x28] sm:$0xff] %vm1223_vm3, %v1210_v22 }
 0x138   : > { %v1481_v23 = vpop.permute.xlu0 %1480 }
 0x139   : > { %1501 = vst.msk [vmem:[#allocation3 + $0x20] sm:$0xff] %vm1496_vm4, %v1481_v23 }
 0x13a   : > { %v1483_v24 = vpop.permute.xlu1 %1482 }
 0x13b   : > { %1502 = vst.msk [vmem:[#allocation3 + $0x28] sm:$0xff] %vm1496_vm4, %v1483_v24 }
 0x13c   : > { %v1642_v25 = vpop.permute.xlu0 %1641 }
 0x13d   : > { %1662 = vst.msk [vmem:[#allocation3 + $0x20] sm:$0xff] %vm1657_vm5, %v1642_v25 }
 0x13e   : > { %v1644_v26 = vpop.permute.xlu1 %1643 }
 0x13f   : > { %1663 = vst.msk [vmem:[#allocation3 + $0x28] sm:$0xff] %vm1657_vm5, %v1644_v26 }
 0x140   : > { %v1732_v27 = vpop.permute.xlu0 %1731 }
 0x141   : > { %1752 = vst.msk [vmem:[#allocation3 + $0x20] sm:$0xff] %vm1747_vm6, %v1732_v27 }
 0x142   : > { %v1734_v28 = vpop.permute.xlu1 %1733 }
 0x143   : > { %1753 = vst.msk [vmem:[#allocation3 + $0x28] sm:$0xff] %vm1747_vm6, %v1734_v28 }
 0x144   : > { %v2005_v29 = vpop.permute.xlu0 %2004 }
 0x145   : > { %2025 = vst.msk [vmem:[#allocation3 + $0x20] sm:$0xff] %vm2020_vm7, %v2005_v29 }
 0x146   : > { %v2007_v30 = vpop.permute.xlu1 %2006 }
 0x147   : > { %2026 = vst.msk [vmem:[#allocation3 + $0x28] sm:$0xff] %vm2020_vm7, %v2007_v30 }
 0x148   : > { %v2166_v31 = vpop.permute.xlu0 %2165 }
 0x149   : > { %2186 = vst.msk [vmem:[#allocation3 + $0x20] sm:$0xff] %vm2181_vm8, %v2166_v31 }
 0x14c   : > { %v2168_v32 = vpop.permute.xlu0 %2167 }
 0x14d   : > { %2187 = vst.msk [vmem:[#allocation3 + $0x28] sm:$0xff] %vm2181_vm8, %v2168_v32  ;;  %v959_v33 = vpop.permute.xlu1 %958 }
 0x14e   : > { %977 = vst.msk [vmem:[#allocation3 + $0x30] sm:$0xff] %vm970_vm15, %v959_v33 }
 0x150   : > { %v2194_v34 = vld [vmem:[#allocation3 + $0x20] sm:$0xff] }
 0x151   : > { %2859 = vmatprep.mubr.msk.bf16.mxu1 %vm2222_vm9, %v2194_v34 }
 0x152   : > { %v1123_v36 = vpop.permute.xlu0 %1122  ;;  %v961_v37 = vpop.permute.xlu1 %960 }
 0x153   : > { %1141 = vst.msk [vmem:[#allocation3 + $0x30] sm:$0xff] %vm1134_vm2, %v1123_v36 }
 0x154   : > { %978 = vst.msk [vmem:[#allocation3 + $0x38] sm:$0xff] %vm970_vm15, %v961_v37  ;;  %v2195_v38 = vld [vmem:[#allocation3 + $0x28] sm:$0xff] }
 0x155   : > { %2860 = vmatmul.mubr.msk.bf16.vlgmr.msra.gmra.mrb[0].mxu1 %vm2222_vm9, %v2195_v38 }
 0x156   : > { %v1212_v39 = vpop.permute.xlu0 %1211  ;;  %v1125_v40 = vpop.permute.xlu1 %1124 }
 0x157   : > { %1230 = vst.msk [vmem:[#allocation3 + $0x30] sm:$0xff] %vm1223_vm3, %v1212_v39 }
 0x158   : > { %1142 = vst.msk [vmem:[#allocation3 + $0x38] sm:$0xff] %vm1134_vm2, %v1125_v40 }
 0x15a   : > { %v1214_v41 = vpop.permute.xlu1 %1213 }
 0x15b   : > { %1231 = vst.msk [vmem:[#allocation3 + $0x38] sm:$0xff] %vm1223_vm3, %v1214_v41 }
 0x15c   : > { %v1485_v42 = vpop.permute.xlu0 %1484 }
 0x15d   : > { %1503 = vst.msk [vmem:[#allocation3 + $0x30] sm:$0xff] %vm1496_vm4, %v1485_v42 }
 0x15e   : > { %v1487_v57 = vpop.permute.xlu1 %1486 }
 0x15f   : > { %1504 = vst.msk [vmem:[#allocation3 + $0x38] sm:$0xff] %vm1496_vm4, %v1487_v57 }
 0x160   : > { %v1646_v62 = vpop.permute.xlu0 %1645 }
 0x161   : > { %1664 = vst.msk [vmem:[#allocation3 + $0x30] sm:$0xff] %vm1657_vm5, %v1646_v62 }
 0x162   : > { %v1648_v1 = vpop.permute.xlu1 %1647 }
 0x163   : > { %1665 = vst.msk [vmem:[#allocation3 + $0x38] sm:$0xff] %vm1657_vm5, %v1648_v1 }
 0x164   : > { %v1736_v43 = vpop.permute.xlu0 %1735 }
 0x165   : > { %1754 = vst.msk [vmem:[#allocation3 + $0x30] sm:$0xff] %vm1747_vm6, %v1736_v43 }
 0x166   : > { %v1738_v44 = vpop.permute.xlu1 %1737 }
 0x167   : > { %1755 = vst.msk [vmem:[#allocation3 + $0x38] sm:$0xff] %vm1747_vm6, %v1738_v44 }
 0x169   : > { %v2009_v46 = vpop.permute.xlu0 %2008 }
 0x16a   : > { %2027 = vst.msk [vmem:[#allocation3 + $0x30] sm:$0xff] %vm2020_vm7, %v2009_v46 }
 0x16c   : > { %v2011_v47 = vpop.permute.xlu1 %2010 }
 0x16d   : > { %2028 = vst.msk [vmem:[#allocation3 + $0x38] sm:$0xff] %vm2020_vm7, %v2011_v47  ;;  %v2170_v48 = vpop.permute.xlu0 %2169 }
 0x16e   : > { %2188 = vst.msk [vmem:[#allocation3 + $0x30] sm:$0xff] %vm2181_vm8, %v2170_v48 }
 0x170   : > { %v2172_v49 = vpop.permute.xlu1 %2171 }
 0x171   : > { %2189 = vst.msk [vmem:[#allocation3 + $0x38] sm:$0xff] %vm2181_vm8, %v2172_v49 }
 0x175   : > { %v2196_v50 = vld [vmem:[#allocation3 + $0x30] sm:$0xff] }
 0x176   : > { %2863 = vmatprep.mubr.msk.bf16.mxu1 %vm2222_vm9, %v2196_v50 }
 0x178   : > { %v2197_v51 = vld [vmem:[#allocation3 + $0x38] sm:$0xff] }
 0x179   : > { %2864 = vmatmul.mubr.msk.bf16.gmra.mrb[4].mxu1 %vm2222_vm9, %v2197_v51 }
 0x1e0   : > { %v2853_v52 = vpop.f32.mrb[0].mxu0 }
 0x1e1   : > { %v2281_v53 = vpop.f32.mrb[1].mxu0  ;;  %v2448_v59 = vmul.f32 %v2853_v52, %v2853_v52 }
 0x1e2   : > { %v2854_v61 = vpop.f32.mrb[2].mxu0  ;;  %v2446_v45 = vmul.f32 %v2281_v53, %v2281_v53 }
 0x1e3   : > { %v2795_v55 = vpack.c.bf16 %v2854_v61, %v2853_v52  ;;  %v2284_v35 = vpop.f32.mrb[3].mxu0  ;;  %v2449_v0 = vmul.f32 %v2854_v61, %v2854_v61 }
 0x1e4   : > { %v2790_v54 = vpack.c.bf16 %v2284_v35, %v2281_v53  ;;  %v2424_v56 = vadd.f32 %v2284_v35, %v2281_v53  ;;  %v2447_v58 = vmul.f32 %v2284_v35, %v2284_v35 }
 0x1e5   : > { %2827 = vst [vmem:[%s3134_s10 + $0x8] sm:$0xff] %v2795_v55  }
 0x1e6   : > { %2791 = vst [vmem:[%s3134_s10] sm:$0xff] %v2790_v54   ;;  %v2425_v60 = vadd.f32 %v2853_v52, %v2424_v56  ;;  %v2462_v63 = vadd.f32 %v2447_v58, %v2446_v45 }
 0x1e8   : > { %v2463_v2 = vadd.f32 %v2462_v63, %v2448_v59  ;;  %v2426_v3 = vadd.f32 %v2854_v61, %v2425_v60 }
 0x1ea   : > { %v2464_v4 = vadd.f32 %v2463_v2, %v2449_v0 }
 0x204   : > { %v2857_v5 = vpop.f32.mrb[4].mxu0 }
 0x205   : > { %v2297_v6 = vpop.f32.mrb[5].mxu0  ;;  %v2452_v16 = vmul.f32 %v2857_v5, %v2857_v5 }
 0x206   : > { %v2427_v7 = vadd.f32 %v2426_v3, %v2297_v6  ;;  %v2450_v8 = vmul.f32 %v2297_v6, %v2297_v6  ;;  %v2858_v9 = vpop.f32.mrb[6].mxu0 }
 0x207   : > { %v2805_v10 = vpack.c.bf16 %v2858_v9, %v2857_v5  ;;  %v2300_v11 = vpop.f32.mrb[7].mxu0  ;;  %v2453_v20 = vmul.f32 %v2858_v9, %v2858_v9 }
 0x208   : > { %v2465_v12 = vadd.f32 %v2464_v4, %v2450_v8  ;;  %v2800_v13 = vpack.c.bf16 %v2300_v11, %v2297_v6  ;;  %v2428_v14 = vadd.f32 %v2427_v7, %v2300_v11  ;;  %v2451_v15 = vmul.f32 %v2300_v11, %v2300_v11 }
 0x209   : > { %2829 = vst [vmem:[%s3134_s10 + $0x18] sm:$0xff] %v2805_v10  }
 0x20a   : > { %2828 = vst [vmem:[%s3134_s10 + $0x10] sm:$0xff] %v2800_v13   ;;  %v2429_v17 = vadd.f32 %v2857_v5, %v2428_v14  ;;  %v2466_v19 = vadd.f32 %v2465_v12, %v2451_v15 }
 0x20c   : > { %v2467_v18 = vadd.f32 %v2466_v19, %v2452_v16  ;;  %v2430_v21 = vadd.f32 %v2858_v9, %v2429_v17 }
 0x20e   : > { %v2468_v22 = vadd.f32 %v2467_v18, %v2453_v20 }
 0x228   : > { %v2861_v23 = vpop.f32.mrb[0].mxu1 }
 0x229   : > { %v2313_v24 = vpop.f32.mrb[1].mxu1  ;;  %v2456_v34 = vmul.f32 %v2861_v23, %v2861_v23 }
 0x22a   : > { %v2431_v25 = vadd.f32 %v2430_v21, %v2313_v24  ;;  %v2454_v26 = vmul.f32 %v2313_v24, %v2313_v24  ;;  %v2862_v27 = vpop.f32.mrb[2].mxu1 }
 0x22b   : > { %v2815_v28 = vpack.c.bf16 %v2862_v27, %v2861_v23  ;;  %v2316_v29 = vpop.f32.mrb[3].mxu1  ;;  %v2457_v38 = vmul.f32 %v2862_v27, %v2862_v27 }
 0x22c   : > { %v2469_v30 = vadd.f32 %v2468_v22, %v2454_v26  ;;  %v2810_v31 = vpack.c.bf16 %v2316_v29, %v2313_v24  ;;  %v2432_v32 = vadd.f32 %v2431_v25, %v2316_v29  ;;  %v2455_v33 = vmul.f32 %v2316_v29, %v2316_v29 }
 0x22d   : > { %2831 = vst [vmem:[%s3134_s10 + $0x28] sm:$0xff] %v2815_v28  }
 0x22e   : > { %2830 = vst [vmem:[%s3134_s10 + $0x20] sm:$0xff] %v2810_v31   ;;  %v2433_v36 = vadd.f32 %v2861_v23, %v2432_v32  ;;  %v2470_v37 = vadd.f32 %v2469_v30, %v2455_v33 }
 0x230   : > { %v2471_v39 = vadd.f32 %v2470_v37, %v2456_v34  ;;  %v2434_v40 = vadd.f32 %v2862_v27, %v2433_v36 }
 0x232   : > { %v2472_v41 = vadd.f32 %v2471_v39, %v2457_v38 }
 0x24c   : > { %v2865_v42 = vpop.f32.mrb[4].mxu1 }
 0x24d   : > { %v2329_v57 = vpop.f32.mrb[5].mxu1  ;;  %v2460_v51 = vmul.f32 %v2865_v42, %v2865_v42 }
 0x24e   : > { %v2435_v62 = vadd.f32 %v2434_v40, %v2329_v57  ;;  %v2458_v1 = vmul.f32 %v2329_v57, %v2329_v57  ;;  %v2866_v43 = vpop.f32.mrb[6].mxu1 }
 0x24f   : > { %v2825_v44 = vpack.c.bf16 %v2866_v43, %v2865_v42  ;;  %v2332_v46 = vpop.f32.mrb[7].mxu1  ;;  %v2461_v61 = vmul.f32 %v2866_v43, %v2866_v43 }
 0x250   : > { %v2473_v47 = vadd.f32 %v2472_v41, %v2458_v1  ;;  %v2820_v48 = vpack.c.bf16 %v2332_v46, %v2329_v57  ;;  %v2436_v49 = vadd.f32 %v2435_v62, %v2332_v46  ;;  %v2459_v50 = vmul.f32 %v2332_v46, %v2332_v46 }
 0x251   : > { %2833 = vst [vmem:[%s3134_s10 + $0x38] sm:$0xff] %v2825_v44  }
 0x252   : > { %2832 = vst [vmem:[%s3134_s10 + $0x30] sm:$0xff] %v2820_v48   ;;  %v2437_v52 = vadd.f32 %v2865_v42, %v2436_v49  ;;  %v2474_v53 = vadd.f32 %v2473_v47, %v2459_v50 }
 0x254   : > { %v2438_v55 = vadd.f32 %v2866_v43, %v2437_v52  ;;  %v2475_v35 = vadd.f32 %v2474_v53, %v2460_v51 }
 0x256   : > { %v2439_v45 = vrot.slane %v2438_v55, 4  ;;  %v2476_v54 = vadd.f32 %v2475_v35, %v2461_v61 }
 0x258   : > { %v2440_v56 = vadd.f32 %v2439_v45, %v2438_v55  ;;  %v2477_v58 = vrot.slane %v2476_v54, 4 }
 0x25a   : > { %v2441_v59 = vrot.slane %v2440_v56, 2  ;;  %v2478_v60 = vadd.f32 %v2477_v58, %v2476_v54 }
 0x25c   : > { %v2442_v63 = vadd.f32 %v2441_v59, %v2440_v56  ;;  %v2479_v0 = vrot.slane %v2478_v60, 2 }
 0x25e   : > { %v2443_v2 = vrot.slane %v2442_v63, 1  ;;  %v2480_v3 = vadd.f32 %v2479_v0, %v2478_v60 }
 0x260   : > { %v2444_v4 = vadd.f32 %v2443_v2, %v2442_v63  ;;  %v2481_v5 = vrot.slane %v2480_v3, 1 }
 0x262   : > { %2445 = vst [vmem:[%s3120_s26] sm:$0x1] %v2444_v4  ;;  %v2482_v6 = vadd.f32 %v2481_v5, %v2480_v3 }
 0x264   : > { %2483 = vst [vmem:[%s3120_s26 + $0x1] sm:$0x1] %v2482_v6 }
 0x265 PF: > { %s14_s16 = sadd.s32 1, %s2989_s16   ;;  %s3678_s12 = smov %s2981_s14 }
 0x266   : > { %p11_p12 = scmp.ge.s32.totalorder %s14_s16, 6   ;;  %s3679_s13 = smov %s2985_s15 }
 0x267   : > { %s3680_s14 = smov %s3683_s17  ;;  %s3681_s15 = smov %s3687_s18 }
 0x268   :  { %13 = sbr.rel (!%p11_p12) target bundleno = 3 (0x3), region = 93 }

</bundles_post_ra>
